<compile_context>
chip_gen: v5e
topology: v5e:2x2
jax: 0.10.0
libtpu: 0.0.40
codegen_flags: <defaults>
</compile_context>

<pallas_src>
import jax
import jax.numpy as jnp
import numpy as np
from jax.experimental import pallas as pl
from jax.experimental.pallas import tpu as pltpu

# ---- module hyper-parameters (match the torch __init__ args) ----
D = 2                    # stalk dimension d
IN_CH = 32               # in_channels
OUT_DIM = D * D          # d**2
TE = 256                 # edge tile size for the Pallas grid


def attention_sheaf_kernel(xr_ref, xc_ref, w_ref, out_ref):
    """xr_ref/xc_ref: (TE, C); w_ref: (2C, d*d); out_ref: (TE, d*d)."""
    cin = xr_ref.shape[1]
    te = xr_ref.shape[0]

    # Linear over the virtual concat [x_row | x_col] without materializing it:
    # split the weight rows (static ref slices are free).
    maps = (jnp.dot(xr_ref[...], w_ref[:cin, :], preferred_element_type=jnp.float32)
            + jnp.dot(xc_ref[...], w_ref[cin:, :], preferred_element_type=jnp.float32))

    # Row-wise softmax over each d-wide group (== softmax over dim=-1 of (E, d, d)),
    # then I_d - softmax. Hoist the lane iota out of the (static, D-long) loop,
    # assemble the full (TE, d*d) tile, and store once.
    lane = jax.lax.broadcasted_iota(jnp.int32, (te, D), 1)
    outs = []
    for j in range(D):
        blk = maps[:, j * D:(j + 1) * D]                              # (TE, d)
        m = jnp.max(blk, axis=-1, keepdims=True)
        e = jnp.exp(blk - m)
        sm = e / jnp.sum(e, axis=-1, keepdims=True)
        id_row = jnp.where(lane == j, 1.0, 0.0).astype(jnp.float32)   # j-th row of I_d
        outs.append(id_row - sm)
    out_ref[...] = jnp.concatenate(outs, axis=-1)


def attention_sheaf(x, edge_index, weight, te=TE):
    """x: (N, C) f32; edge_index: (2, E) int32; weight: (2C, d*d) f32 (stored in->out).
    Returns (E, d, d) f32."""
    row, col = edge_index[0], edge_index[1]
    E = row.shape[0]
    C = x.shape[1]

    # Pad E to a multiple of the edge tile; padded edges point at valid node 0 and
    # the corresponding output rows are sliced off at the end.
    E_pad = pl.cdiv(E, te) * te
    if E_pad != E:
        pad = E_pad - E
        row = jnp.concatenate([row, jnp.zeros((pad,), row.dtype)])
        col = jnp.concatenate([col, jnp.zeros((pad,), col.dtype)])

    # Two full-width gathers (torch.index_select equivalents) — glue outside the kernel.
    xr = jnp.take(x, row, axis=0)   # (E_pad, C)
    xc = jnp.take(x, col, axis=0)   # (E_pad, C)

    grid = (E_pad // te,)

    cost = pl.CostEstimate(
        flops=2 * E_pad * (2 * C) * OUT_DIM,
        transcendentals=E_pad * OUT_DIM,
        bytes_accessed=(2 * E_pad * C + E_pad * OUT_DIM + 2 * C * OUT_DIM) * 4,
    )

    maps_flat = pl.pallas_call(
        attention_sheaf_kernel,
        out_shape=jax.ShapeDtypeStruct((E_pad, OUT_DIM), jnp.float32),
        grid=grid,
        in_specs=[pl.BlockSpec((te, C), lambda i: (i, 0)),
                  pl.BlockSpec((te, C), lambda i: (i, 0)),
                  pl.BlockSpec((2 * C, OUT_DIM), lambda i: (0, 0))],
        out_specs=pl.BlockSpec((te, OUT_DIM), lambda i: (i, 0)),
        compiler_params=pltpu.CompilerParams(dimension_semantics=("parallel",)),
        cost_estimate=cost,
    )(xr, xc, weight)

    return maps_flat[:E].reshape((E, D, D))


def reference(x, edge_index, weight):
    """Pure-JAX mirror of the torch forward (for correctness checking)."""
    row, col = edge_index[0], edge_index[1]
    x_cat = jnp.concatenate([x[row], x[col]], axis=-1)
    maps = jnp.dot(x_cat, weight).reshape(-1, D, D)
    eye = jnp.eye(D, dtype=maps.dtype)[None]
    return eye - jax.nn.softmax(maps, axis=-1)


def init_weight(key, in_channels):
    """torch.nn.Linear(in_channels*2, d*d, bias=False) default init, stored as (in, out)."""
    fan_in = 2 * in_channels
    bound = 1.0 / np.sqrt(fan_in)
    return jax.random.uniform(key, (fan_in, OUT_DIM), jnp.float32, -bound, bound)


if __name__ == "__main__":
    key = jax.random.PRNGKey(0)
    k_x, k_e, k_w = jax.random.split(key, 3)

    N = 64            # nodes
    E = 500           # edges (non-multiple of TE to exercise the padding path; grid = 2)
    x = jax.random.normal(k_x, (N, IN_CH), jnp.float32)
    edge_index = jax.random.randint(k_e, (2, E), 0, N, dtype=jnp.int32)
    weight = init_weight(k_w, IN_CH)

    maps = attention_sheaf(x, edge_index, weight)
    maps = jax.block_until_ready(maps)

    ref = reference(x, edge_index, weight)
    np.testing.assert_allclose(np.asarray(maps), np.asarray(ref), rtol=1e-5, atol=1e-5)

    print("KERNEL_OK")
</pallas_src>

<mosaic_0001>
module attributes {stable_mosaic.version = 11 : i64} {
  func.func @attention_sheaf_kernel(%arg0: i32, %arg1: memref<256x32xf32, #tpu.memory_space<vmem>>, %arg2: memref<256x32xf32, #tpu.memory_space<vmem>>, %arg3: memref<64x4xf32, #tpu.memory_space<vmem>>, %arg4: memref<256x4xf32, #tpu.memory_space<vmem>>) attributes {dimension_semantics = [#tpu.dimension_semantics<parallel>], iteration_bounds = array<i64: 2>, scalar_prefetch = 0 : i64, scratch_operands = 0 : i64, tpu.core_type = #tpu.core_type<tc>, window_params = [{transform_indices = @transform_0, window_bounds = array<i64: 256, 32>}, {transform_indices = @transform_1, window_bounds = array<i64: 256, 32>}, {pipeline_mode = #tpu.pipeline_mode<synchronous>, transform_indices = @transform_2, window_bounds = array<i64: 64, 4>}, {transform_indices = @transform_3, window_bounds = array<i64: 256, 4>}]} {
    %c0 = arith.constant 0 : index
    %c0_0 = arith.constant 0 : index
    %0 = vector.load %arg1[%c0, %c0_0] : memref<256x32xf32, #tpu.memory_space<vmem>>, vector<256x32xf32>
    %c0_1 = arith.constant 0 : index
    %c0_2 = arith.constant 0 : index
    %1 = vector.load %arg3[%c0_1, %c0_2] : memref<64x4xf32, #tpu.memory_space<vmem>>, vector<32x4xf32>
    %cst = arith.constant dense<0.000000e+00> : vector<256x4xf32>
    %2 = tpu.matmul %0, %1, %cst {dimension_numbers = #tpu.dot_dimension_numbers<[1], [0], [0], [1], [0, 0, 1, 1], [], []>} : vector<256x32xf32>, vector<32x4xf32>, vector<256x4xf32> -> vector<256x4xf32>
    %c0_3 = arith.constant 0 : index
    %c0_4 = arith.constant 0 : index
    %3 = vector.load %arg2[%c0_3, %c0_4] : memref<256x32xf32, #tpu.memory_space<vmem>>, vector<256x32xf32>
    %c32 = arith.constant 32 : index
    %c0_5 = arith.constant 0 : index
    %4 = vector.load %arg3[%c32, %c0_5] : memref<64x4xf32, #tpu.memory_space<vmem>>, vector<32x4xf32>
    %cst_6 = arith.constant dense<0.000000e+00> : vector<256x4xf32>
    %5 = tpu.matmul %3, %4, %cst_6 {dimension_numbers = #tpu.dot_dimension_numbers<[1], [0], [0], [1], [0, 0, 1, 1], [], []>} : vector<256x32xf32>, vector<32x4xf32>, vector<256x4xf32> -> vector<256x4xf32>
    %6 = arith.addf %2, %5 : vector<256x4xf32>
    %7 = tpu.iota {dimensions = array<i32: 1>} : vector<256x2xi32>
    %8 = vector.extract_strided_slice %6 {offsets = [0, 0], sizes = [256, 2], strides = [1, 1]} : vector<256x4xf32> to vector<256x2xf32>
    %cst_7 = arith.constant dense<0xFF800000> : vector<256xf32>
    %9 = vector.multi_reduction <maximumf>, %8, %cst_7 [1] : vector<256x2xf32> to vector<256xf32>
    %10 = vector.shape_cast %9 : vector<256xf32> to vector<256x1xf32>
    %11 = vector.broadcast %10 : vector<256x1xf32> to vector<256x2xf32>
    %12 = arith.subf %8, %11 : vector<256x2xf32>
    %13 = math.exp %12 : vector<256x2xf32>
    %cst_8 = arith.constant dense<0.000000e+00> : vector<256xf32>
    %14 = vector.multi_reduction <add>, %13, %cst_8 [1] : vector<256x2xf32> to vector<256xf32>
    %15 = vector.shape_cast %14 : vector<256xf32> to vector<256x1xf32>
    %16 = vector.broadcast %15 : vector<256x1xf32> to vector<256x2xf32>
    %17 = arith.divf %13, %16 : vector<256x2xf32>
    %c0_i32 = arith.constant 0 : i32
    %18 = vector.broadcast %c0_i32 : i32 to vector<256x2xi32>
    %19 = arith.cmpi eq, %7, %18 : vector<256x2xi32>
    %cst_9 = arith.constant 1.000000e+00 : f32
    %cst_10 = arith.constant 0.000000e+00 : f32
    %20 = vector.broadcast %cst_9 : f32 to vector<256x2xf32>
    %21 = vector.broadcast %cst_10 : f32 to vector<256x2xf32>
    %22 = arith.select %19, %20, %21 : vector<256x2xi1>, vector<256x2xf32>
    %23 = arith.subf %22, %17 : vector<256x2xf32>
    %24 = vector.extract_strided_slice %6 {offsets = [0, 2], sizes = [256, 2], strides = [1, 1]} : vector<256x4xf32> to vector<256x2xf32>
    %cst_11 = arith.constant dense<0xFF800000> : vector<256xf32>
    %25 = vector.multi_reduction <maximumf>, %24, %cst_11 [1] : vector<256x2xf32> to vector<256xf32>
    %26 = vector.shape_cast %25 : vector<256xf32> to vector<256x1xf32>
    %27 = vector.broadcast %26 : vector<256x1xf32> to vector<256x2xf32>
    %28 = arith.subf %24, %27 : vector<256x2xf32>
    %29 = math.exp %28 : vector<256x2xf32>
    %cst_12 = arith.constant dense<0.000000e+00> : vector<256xf32>
    %30 = vector.multi_reduction <add>, %29, %cst_12 [1] : vector<256x2xf32> to vector<256xf32>
    %31 = vector.shape_cast %30 : vector<256xf32> to vector<256x1xf32>
    %32 = vector.broadcast %31 : vector<256x1xf32> to vector<256x2xf32>
    %33 = arith.divf %29, %32 : vector<256x2xf32>
    %c1_i32 = arith.constant 1 : i32
    %34 = vector.broadcast %c1_i32 : i32 to vector<256x2xi32>
    %35 = arith.cmpi eq, %7, %34 : vector<256x2xi32>
    %cst_13 = arith.constant 1.000000e+00 : f32
    %cst_14 = arith.constant 0.000000e+00 : f32
    %36 = vector.broadcast %cst_13 : f32 to vector<256x2xf32>
    %37 = vector.broadcast %cst_14 : f32 to vector<256x2xf32>
    %38 = arith.select %35, %36, %37 : vector<256x2xi1>, vector<256x2xf32>
    %39 = arith.subf %38, %33 : vector<256x2xf32>
    %40 = tpu.concatenate %23, %39 in 1 : vector<256x2xf32>, vector<256x2xf32> -> vector<256x4xf32>
    %c0_15 = arith.constant 0 : index
    %c0_16 = arith.constant 0 : index
    %41 = vector.load %arg4[%c0_15, %c0_16] : memref<256x4xf32, #tpu.memory_space<vmem>>, vector<256x4xf32>
    tpu.vector_store %arg4[%c0_15, %c0_16], %40 {strides = array<i32>} : memref<256x4xf32, #tpu.memory_space<vmem>>, vector<256x4xf32>,
    return
  }
  func.func @transform_0(%arg0: i32) -> (i32, i32) {
    %c0_i32 = arith.constant 0 : i32
    %c0_i32_0 = arith.constant 0 : i32
    return %arg0, %c0_i32 : i32, i32
  }
  func.func @transform_1(%arg0: i32) -> (i32, i32) {
    %c0_i32 = arith.constant 0 : i32
    %c0_i32_0 = arith.constant 0 : i32
    return %arg0, %c0_i32 : i32, i32
  }
  func.func @transform_2(%arg0: i32) -> (i32, i32) {
    %c0_i32 = arith.constant 0 : i32
    %c0_i32_0 = arith.constant 0 : i32
    %c0_i32_1 = arith.constant 0 : i32
    return %c0_i32, %c0_i32_0 : i32, i32
  }
  func.func @transform_3(%arg0: i32) -> (i32, i32) {
    %c0_i32 = arith.constant 0 : i32
    %c0_i32_0 = arith.constant 0 : i32
    return %arg0, %c0_i32 : i32, i32
  }
}

</mosaic_0001>

<bundles_post_ra>
// kernel: tpu_custom_call.1
= control target key start
LH: loop header
LB: loop body
LE: loop exit
PB: predicated region body
PF: predicated region fallthrough
CT: control target
= control target key end

     0   :  { %s3195_s12 = smov 0   ;;  %s5270_s0 = inlined_call_operand.vmem [shape: f32[512,32], index: 0, kind: input, shape index: {}]   ;;  %s5271_s1 = inlined_call_operand.vmem [shape: f32[512,32], index: 1, kind: input, shape index: {}]   ;;  %s5272_s2 = inlined_call_operand.vmem [shape: f32[64,4], index: 2, kind: input, shape index: {}]   ;;  %s5273_s3 = inlined_call_operand.vmem [shape: f32[512,4], index: 3, kind: output, shape index: {}]  }
   0x1 LB: > { %s2812_s13 = sadd.s32 4294967295, %s3170_s12   ;;  %p2816_p0 = scmp.ge.s32.totalorder %s3170_s12, 1  ;;  %s3170_s12 = sphi %s3195_s12, %s13_s12  }
   0x2   : > { %p149_p1 = scmp.lt.s32.totalorder %s3170_s12, 3 }
   0x4   : > { %p150_p2 = pnand %p2816_p0, %p149_p1 }
   0x6   : > { %153 = sbr.rel (%p150_p2) target bundleno = 1388 (0x56c), region = 32 }
   0xb   : > { %v267_v0 = vld [vmem:[%s5272_s2 + $0x38] sm:$0xff]  ;;  %v266_v2 = vld [vmem:[%s5272_s2 + $0x30] sm:$0xff]  ;;  %s2817_s20 = sshll.u32 %s2812_s13, 5  ;;  %v265_v4 = vld [vmem:[%s5272_s2 + $0x28] sm:$0xff]  ;;  %vm268_vm0 = vcmask 261120   ;;  %vm1492_vm1 = vcmask 31760  }
   0xc   : > { %v231_v1 = vld [vmem:[%s5272_s2 + $0x18] sm:$0xff]  ;;  %377 = vmatpush.msra.mxu0 %v267_v0  ;;  %2889 = vmatpush.msra.mxu2 %v267_v0  ;;  %v230_v3 = vld [vmem:[%s5272_s2 + $0x10] sm:$0xff]  ;;  %p179_p3 = scmp.lt.s32.totalorder %s2817_s20, 63  ;;  %v229_v5 = vld [vmem:[%s5272_s2 + $0x8] sm:$0xff]  ;;  %vm689_vm2 = vcmask 15360   ;;  %s3172_s11 = smov 126  }
   0xd   : > { %586 = vmatpush.msra.mxu1 %v231_v1  ;;  %2893 = vmatpush.msra.mxu3 %v231_v1  ;;  %v264_v6 = vld [vmem:[%s5272_s2 + $0x20] sm:$0xff]  ;;  %s3174_s13 = smov 2  }
   0xe   : > { %378 = vmatpush.msra.mxu0 %v266_v2  ;;  %2890 = vmatpush.msra.mxu2 %v266_v2  ;;  %s5549_s20 = smov (!%p179_p3, %s2817_s20), 63  ;;  %v228_v7 = vld [vmem:[%s5272_s2] sm:$0xff] }
   0xf   : > { %587 = vmatpush.msra.mxu1 %v230_v3  ;;  %2894 = vmatpush.msra.mxu3 %v230_v3  ;;  %s3227_s4 = sshll.u32 %s5549_s20, 3 }
  0x10   : > { %379 = vmatpush.msra.mxu0 %v265_v4  ;;  %2891 = vmatpush.msra.mxu2 %v265_v4  ;;  %s3233_s7 = scalar_lea.vmem %s5271_s1, %s3227_s4  ;;  %s3239_s10 = scalar_lea.vmem %s5270_s0, %s3227_s4 }
  0x11   : > { %588 = vmatpush.msra.mxu1 %v229_v5  ;;  %2895 = vmatpush.msra.mxu3 %v229_v5  ;;  %v232_v8 = vld [vmem:[%s3233_s7] sm:$0xff]  ;;  %v233_v12 = vld [vmem:[%s3233_s7 + $0x8] sm:$0xff]  ;;  %v234_v16 = vld [vmem:[%s3233_s7 + $0x10] sm:$0xff]  ;;  %s4628_s16 = scalar_lea.vmem %s5273_s3, %s3227_s4 }
  0x12   : > { %380 = vmatpush.msra.mxu0 %v264_v6  ;;  %2892 = vmatpush.msra.mxu2 %v264_v6  ;;  %v248_v9 = vld [vmem:[%s3233_s7 + $0x80] sm:$0xff]  ;;  %v249_v13 = vld [vmem:[%s3233_s7 + $0x88] sm:$0xff]  ;;  %v250_v17 = vld [vmem:[%s3233_s7 + $0x90] sm:$0xff] }
  0x13   : > { %v196_v10 = vld [vmem:[%s3239_s10] sm:$0xff]  ;;  %589 = vmatpush.msra.mxu1 %v228_v7  ;;  %2896 = vmatpush.msra.mxu3 %v228_v7  ;;  %v197_v14 = vld [vmem:[%s3239_s10 + $0x8] sm:$0xff]  ;;  %v198_v18 = vld [vmem:[%s3239_s10 + $0x10] sm:$0xff] }
  0x14   : > { %v212_v11 = vld [vmem:[%s3239_s10 + $0x80] sm:$0xff]  ;;  %2823 = vmatmul.msk.f32.vlgmr.msra.gmra.mxu0 %vm268_vm0, %v232_v8  ;;  %2839 = vmatmul.msk.f32.vlgmr.msra.gmra.mxu2 %vm268_vm0, %v248_v9  ;;  %v213_v15 = vld [vmem:[%s3239_s10 + $0x88] sm:$0xff]  ;;  %v214_v19 = vld [vmem:[%s3239_s10 + $0x90] sm:$0xff] }
  0x15   : > { %2855 = vmatmul.msk.f32.vlgmr.msra.gmra.mxu1 %vm268_vm0, %v196_v10  ;;  %2871 = vmatmul.msk.f32.vlgmr.msra.gmra.mxu3 %vm268_vm0, %v212_v11  ;;  %v251_v20 = vld [vmem:[%s3233_s7 + $0x98] sm:$0xff]  ;;  %v252_v24 = vld [vmem:[%s3233_s7 + $0xa0] sm:$0xff]  ;;  %v237_v28 = vld [vmem:[%s3233_s7 + $0x28] sm:$0xff] }
  0x16   : > { %v235_v21 = vld [vmem:[%s3233_s7 + $0x18] sm:$0xff]  ;;  %v236_v25 = vld [vmem:[%s3233_s7 + $0x20] sm:$0xff]  ;;  %v253_v29 = vld [vmem:[%s3233_s7 + $0xa8] sm:$0xff] }
  0x17   : > { %v215_v22 = vld [vmem:[%s3239_s10 + $0x98] sm:$0xff]  ;;  %v216_v26 = vld [vmem:[%s3239_s10 + $0xa0] sm:$0xff]  ;;  %v201_v30 = vld [vmem:[%s3239_s10 + $0x28] sm:$0xff] }
  0x18   : > { %v199_v23 = vld [vmem:[%s3239_s10 + $0x18] sm:$0xff]  ;;  %v200_v27 = vld [vmem:[%s3239_s10 + $0x20] sm:$0xff]  ;;  %v217_v31 = vld [vmem:[%s3239_s10 + $0xa8] sm:$0xff] }
  0x19   : > { %v254_v32 = vld [vmem:[%s3233_s7 + $0xb0] sm:$0xff]  ;;  %v255_v36 = vld [vmem:[%s3233_s7 + $0xb8] sm:$0xff]  ;;  %v240_v40 = vld [vmem:[%s3233_s7 + $0x40] sm:$0xff] }
  0x1a   : > { %v238_v33 = vld [vmem:[%s3233_s7 + $0x30] sm:$0xff]  ;;  %v239_v37 = vld [vmem:[%s3233_s7 + $0x38] sm:$0xff]  ;;  %v256_v41 = vld [vmem:[%s3233_s7 + $0xc0] sm:$0xff] }
  0x1b   : > { %v218_v34 = vld [vmem:[%s3239_s10 + $0xb0] sm:$0xff]  ;;  %v219_v38 = vld [vmem:[%s3239_s10 + $0xb8] sm:$0xff]  ;;  %v204_v42 = vld [vmem:[%s3239_s10 + $0x40] sm:$0xff] }
  0x1c   : > { %2824 = vmatmul.msk.f32.gmra.mxu0 %vm268_vm0, %v233_v12  ;;  %2840 = vmatmul.msk.f32.gmra.mxu2 %vm268_vm0, %v249_v13  ;;  %v202_v35 = vld [vmem:[%s3239_s10 + $0x30] sm:$0xff]  ;;  %v203_v39 = vld [vmem:[%s3239_s10 + $0x38] sm:$0xff]  ;;  %v220_v43 = vld [vmem:[%s3239_s10 + $0xc0] sm:$0xff] }
  0x1d   : > { %2856 = vmatmul.msk.f32.gmra.mxu1 %vm268_vm0, %v197_v14  ;;  %2872 = vmatmul.msk.f32.gmra.mxu3 %vm268_vm0, %v213_v15  ;;  %v257_v44 = vld [vmem:[%s3233_s7 + $0xc8] sm:$0xff]  ;;  %v258_v48 = vld [vmem:[%s3233_s7 + $0xd0] sm:$0xff]  ;;  %v243_v52 = vld [vmem:[%s3233_s7 + $0x58] sm:$0xff] }
  0x1e   : > { %v241_v45 = vld [vmem:[%s3233_s7 + $0x48] sm:$0xff]  ;;  %v242_v49 = vld [vmem:[%s3233_s7 + $0x50] sm:$0xff]  ;;  %v259_v53 = vld [vmem:[%s3233_s7 + $0xd8] sm:$0xff] }
  0x1f   : > { %v221_v46 = vld [vmem:[%s3239_s10 + $0xc8] sm:$0xff]  ;;  %v222_v50 = vld [vmem:[%s3239_s10 + $0xd0] sm:$0xff]  ;;  %v207_v54 = vld [vmem:[%s3239_s10 + $0x58] sm:$0xff] }
  0x20   : > { %v205_v47 = vld [vmem:[%s3239_s10 + $0x48] sm:$0xff]  ;;  %v206_v51 = vld [vmem:[%s3239_s10 + $0x50] sm:$0xff]  ;;  %v223_v55 = vld [vmem:[%s3239_s10 + $0xd8] sm:$0xff] }
  0x21   : > { %v260_v56 = vld [vmem:[%s3233_s7 + $0xe0] sm:$0xff]  ;;  %v261_v60 = vld [vmem:[%s3233_s7 + $0xe8] sm:$0xff]  ;;  %v246_v0 = vld [vmem:[%s3233_s7 + $0x70] sm:$0xff] }
  0x22   : > { %v224_v57 = vld [vmem:[%s3239_s10 + $0xe0] sm:$0xff]  ;;  %v225_v61 = vld [vmem:[%s3239_s10 + $0xe8] sm:$0xff]  ;;  %v210_v1 = vld [vmem:[%s3239_s10 + $0x70] sm:$0xff] }
  0x23   : > { %v244_v58 = vld [vmem:[%s3233_s7 + $0x60] sm:$0xff]  ;;  %v245_v62 = vld [vmem:[%s3233_s7 + $0x68] sm:$0xff]  ;;  %v262_v2 = vld [vmem:[%s3233_s7 + $0xf0] sm:$0xff] }
  0x24   : > { %2825 = vmatmul.msk.f32.gmra.mxu0 %vm268_vm0, %v234_v16  ;;  %2841 = vmatmul.msk.f32.gmra.mxu2 %vm268_vm0, %v250_v17  ;;  %v208_v59 = vld [vmem:[%s3239_s10 + $0x60] sm:$0xff]  ;;  %v209_v63 = vld [vmem:[%s3239_s10 + $0x68] sm:$0xff]  ;;  %v226_v3 = vld [vmem:[%s3239_s10 + $0xf0] sm:$0xff] }
  0x25   : > { %2857 = vmatmul.msk.f32.gmra.mxu1 %vm268_vm0, %v198_v18  ;;  %2873 = vmatmul.msk.f32.gmra.mxu3 %vm268_vm0, %v214_v19  ;;  %v247_v7 = vld [vmem:[%s3233_s7 + $0x78] sm:$0xff] }
  0x26   : > { %v263_v8 = vld [vmem:[%s3233_s7 + $0xf8] sm:$0xff] }
  0x27   : > { %v211_v9 = vld [vmem:[%s3239_s10 + $0x78] sm:$0xff] }
  0x28   : > { %v227_v12 = vld [vmem:[%s3239_s10 + $0xf8] sm:$0xff] }
  0x2c   : > { %2842 = vmatmul.msk.f32.gmra.mxu2 %vm268_vm0, %v251_v20  ;;  %2826 = vmatmul.msk.f32.gmra.mxu0 %vm268_vm0, %v235_v21 }
  0x2d   : > { %2874 = vmatmul.msk.f32.gmra.mxu3 %vm268_vm0, %v215_v22  ;;  %2858 = vmatmul.msk.f32.gmra.mxu1 %vm268_vm0, %v199_v23 }
  0x34   : > { %2843 = vmatmul.msk.f32.gmra.mxu2 %vm268_vm0, %v252_v24  ;;  %2827 = vmatmul.msk.f32.gmra.mxu0 %vm268_vm0, %v236_v25 }
  0x35   : > { %2875 = vmatmul.msk.f32.gmra.mxu3 %vm268_vm0, %v216_v26  ;;  %2859 = vmatmul.msk.f32.gmra.mxu1 %vm268_vm0, %v200_v27 }
  0x3c   : > { %2828 = vmatmul.msk.f32.gmra.mxu0 %vm268_vm0, %v237_v28  ;;  %2844 = vmatmul.msk.f32.gmra.mxu2 %vm268_vm0, %v253_v29 }
  0x3d   : > { %2860 = vmatmul.msk.f32.gmra.mxu1 %vm268_vm0, %v201_v30  ;;  %2876 = vmatmul.msk.f32.gmra.mxu3 %vm268_vm0, %v217_v31 }
  0x44   : > { %2845 = vmatmul.msk.f32.gmra.mxu2 %vm268_vm0, %v254_v32  ;;  %2829 = vmatmul.msk.f32.gmra.mxu0 %vm268_vm0, %v238_v33 }
  0x45   : > { %2877 = vmatmul.msk.f32.gmra.mxu3 %vm268_vm0, %v218_v34  ;;  %2861 = vmatmul.msk.f32.gmra.mxu1 %vm268_vm0, %v202_v35 }
  0x4c   : > { %2846 = vmatmul.msk.f32.gmra.mxu2 %vm268_vm0, %v255_v36  ;;  %2830 = vmatmul.msk.f32.gmra.mxu0 %vm268_vm0, %v239_v37 }
  0x4d   : > { %2878 = vmatmul.msk.f32.gmra.mxu3 %vm268_vm0, %v219_v38  ;;  %2862 = vmatmul.msk.f32.gmra.mxu1 %vm268_vm0, %v203_v39 }
  0x54   : > { %2831 = vmatmul.msk.f32.gmra.mxu0 %vm268_vm0, %v240_v40  ;;  %2847 = vmatmul.msk.f32.gmra.mxu2 %vm268_vm0, %v256_v41 }
  0x55   : > { %2863 = vmatmul.msk.f32.gmra.mxu1 %vm268_vm0, %v204_v42  ;;  %2879 = vmatmul.msk.f32.gmra.mxu3 %vm268_vm0, %v220_v43 }
  0x5c   : > { %2848 = vmatmul.msk.f32.gmra.mxu2 %vm268_vm0, %v257_v44  ;;  %2832 = vmatmul.msk.f32.gmra.mxu0 %vm268_vm0, %v241_v45 }
  0x5d   : > { %2880 = vmatmul.msk.f32.gmra.mxu3 %vm268_vm0, %v221_v46  ;;  %2864 = vmatmul.msk.f32.gmra.mxu1 %vm268_vm0, %v205_v47 }
  0x64   : > { %2849 = vmatmul.msk.f32.gmra.mxu2 %vm268_vm0, %v258_v48  ;;  %2833 = vmatmul.msk.f32.gmra.mxu0 %vm268_vm0, %v242_v49 }
  0x65   : > { %2881 = vmatmul.msk.f32.gmra.mxu3 %vm268_vm0, %v222_v50  ;;  %2865 = vmatmul.msk.f32.gmra.mxu1 %vm268_vm0, %v206_v51 }
  0x6c   : > { %2834 = vmatmul.msk.f32.gmra.mxu0 %vm268_vm0, %v243_v52  ;;  %2850 = vmatmul.msk.f32.gmra.mxu2 %vm268_vm0, %v259_v53 }
  0x6d   : > { %2866 = vmatmul.msk.f32.gmra.mxu1 %vm268_vm0, %v207_v54  ;;  %2882 = vmatmul.msk.f32.gmra.mxu3 %vm268_vm0, %v223_v55 }
  0x74   : > { %2851 = vmatmul.msk.f32.gmra.mxu2 %vm268_vm0, %v260_v56  ;;  %2835 = vmatmul.msk.f32.gmra.mxu0 %vm268_vm0, %v244_v58 }
  0x75   : > { %2883 = vmatmul.msk.f32.gmra.mxu3 %vm268_vm0, %v224_v57  ;;  %2867 = vmatmul.msk.f32.gmra.mxu1 %vm268_vm0, %v208_v59 }
  0x7c   : > { %2852 = vmatmul.msk.f32.gmra.mxu2 %vm268_vm0, %v261_v60  ;;  %2836 = vmatmul.msk.f32.gmra.mxu0 %vm268_vm0, %v245_v62 }
  0x7d   : > { %2884 = vmatmul.msk.f32.gmra.mxu3 %vm268_vm0, %v225_v61  ;;  %2868 = vmatmul.msk.f32.gmra.mxu1 %vm268_vm0, %v209_v63 }
  0x84   : > { %2837 = vmatmul.msk.f32.gmra.mxu0 %vm268_vm0, %v246_v0  ;;  %2853 = vmatmul.msk.f32.gmra.mxu2 %vm268_vm0, %v262_v2 }
  0x85   : > { %2869 = vmatmul.msk.f32.gmra.mxu1 %vm268_vm0, %v210_v1  ;;  %2885 = vmatmul.msk.f32.gmra.mxu3 %vm268_vm0, %v226_v3 }
  0x8c   : > { %2838 = vmatmul.msk.f32.gmra.mxu0 %vm268_vm0, %v247_v7  ;;  %2854 = vmatmul.msk.f32.gmra.mxu2 %vm268_vm0, %v263_v8 }
  0x8d   : > { %2870 = vmatmul.msk.f32.gmra.mxu1 %vm268_vm0, %v211_v9  ;;  %2886 = vmatmul.msk.f32.gmra.mxu3 %vm268_vm0, %v227_v12 }
  0x91   : > { %v382_v4 = vpop.f32.mrf.mxu0 }
  0x92   : > { %v591_v5 = vpop.f32.mrf.mxu1 }
  0x93   : > { %v3361_v6 = vadd.f32 %v591_v5, %v382_v4 }
  0x95   : > { %v1493_v10 = vsel %vm1492_vm1, %v3361_v6, -inf  ;;  %v690_v11 = vsel %vm689_vm2, %v3361_v6, -inf }
  0x96   : > { %1494 = vmax.xlane.f32.xlu1 %v1493_v10  ;;  %691 = vmax.xlane.f32.xlu0 %v690_v11 }
  0x97   : > { %v430_v13 = vpop.f32.mrf.mxu2 }
  0x98   : > { %v639_v14 = vpop.f32.mrf.mxu3 }
  0x99   : > { %v3375_v15 = vadd.f32 %v639_v14, %v430_v13  ;;  %v385_v16 = vpop.f32.mrf.mxu0 }
  0x9a   : > { %v594_v17 = vpop.f32.mrf.mxu1 }
  0x9b   : > { %v3377_v18 = vadd.f32 %v594_v17, %v385_v16  ;;  %v1541_v19 = vsel %vm1492_vm1, %v3375_v15, -inf  ;;  %v738_v20 = vsel %vm689_vm2, %v3375_v15, -inf }
  0x9c   : > { %1542 = vmax.xlane.f32.xlu2 %v1541_v19 }
  0x9d   : > { %v693_v21 = vsel %vm689_vm2, %v3377_v18, -inf  ;;  %v1496_v28 = vsel %vm1492_vm1, %v3377_v18, -inf }
  0x9e   : > { %739 = vmax.xlane.f32.xlu1 %v738_v20  ;;  %694 = vmax.xlane.f32.xlu0 %v693_v21 }
  0x9f   : > { %v433_v22 = vpop.f32.mrf.mxu2 }
  0xa0   : > { %v642_v23 = vpop.f32.mrf.mxu3 }
  0xa1   : > { %v3385_v24 = vadd.f32 %v642_v23, %v433_v22  ;;  %v388_v25 = vpop.f32.mrf.mxu0 }
  0xa2   : > { %v597_v26 = vpop.f32.mrf.mxu1 }
  0xa3   : > { %v3387_v27 = vadd.f32 %v597_v26, %v388_v25  ;;  %v1544_v29 = vsel %vm1492_vm1, %v3385_v24, -inf  ;;  %v741_v36 = vsel %vm689_vm2, %v3385_v24, -inf }
  0xa4   : > { %1497 = vmax.xlane.f32.xlu2 %v1496_v28 }
  0xa5   : > { %v696_v30 = vsel %vm689_vm2, %v3387_v27, -inf  ;;  %v1499_v38 = vsel %vm1492_vm1, %v3387_v27, -inf }
  0xa6   : > { %697 = vmax.xlane.f32.xlu1 %v696_v30  ;;  %1545 = vmax.xlane.f32.xlu0 %v1544_v29 }
  0xa7   : > { %v436_v31 = vpop.f32.mrf.mxu2 }
  0xa8   : > { %v645_v32 = vpop.f32.mrf.mxu3 }
  0xa9   : > { %v3395_v33 = vadd.f32 %v645_v32, %v436_v31  ;;  %v391_v34 = vpop.f32.mrf.mxu0 }
  0xaa   : > { %v600_v35 = vpop.f32.mrf.mxu1 }
  0xab   : > { %v1547_v37 = vsel %vm1492_vm1, %v3395_v33, -inf  ;;  %v3403_v40 = vadd.f32 %v600_v35, %v391_v34  ;;  %v744_v47 = vsel %vm689_vm2, %v3395_v33, -inf }
  0xac   : > { %742 = vmax.xlane.f32.xlu2 %v741_v36 }
  0xad   : > { %v699_v46 = vsel %vm689_vm2, %v3403_v40, -inf  ;;  %v1502_v56 = vsel %vm1492_vm1, %v3403_v40, -inf }
  0xae   : > { %1548 = vmax.xlane.f32.xlu1 %v1547_v37  ;;  %1500 = vmax.xlane.f32.xlu0 %v1499_v38 }
  0xaf   : > { %v439_v39 = vpop.f32.mrf.mxu2 }
  0xb0   : > { %v648_v41 = vpop.f32.mrf.mxu3 }
  0xb1   : > { %v3405_v42 = vadd.f32 %v648_v41, %v439_v39  ;;  %v394_v43 = vpop.f32.mrf.mxu0 }
  0xb2   : > { %v603_v44 = vpop.f32.mrf.mxu1 }
  0xb3   : > { %v1550_v45 = vsel %vm1492_vm1, %v3405_v42, -inf  ;;  %v3413_v48 = vadd.f32 %v603_v44, %v394_v43  ;;  %v747_v62 = vsel %vm689_vm2, %v3405_v42, -inf }
  0xb4   : > { %1551 = vmax.xlane.f32.xlu2 %v1550_v45 }
  0xb5   : > { %v702_v52 = vsel %vm689_vm2, %v3413_v48, -inf  ;;  %v1505_v60 = vsel %vm1492_vm1, %v3413_v48, -inf }
  0xb6   : > { %700 = vmax.xlane.f32.xlu1 %v699_v46  ;;  %745 = vmax.xlane.f32.xlu0 %v744_v47 }
  0xb7   : > { %v442_v49 = vpop.f32.mrf.mxu2 }
  0xb8   : > { %v651_v50 = vpop.f32.mrf.mxu3 }
  0xb9   : > { %v3415_v51 = vadd.f32 %v651_v50, %v442_v49  ;;  %v397_v54 = vpop.f32.mrf.mxu0 }
  0xba   : > { %v606_v55 = vpop.f32.mrf.mxu1 }
  0xbb   : > { %v1553_v53 = vsel %vm1492_vm1, %v3415_v51, -inf  ;;  %v3423_v57 = vadd.f32 %v606_v55, %v397_v54  ;;  %v750_v4 = vsel %vm689_vm2, %v3415_v51, -inf }
  0xbc   : > { %703 = vmax.xlane.f32.xlu2 %v702_v52 }
  0xbd   : > { %v1508_v61 = vsel %vm1492_vm1, %v3423_v57, -inf  ;;  %v705_v11 = vsel %vm689_vm2, %v3423_v57, -inf }
  0xbe   : > { %1503 = vmax.xlane.f32.xlu1 %v1502_v56  ;;  %1554 = vmax.xlane.f32.xlu0 %v1553_v53 }
  0xbf   : > { %v445_v58 = vpop.f32.mrf.mxu2 }
  0xc0   : > { %v654_v59 = vpop.f32.mrf.mxu3 }
  0xc1   : > { %v3431_v63 = vadd.f32 %v654_v59, %v445_v58  ;;  %v400_v0 = vpop.f32.mrf.mxu0 }
  0xc2   : > { %v609_v1 = vpop.f32.mrf.mxu1 }
  0xc3   : > { %v1556_v5 = vsel %vm1492_vm1, %v3431_v63, -inf  ;;  %v753_v7 = vsel %vm689_vm2, %v3431_v63, -inf  ;;  %v3439_v8 = vadd.f32 %v609_v1, %v400_v0 }
  0xc4   : > { %1506 = vmax.xlane.f32.xlu2 %v1505_v60 }
  0xc5   : > { %v1511_v12 = vsel %vm1492_vm1, %v3439_v8, -inf  ;;  %v708_v13 = vsel %vm689_vm2, %v3439_v8, -inf }
  0xc6   : > { %748 = vmax.xlane.f32.xlu1 %v747_v62  ;;  %1509 = vmax.xlane.f32.xlu0 %v1508_v61 }
  0xc7   : > { %v448_v2 = vpop.f32.mrf.mxu2 }
  0xc8   : > { %v657_v3 = vpop.f32.mrf.mxu3 }
  0xc9   : > { %v403_v9 = vpop.f32.mrf.mxu0  ;;  %v3447_v17 = vadd.f32 %v657_v3, %v448_v2 }
  0xca   : > { %v612_v10 = vpop.f32.mrf.mxu1 }
  0xcb   : > { %v1559_v20 = vsel %vm1492_vm1, %v3447_v17, -inf  ;;  %v756_v21 = vsel %vm689_vm2, %v3447_v17, -inf  ;;  %v3457_v26 = vadd.f32 %v612_v10, %v403_v9 }
  0xcc   : > { %751 = vmax.xlane.f32.xlu2 %v750_v4 }
  0xcd   : > { %v1514_v31 = vsel %vm1492_vm1, %v3457_v26, -inf  ;;  %v711_v32 = vsel %vm689_vm2, %v3457_v26, -inf }
  0xce   : > { %1557 = vmax.xlane.f32.xlu1 %v1556_v5  ;;  %754 = vmax.xlane.f32.xlu0 %v753_v7 }
  0xcf   : > { %v451_v14 = vpop.f32.mrf.mxu2 }
  0xd0   : > { %v660_v16 = vpop.f32.mrf.mxu3 }
  0xd1   : > { %v3449_v19 = vadd.f32 %v660_v16, %v451_v14  ;;  %v406_v23 = vpop.f32.mrf.mxu0 }
  0xd2   : > { %v615_v25 = vpop.f32.mrf.mxu1 }
  0xd3   : > { %v1562_v22 = vsel %vm1492_vm1, %v3449_v19, -inf  ;;  %v3459_v28 = vadd.f32 %v615_v25, %v406_v23  ;;  %v759_v41 = vsel %vm689_vm2, %v3449_v19, -inf }
  0xd4   : > { %706 = vmax.xlane.f32.xlu2 %v705_v11 }
  0xd5   : > { %v1517_v34 = vsel %vm1492_vm1, %v3459_v28, -inf  ;;  %v714_v49 = vsel %vm689_vm2, %v3459_v28, -inf }
  0xd6   : > { %1512 = vmax.xlane.f32.xlu1 %v1511_v12  ;;  %709 = vmax.xlane.f32.xlu0 %v708_v13 }
  0xd7   : > { %v454_v29 = vpop.f32.mrf.mxu2 }
  0xd8   : > { %v663_v30 = vpop.f32.mrf.mxu3 }
  0xd9   : > { %v3467_v35 = vadd.f32 %v663_v30, %v454_v29  ;;  %v409_v36 = vpop.f32.mrf.mxu0 }
  0xda   : > { %v618_v37 = vpop.f32.mrf.mxu1 }
  0xdb   : > { %v1565_v43 = vsel %vm1492_vm1, %v3467_v35, -inf  ;;  %v762_v44 = vsel %vm689_vm2, %v3467_v35, -inf  ;;  %v3475_v45 = vadd.f32 %v618_v37, %v409_v36 }
  0xdc   : > { %1560 = vmax.xlane.f32.xlu2 %v1559_v20 }
  0xdd   : > { %v1520_v50 = vsel %vm1492_vm1, %v3475_v45, -inf  ;;  %v717_v52 = vsel %vm689_vm2, %v3475_v45, -inf }
  0xde   : > { %757 = vmax.xlane.f32.xlu1 %v756_v21  ;;  %1563 = vmax.xlane.f32.xlu0 %v1562_v22 }
  0xdf   : > { %v457_v38 = vpop.f32.mrf.mxu2 }
  0xe0   : > { %v666_v39 = vpop.f32.mrf.mxu3 }
  0xe1   : > { %v412_v46 = vpop.f32.mrf.mxu0  ;;  %v3483_v55 = vadd.f32 %v666_v39, %v457_v38 }
  0xe2   : > { %v621_v47 = vpop.f32.mrf.mxu1 }
  0xe3   : > { %v1568_v58 = vsel %vm1492_vm1, %v3483_v55, -inf  ;;  %v765_v59 = vsel %vm689_vm2, %v3483_v55, -inf  ;;  %v3493_v0 = vadd.f32 %v621_v47, %v412_v46 }
  0xe4   : > { %1515 = vmax.xlane.f32.xlu2 %v1514_v31 }
  0xe5   : > { %v1523_v4 = vsel %vm1492_vm1, %v3493_v0, -inf  ;;  %v720_v5 = vsel %vm689_vm2, %v3493_v0, -inf }
  0xe6   : > { %712 = vmax.xlane.f32.xlu1 %v711_v32  ;;  %1518 = vmax.xlane.f32.xlu0 %v1517_v34 }
  0xe7   : > { %v460_v53 = vpop.f32.mrf.mxu2 }
  0xe8   : > { %v669_v54 = vpop.f32.mrf.mxu3 }
  0xe9   : > { %v3485_v56 = vadd.f32 %v669_v54, %v460_v53  ;;  %v415_v61 = vpop.f32.mrf.mxu0 }
  0xea   : > { %v624_v62 = vpop.f32.mrf.mxu1 }
  0xeb   : > { %v1571_v60 = vsel %vm1492_vm1, %v3485_v56, -inf  ;;  %v3495_v1 = vadd.f32 %v624_v62, %v415_v61  ;;  %v768_v14 = vsel %vm689_vm2, %v3485_v56, -inf }
  0xec   : > { %760 = vmax.xlane.f32.xlu2 %v759_v41 }
  0xed   : > { %v1526_v7 = vsel %vm1492_vm1, %v3495_v1, -inf  ;;  %v723_v25 = vsel %vm689_vm2, %v3495_v1, -inf }
  0xee   : > { %1566 = vmax.xlane.f32.xlu1 %v1565_v43  ;;  %763 = vmax.xlane.f32.xlu0 %v762_v44 }
  0xef   : > { %v463_v2 = vpop.f32.mrf.mxu2 }
  0xf0   : > { %v672_v3 = vpop.f32.mrf.mxu3 }
  0xf1   : > { %v3503_v9 = vadd.f32 %v672_v3, %v463_v2  ;;  %v418_v10 = vpop.f32.mrf.mxu0 }
  0xf2   : > { %v627_v11 = vpop.f32.mrf.mxu1 }
  0xf3   : > { %v1574_v16 = vsel %vm1492_vm1, %v3503_v9, -inf  ;;  %v771_v20 = vsel %vm689_vm2, %v3503_v9, -inf  ;;  %v3511_v21 = vadd.f32 %v627_v11, %v418_v10 }
  0xf4   : > { %715 = vmax.xlane.f32.xlu2 %v714_v49 }
  0xf5   : > { %v1529_v29 = vsel %vm1492_vm1, %v3511_v21, -inf  ;;  %v726_v30 = vsel %vm689_vm2, %v3511_v21, -inf }
  0xf6   : > { %1521 = vmax.xlane.f32.xlu1 %v1520_v50  ;;  %718 = vmax.xlane.f32.xlu0 %v717_v52 }
  0xf7   : > { %v466_v12 = vpop.f32.mrf.mxu2 }
  0xf8   : > { %v675_v13 = vpop.f32.mrf.mxu3 }
  0xf9   : > { %v421_v22 = vpop.f32.mrf.mxu0  ;;  %v3519_v34 = vadd.f32 %v675_v13, %v466_v12 }
  0xfa   : > { %v630_v23 = vpop.f32.mrf.mxu1 }
  0xfb   : > { %v1577_v37 = vsel %vm1492_vm1, %v3519_v34, -inf  ;;  %v774_v38 = vsel %vm689_vm2, %v3519_v34, -inf  ;;  %v3529_v44 = vadd.f32 %v630_v23, %v421_v22 }
  0xfc   : > { %1569 = vmax.xlane.f32.xlu2 %v1568_v58 }
  0xfd   : > { %v1532_v47 = vsel %vm1492_vm1, %v3529_v44, -inf  ;;  %v729_v49 = vsel %vm689_vm2, %v3529_v44, -inf }
  0xfe   : > { %766 = vmax.xlane.f32.xlu1 %v765_v59  ;;  %1572 = vmax.xlane.f32.xlu0 %v1571_v60 }
  0xff   : > { %v469_v31 = vpop.f32.mrf.mxu2 }
 0x100   : > { %v678_v32 = vpop.f32.mrf.mxu3 }
 0x101   : > { %v3521_v36 = vadd.f32 %v678_v32, %v469_v31  ;;  %v424_v41 = vpop.f32.mrf.mxu0 }
 0x102   : > { %v633_v43 = vpop.f32.mrf.mxu1 }
 0x103   : > { %v1580_v39 = vsel %vm1492_vm1, %v3521_v36, -inf  ;;  %v3531_v46 = vadd.f32 %v633_v43, %v424_v41  ;;  %v777_v58 = vsel %vm689_vm2, %v3521_v36, -inf }
 0x104   : > { %1524 = vmax.xlane.f32.xlu2 %v1523_v4 }
 0x105   : > { %v1535_v50 = vsel %vm1492_vm1, %v3531_v46, -inf  ;;  %v732_v10 = vsel %vm689_vm2, %v3531_v46, -inf }
 0x106   : > { %721 = vmax.xlane.f32.xlu1 %v720_v5  ;;  %1527 = vmax.xlane.f32.xlu0 %v1526_v7 }
 0x107   : > { %v472_v52 = vpop.f32.mrf.mxu2 }
 0x108   : > { %v681_v53 = vpop.f32.mrf.mxu3 }
 0x109   : > { %v3539_v54 = vadd.f32 %v681_v53, %v472_v52  ;;  %v427_v61 = vpop.f32.mrf.mxu0  ;;  %v692_v2 = vpop.xlane.xlu0 %691 }
 0x10a   : > { %v636_v62 = vpop.f32.mrf.mxu1  ;;  %v786_v4 = vsub.f32 %v3361_v6, %v692_v2 }
 0x10b   : > { %v1583_v59 = vsel %vm1492_vm1, %v3539_v54, -inf  ;;  %v780_v60 = vsel %vm689_vm2, %v3539_v54, -inf  ;;  %v3547_v3 = vadd.f32 %v636_v62, %v427_v61 }
 0x10c   : > { %769 = vmax.xlane.f32.xlu2 %v768_v14  ;;  %v818_v14 = vmul.f32 1.442695, %v786_v4 }
 0x10d   : > { %v1538_v11 = vsel %vm1492_vm1, %v3547_v3, -inf  ;;  %v735_v12 = vsel %vm689_vm2, %v3547_v3, -inf }
 0x10e   : > { %1575 = vmax.xlane.f32.xlu1 %v1574_v16  ;;  %772 = vmax.xlane.f32.xlu0 %v771_v20  ;;  %v1495_v16 = vpop.xlane.xlu1 %1494  ;;  %2908 = vpow2.f32 %v818_v14 }
 0x10f   : > { %v475_v5 = vpop.f32.mrf.mxu2  ;;  %v1589_v22 = vsub.f32 %v3361_v6, %v1495_v16  ;;  %v1543_v23 = vpop.xlane.xlu2 %1542 }
 0x110   : > { %v684_v7 = vpop.f32.mrf.mxu3  ;;  %v1605_v43 = vsub.f32 %v3375_v15, %v1543_v23 }
 0x111   : > { %v3556_v13 = vadd.f32 %v684_v7, %v475_v5 }
 0x113   : > { %v1586_v20 = vsel %vm1492_vm1, %v3556_v13, -inf }
 0x114   : > { %724 = vmax.xlane.f32.xlu2 %v723_v25  ;;  %v783_v25 = vsel %vm689_vm2, %v3556_v13, -inf  ;;  %v3563_v31 = vpop.eup %2908 }
 0x115   : > { %5338 = vst [vmem:[#allocation2_spill] sm:$0xff] %v3563_v31  ;;  %v882_v32 = vsel %vm689_vm2, %v3563_v31, 0.0 }
 0x116   : > { %1530 = vmax.xlane.f32.xlu1 %v1529_v29  ;;  %727 = vmax.xlane.f32.xlu0 %v726_v30  ;;  %v695_v29 = vpop.xlane.xlu0 %694  ;;  %v1621_v30 = vmul.f32 1.442695, %v1589_v22  ;;  %v740_v62 = vpop.xlane.xlu1 %739 }
 0x117   : > { %v802_v2 = vsub.f32 %v3375_v15, %v740_v62 }
 0x118   : > { %2910 = vpow2.f32 %v1621_v30 }
 0x119   : > { %v850_v5 = vmul.f32 1.442695, %v802_v2 }
 0x11c   : > { %1578 = vmax.xlane.f32.xlu2 %v1577_v37  ;;  %v1498_v37 = vpop.xlane.xlu2 %1497 }
 0x11e   : > { %775 = vmax.xlane.f32.xlu1 %v774_v38  ;;  %1581 = vmax.xlane.f32.xlu0 %v1580_v39  ;;  %v1590_v38 = vsub.f32 %v3377_v18, %v1498_v37  ;;  %v1546_v39 = vpop.xlane.xlu0 %1545  ;;  %v3568_v6 = vpop.eup %2910 }
 0x11f   : > { %v698_v7 = vpop.xlane.xlu1 %697 }
 0x120   : > { %v1623_v41 = vmul.f32 1.442695, %v1590_v38 }
 0x122   : > { %2912 = vpow2.f32 %v1623_v41 }
 0x124   : > { %1533 = vmax.xlane.f32.xlu2 %v1532_v47  ;;  %v1606_v47 = vsub.f32 %v3385_v24, %v1546_v39 }
 0x126   : > { %730 = vmax.xlane.f32.xlu1 %v729_v49  ;;  %1536 = vmax.xlane.f32.xlu0 %v1535_v50  ;;  %v1653_v49 = vmul.f32 1.442695, %v1605_v43  ;;  %v1501_v50 = vpop.xlane.xlu0 %1500  ;;  %v1655_v52 = vmul.f32 1.442695, %v1606_v47 }
 0x127   : > { %v1591_v53 = vsub.f32 %v3387_v27, %v1501_v50  ;;  %v1549_v14 = vpop.xlane.xlu1 %1548 }
 0x128   : > { %2914 = vpow2.f32 %v1653_v49  ;;  %v1607_v38 = vsub.f32 %v3395_v33, %v1549_v14 }
 0x129   : > { %2916 = vpow2.f32 %v1655_v52 }
 0x12a   : > { %v1657_v43 = vmul.f32 1.442695, %v1607_v38 }
 0x12c   : > { %778 = vmax.xlane.f32.xlu2 %v777_v58  ;;  %v3575_v58 = vpop.eup %2912 }
 0x12e   : > { %1584 = vmax.xlane.f32.xlu1 %v1583_v59  ;;  %781 = vmax.xlane.f32.xlu0 %v780_v60  ;;  %v1625_v59 = vmul.f32 1.442695, %v1591_v53  ;;  %v3579_v60 = vpop.eup %2914  ;;  %v746_v23 = vpop.xlane.xlu0 %745 }
 0x12f   : > { %v3583_v61 = vpop.eup %2916  ;;  %v804_v30 = vsub.f32 %v3395_v33, %v746_v23 }
 0x130   : > { %2918 = vpow2.f32 %v1625_v59 }
 0x131   : > { %2920 = vpow2.f32 %v850_v5  ;;  %v854_v37 = vmul.f32 1.442695, %v804_v30 }
 0x134   : > { %733 = vmax.xlane.f32.xlu2 %v732_v10  ;;  %v787_v10 = vsub.f32 %v3377_v18, %v695_v29  ;;  %v701_v29 = vpop.xlane.xlu1 %700 }
 0x136   : > { %1539 = vmax.xlane.f32.xlu1 %v1538_v11  ;;  %736 = vmax.xlane.f32.xlu0 %v735_v12  ;;  %v3588_v4 = vpop.eup %2918  ;;  %v820_v11 = vmul.f32 1.442695, %v787_v10 }
 0x137   : > { %v3593_v12 = vpop.eup %2920 }
 0x138   : > { %5339 = vst [vmem:[#allocation3_spill] sm:$0xff] %v3593_v12  ;;  %2922 = vpow2.f32 %v820_v11  ;;  %v930_v16 = vsel %vm689_vm2, %v3593_v12, 0.0  ;;  %v1555_v11 = vpop.xlane.xlu0 %1554 }
 0x13c   : > { %1587 = vmax.xlane.f32.xlu2 %v1586_v20  ;;  %v743_v20 = vpop.xlane.xlu2 %742  ;;  %v1504_v47 = vpop.xlane.xlu1 %1503 }
 0x13d   : > { %v803_v15 = vsub.f32 %v3385_v24, %v743_v20  ;;  %v789_v24 = vsub.f32 %v3403_v40, %v701_v29 }
 0x13e   : > { %784 = vmax.xlane.f32.xlu1 %v783_v25  ;;  %v3598_v22 = vpop.eup %2922 }
 0x13f   : > { %5340 = vst [vmem:[#allocation4_spill] sm:$0xff] %v3598_v22  ;;  %v852_v25 = vmul.f32 1.442695, %v803_v15  ;;  %v885_v18 = vsel %vm689_vm2, %v3598_v22, 0.0  ;;  %v824_v49 = vmul.f32 1.442695, %v789_v24 }
 0x141   : > { %2924 = vpow2.f32 %v852_v25 }
 0x142   : > { %2926 = vpow2.f32 %v854_v37 }
 0x144   : > { %883 = vadd.xlane.f32.xlu2 %v882_v32  ;;  %v788_v32 = vsub.f32 %v3387_v27, %v698_v7  ;;  %v1592_v27 = vsub.f32 %v3403_v40, %v1504_v47  ;;  %v1552_v2 = vpop.xlane.xlu2 %1551  ;;  %v749_v37 = vpop.xlane.xlu1 %748 }
 0x145   : > { %v1608_v20 = vsub.f32 %v3405_v42, %v1552_v2  ;;  %v805_v38 = vsub.f32 %v3405_v42, %v749_v37 }
 0x146   : > { %v822_v39 = vmul.f32 1.442695, %v788_v32  ;;  %v1627_v59 = vmul.f32 1.442695, %v1592_v27 }
 0x147   : > { %v3606_v41 = vpop.eup %2924  ;;  %v1659_v23 = vmul.f32 1.442695, %v1608_v20  ;;  %v856_v24 = vmul.f32 1.442695, %v805_v38 }
 0x148   : > { %5341 = vst [vmem:[#allocation5_spill] sm:$0xff] %v3606_v41  ;;  %2928 = vpow2.f32 %v822_v39  ;;  %v933_v50 = vsel %vm689_vm2, %v3606_v41, 0.0  ;;  %v3610_v52 = vpop.eup %2926 }
 0x149   : > { %5342 = vst [vmem:[#allocation6_spill] sm:$0xff] %v3610_v52  ;;  %2930 = vpow2.f32 %v1657_v43  ;;  %v936_v33 = vsel %vm689_vm2, %v3610_v52, 0.0 }
 0x14a   : > { %1717 = vrot.lane.b32.xlu0 %v3568_v6, %s3172_s11  ;;  %2932 = vpow2.f32 %v824_v49  ;;  %v1510_v49 = vpop.xlane.xlu0 %1509 }
 0x14b   : > { %2934 = vpow2.f32 %v1627_v59 }
 0x14c   : > { %v704_v14 = vpop.xlane.xlu2 %703 }
 0x14d   : > { %v790_v43 = vsub.f32 %v3413_v48, %v704_v14 }
 0x14e   : > { %v3615_v53 = vpop.eup %2928 }
 0x14f   : > { %5343 = vst [vmem:[#allocation7_spill] sm:$0xff] %v3615_v53  ;;  %v3617_v62 = vpop.eup %2930  ;;  %v888_v5 = vsel %vm689_vm2, %v3615_v53, 0.0  ;;  %v826_v47 = vmul.f32 1.442695, %v790_v43 }
 0x150   : > { %v3623_v7 = vpop.eup %2932 }
 0x151   : > { %5344 = vst [vmem:[#allocation8_spill] sm:$0xff] %v3623_v7  ;;  %v891_v40 = vsel %vm689_vm2, %v3623_v7, 0.0  ;;  %v3627_v10 = vpop.eup %2934 }
 0x154   : > { %v1507_v25 = vpop.xlane.xlu2 %1506 }
 0x155   : > { %v1593_v30 = vsub.f32 %v3413_v48, %v1507_v25 }
 0x157   : > { %1719 = vrot.lane.b32.xlu1 %v3575_v58, %s3172_s11  ;;  %v1629_v29 = vmul.f32 1.442695, %v1593_v30 }
 0x15c   : > { %1749 = vrot.lane.b32.xlu2 %v3579_v60, %s3172_s11  ;;  %v752_v27 = vpop.xlane.xlu2 %751 }
 0x15d   : > { %v806_v42 = vsub.f32 %v3415_v51, %v752_v27 }
 0x15f   : > { %1751 = vrot.lane.b32.xlu1 %v3583_v61, %s3172_s11  ;;  %v858_v2 = vmul.f32 1.442695, %v806_v42 }
 0x164   : > { %1721 = vrot.lane.b32.xlu2 %v3588_v4, %s3172_s11  ;;  %v707_v27 = vpop.xlane.xlu2 %706 }
 0x174   : > { %931 = vadd.xlane.f32.xlu0 %v930_v16  ;;  %v1609_v16 = vsub.f32 %v3415_v51, %v1555_v11 }
 0x176   : > { %v1661_v15 = vmul.f32 1.442695, %v1609_v16 }
 0x178   : > { %2936 = vpow2.f32 %v1661_v15 }
 0x179   : > { %2938 = vpow2.f32 %v1659_v23 }
 0x17a   : > { %2940 = vpow2.f32 %v1629_v29 }
 0x17b   : > { %2942 = vpow2.f32 %v856_v24 }
 0x17c   : > { %886 = vadd.xlane.f32.xlu0 %v885_v18  ;;  %2944 = vpow2.f32 %v826_v47  ;;  %v1594_v47 = vsub.f32 %v3423_v57, %v1510_v49  ;;  %v1561_v49 = vpop.xlane.xlu2 %1560 }
 0x17d   : > { %2946 = vpow2.f32 %v858_v2 }
 0x17e   : > { %v3634_v18 = vpop.eup %2936 }
 0x17f   : > { %v3638_v32 = vpop.eup %2938 }
 0x180   : > { %v3643_v39 = vpop.eup %2940 }
 0x189   : > { %934 = vadd.xlane.f32.xlu1 %v933_v50  ;;  %v3648_v50 = vpop.eup %2942 }
 0x18a   : > { %5345 = vst [vmem:[#allocation9_spill] sm:$0xff] %v3648_v50  ;;  %v3653_v59 = vpop.eup %2944 }
 0x18b   : > { %5346 = vst [vmem:[#allocation10_spill] sm:$0xff] %v3653_v59  ;;  %v894_v48 = vsel %vm689_vm2, %v3653_v59, 0.0  ;;  %v3659_v16 = vpop.eup %2946 }
 0x18c   : > { %5347 = vst [vmem:[#allocation11_spill] sm:$0xff] %v3659_v16  ;;  %v942_v23 = vsel %vm689_vm2, %v3659_v16, 0.0 }
 0x18d   : > { %937 = vadd.xlane.f32.xlu2 %v936_v33  ;;  %v939_v33 = vsel %vm689_vm2, %v3648_v50, 0.0 }
 0x190   : > { %1753 = vrot.lane.b32.xlu0 %v3617_v62, %s3172_s11 }
 0x191   : > { %889 = vadd.xlane.f32.xlu1 %v888_v5  ;;  %v755_v5 = vpop.xlane.xlu0 %754 }
 0x192   : > { %v807_v11 = vsub.f32 %v3431_v63, %v755_v5 }
 0x194   : > { %v860_v20 = vmul.f32 1.442695, %v807_v11  ;;  %v1516_v11 = vpop.xlane.xlu2 %1515 }
 0x195   : > { %892 = vadd.xlane.f32.xlu2 %v891_v40  ;;  %v1558_v40 = vpop.xlane.xlu1 %1557 }
 0x196   : > { %v1610_v14 = vsub.f32 %v3431_v63, %v1558_v40  ;;  %2948 = vpow2.f32 %v860_v20 }
 0x198   : > { %1723 = vrot.lane.b32.xlu0 %v3627_v10, %s3172_s11  ;;  %v1663_v51 = vmul.f32 1.442695, %v1610_v14  ;;  %v1596_v14 = vsub.f32 %v3457_v26, %v1516_v11 }
 0x199   : > { %v710_v15 = vpop.xlane.xlu0 %709 }
 0x19a   : > { %v792_v30 = vsub.f32 %v3439_v8, %v710_v15  ;;  %2950 = vpow2.f32 %v1663_v51  ;;  %v1635_v15 = vmul.f32 1.442695, %v1596_v14 }
 0x19c   : > { %v830_v37 = vmul.f32 1.442695, %v792_v30  ;;  %v3665_v38 = vpop.eup %2948 }
 0x19d   : > { %v1513_v25 = vpop.xlane.xlu1 %1512  ;;  %5348 = vst [vmem:[#allocation12_spill] sm:$0xff] %v3665_v38  ;;  %v945_v43 = vsel %vm689_vm2, %v3665_v38, 0.0 }
 0x19e   : > { %v1595_v29 = vsub.f32 %v3439_v8, %v1513_v25  ;;  %2952 = vpow2.f32 %v830_v37  ;;  %v1631_v8 = vmul.f32 1.442695, %v1594_v47 }
 0x1a0   : > { %v1633_v63 = vmul.f32 1.442695, %v1595_v29  ;;  %v3667_v24 = vpop.eup %2950 }
 0x1a1   : > { %v1564_v29 = vpop.xlane.xlu0 %1563 }
 0x1a2   : > { %2954 = vpow2.f32 %v1633_v63  ;;  %v791_v63 = vsub.f32 %v3423_v57, %v707_v27 }
 0x1a3   : > { %2956 = vpow2.f32 %v1631_v8 }
 0x1a4   : > { %v828_v47 = vmul.f32 1.442695, %v791_v63  ;;  %v761_v63 = vpop.xlane.xlu2 %760 }
 0x1a5   : > { %v758_v20 = vpop.xlane.xlu1 %757 }
 0x1aa   : > { %1757 = vrot.lane.b32.xlu1 %v3634_v18, %s3172_s11 }
 0x1ad   : > { %1755 = vrot.lane.b32.xlu2 %v3638_v32, %s3172_s11  ;;  %v713_v30 = vpop.xlane.xlu1 %712 }
 0x1b5   : > { %1725 = vrot.lane.b32.xlu2 %v3643_v39, %s3172_s11  ;;  %v1567_v27 = vpop.xlane.xlu1 %1566 }
 0x1b6   : > { %v1613_v14 = vsub.f32 %v3467_v35, %v1567_v27 }
 0x1c2   : > { %940 = vadd.xlane.f32.xlu0 %v939_v33  ;;  %v3674_v33 = vpop.eup %2952 }
 0x1c3   : > { %5349 = vst [vmem:[#allocation13_spill] sm:$0xff] %v3674_v33  ;;  %v3676_v42 = vpop.eup %2954  ;;  %v900_v2 = vsel %vm689_vm2, %v3674_v33, 0.0 }
 0x1c4   : > { %v3682_v5 = vpop.eup %2956 }
 0x1ca   : > { %895 = vadd.xlane.f32.xlu0 %v894_v48  ;;  %v1611_v48 = vsub.f32 %v3447_v17, %v1561_v49 }
 0x1cc   : > { %v1665_v40 = vmul.f32 1.442695, %v1611_v48 }
 0x1ce   : > { %2958 = vpow2.f32 %v1665_v40 }
 0x1cf   : > { %2960 = vpow2.f32 %v1635_v15  ;;  %v1669_v15 = vmul.f32 1.442695, %v1613_v14 }
 0x1d4   : > { %943 = vadd.xlane.f32.xlu1 %v942_v23  ;;  %v3688_v51 = vpop.eup %2958  ;;  %v808_v23 = vsub.f32 %v3447_v17, %v758_v20 }
 0x1d5   : > { %v3693_v37 = vpop.eup %2960 }
 0x1d6   : > { %v862_v25 = vmul.f32 1.442695, %v808_v23  ;;  %v1612_v23 = vsub.f32 %v3449_v19, %v1564_v29 }
 0x1d8   : > { %2962 = vpow2.f32 %v862_v25 }
 0x1d9   : > { %2964 = vpow2.f32 %v828_v47 }
 0x1de   : > { %1759 = vrot.lane.b32.xlu0 %v3667_v24, %s3172_s11  ;;  %946 = vadd.xlane.f32.xlu2 %v945_v43  ;;  %v793_v43 = vsub.f32 %v3457_v26, %v713_v30  ;;  %v3699_v17 = vpop.eup %2962  ;;  %v1522_v30 = vpop.xlane.xlu1 %1521 }
 0x1df   : > { %5350 = vst [vmem:[#allocation14_spill] sm:$0xff] %v3699_v17  ;;  %v948_v49 = vsel %vm689_vm2, %v3699_v17, 0.0  ;;  %v3705_v48 = vpop.eup %2964  ;;  %v1598_v47 = vsub.f32 %v3475_v45, %v1522_v30 }
 0x1e0   : > { %v832_v8 = vmul.f32 1.442695, %v793_v43  ;;  %5351 = vst [vmem:[#allocation15_spill] sm:$0xff] %v3705_v48  ;;  %v897_v26 = vsel %vm689_vm2, %v3705_v48, 0.0 }
 0x1e2   : > { %2966 = vpow2.f32 %v832_v8  ;;  %v1667_v8 = vmul.f32 1.442695, %v1612_v23 }
 0x1e3   : > { %2968 = vpow2.f32 %v1669_v15 }
 0x1e6   : > { %1729 = vrot.lane.b32.xlu0 %v3676_v42, %s3172_s11  ;;  %901 = vadd.xlane.f32.xlu2 %v900_v2  ;;  %v3701_v2 = vpop.xlane.xlu0 %1518 }
 0x1e8   : > { %v3707_v57 = vpop.eup %2966 }
 0x1e9   : > { %5352 = vst [vmem:[#allocation16_spill] sm:$0xff] %v3707_v57  ;;  %v903_v40 = vsel %vm689_vm2, %v3707_v57, 0.0  ;;  %v3718_v27 = vpop.eup %2968 }
 0x1ed   : > { %1727 = vrot.lane.b32.xlu1 %v3682_v5, %s3172_s11 }
 0x1ee   : > { %v764_v11 = vpop.xlane.xlu0 %763 }
 0x1ef   : > { %v810_v20 = vsub.f32 %v3467_v35, %v764_v11  ;;  %v3722_v11 = vpop.xlane.xlu2 %715 }
 0x1f1   : > { %v866_v25 = vmul.f32 1.442695, %v810_v20 }
 0x1f3   : > { %2970 = vpow2.f32 %v866_v25 }
 0x1f4   : > { %2972 = vpow2.f32 %v1667_v8  ;;  %v767_v8 = vpop.xlane.xlu1 %766 }
 0x1f6   : > { %v719_v43 = vpop.xlane.xlu0 %718 }
 0x1f7   : > { %v1570_v15 = vpop.xlane.xlu2 %1569 }
 0x1f8   : > { %v1614_v25 = vsub.f32 %v3483_v55, %v1570_v15 }
 0x1f9   : > { %v3720_v35 = vpop.eup %2970 }
 0x1fa   : > { %5353 = vst [vmem:[#allocation17_spill] sm:$0xff] %v3720_v35  ;;  %v954_v29 = vsel %vm689_vm2, %v3720_v35, 0.0  ;;  %v3728_v14 = vpop.eup %2972 }
 0x1fe   : > { %1761 = vrot.lane.b32.xlu2 %v3688_v51, %s3172_s11 }
 0x1ff   : > { %v1525_v30 = vpop.xlane.xlu2 %1524 }
 0x206   : > { %1731 = vrot.lane.b32.xlu2 %v3693_v37, %s3172_s11 }
 0x210   : > { %949 = vadd.xlane.f32.xlu0 %v948_v49  ;;  %v795_v49 = vsub.f32 %v3475_v45, %v719_v43  ;;  %v1671_v43 = vmul.f32 1.442695, %v1614_v25 }
 0x217   : > { %898 = vadd.xlane.f32.xlu1 %v897_v26  ;;  %v1639_v26 = vmul.f32 1.442695, %v1598_v47  ;;  %v809_v47 = vsub.f32 %v3449_v19, %v761_v63 }
 0x218   : > { %904 = vadd.xlane.f32.xlu0 %v903_v40  ;;  %v836_v40 = vmul.f32 1.442695, %v795_v49  ;;  %v1599_v49 = vsub.f32 %v3493_v0, %v1525_v30  ;;  %v3755_v30 = vpop.xlane.xlu0 %1572 }
 0x219   : > { %2974 = vpow2.f32 %v1639_v26  ;;  %v3743_v26 = vpop.xlane.xlu2 %769 }
 0x21a   : > { %2976 = vpow2.f32 %v836_v40  ;;  %v864_v40 = vmul.f32 1.442695, %v809_v47  ;;  %v1641_v35 = vmul.f32 1.442695, %v1599_v49 }
 0x21b   : > { %2978 = vpow2.f32 %v1671_v43 }
 0x21c   : > { %2980 = vpow2.f32 %v864_v40 }
 0x21d   : > { %2982 = vpow2.f32 %v1641_v35 }
 0x21f   : > { %v3732_v45 = vpop.eup %2974 }
 0x220   : > { %v3734_v20 = vpop.eup %2976  ;;  %v3767_v49 = vpop.xlane.xlu0 %1527 }
 0x221   : > { %5354 = vst [vmem:[#allocation18_spill] sm:$0xff] %v3734_v20  ;;  %v909_v23 = vsel %vm689_vm2, %v3734_v20, 0.0  ;;  %v3746_v57 = vpop.eup %2978  ;;  %v3751_v63 = vpop.xlane.xlu2 %724 }
 0x222   : > { %v3753_v25 = vpop.eup %2980 }
 0x223   : > { %5355 = vst [vmem:[#allocation19_spill] sm:$0xff] %v3753_v25  ;;  %v951_v47 = vsel %vm689_vm2, %v3753_v25, 0.0 }
 0x22c   : > { %1765 = vrot.lane.b32.xlu0 %v3718_v27, %s3172_s11 }
 0x22f   : > { %955 = vadd.xlane.f32.xlu2 %v954_v29  ;;  %v811_v29 = vsub.f32 %v3483_v55, %v767_v8  ;;  %v3757_v55 = vpop.eup %2982  ;;  %v1579_v8 = vpop.xlane.xlu2 %1578 }
 0x230   : > { %1763 = vrot.lane.b32.xlu1 %v3728_v14, %s3172_s11 }
 0x231   : > { %v868_v15 = vmul.f32 1.442695, %v811_v29  ;;  %v1597_v29 = vsub.f32 %v3459_v28, %v3701_v2 }
 0x233   : > { %2984 = vpow2.f32 %v868_v15 }
 0x234   : > { %1735 = vrot.lane.b32.xlu0 %v3732_v45, %s3172_s11 }
 0x237   : > { %910 = vadd.xlane.f32.xlu2 %v909_v23  ;;  %v722_v23 = vpop.xlane.xlu1 %721 }
 0x238   : > { %v796_v19 = vsub.f32 %v3493_v0, %v722_v23 }
 0x239   : > { %v3763_v35 = vpop.eup %2984 }
 0x23a   : > { %v838_v43 = vmul.f32 1.442695, %v796_v19  ;;  %5356 = vst [vmem:[#allocation20_spill] sm:$0xff] %v3763_v35  ;;  %v957_v0 = vsel %vm689_vm2, %v3763_v35, 0.0  ;;  %v1637_v19 = vmul.f32 1.442695, %v1597_v29 }
 0x23c   : > { %2986 = vpow2.f32 %v838_v43  ;;  %v773_v43 = vpop.xlane.xlu0 %772 }
 0x23d   : > { %2988 = vpow2.f32 %v1637_v19 }
 0x23f   : > { %v1576_v23 = vpop.xlane.xlu1 %1575 }
 0x240   : > { %v1616_v20 = vsub.f32 %v3503_v9, %v1576_v23 }
 0x242   : > { %v3769_v40 = vpop.eup %2986  ;;  %v1675_v25 = vmul.f32 1.442695, %v1616_v20 }
 0x243   : > { %5357 = vst [vmem:[#allocation21_spill] sm:$0xff] %v3769_v40  ;;  %v912_v15 = vsel %vm689_vm2, %v3769_v40, 0.0  ;;  %v3777_v48 = vpop.eup %2988 }
 0x244   : > { %2990 = vpow2.f32 %v1675_v25  ;;  %v728_v40 = vpop.xlane.xlu0 %727 }
 0x245   : > { %v798_v29 = vsub.f32 %v3511_v21, %v728_v40 }
 0x247   : > { %v1531_v35 = vpop.xlane.xlu1 %1530 }
 0x248   : > { %v1601_v2 = vsub.f32 %v3511_v21, %v1531_v35 }
 0x24a   : > { %v3785_v23 = vpop.eup %2990 }
 0x24f   : > { %1767 = vrot.lane.b32.xlu2 %v3746_v57, %s3172_s11 }
 0x257   : > { %1737 = vrot.lane.b32.xlu2 %v3757_v55, %s3172_s11 }
 0x25a   : > { %952 = vadd.xlane.f32.xlu1 %v951_v47  ;;  %v1534_v47 = vpop.xlane.xlu2 %1533 }
 0x25e   : > { %958 = vadd.xlane.f32.xlu0 %v957_v0  ;;  %v813_v0 = vsub.f32 %v3503_v9, %v773_v43  ;;  %v842_v9 = vmul.f32 1.442695, %v798_v29  ;;  %v794_v43 = vsub.f32 %v3459_v28, %v3722_v11 }
 0x260   : > { %v872_v17 = vmul.f32 1.442695, %v813_v0  ;;  %v3807_v0 = vpop.xlane.xlu0 %1581 }
 0x262   : > { %v3779_v33 = vpop.xlane.xlu2 %778  ;;  %2992 = vpow2.f32 %v872_v17 }
 0x266   : > { %913 = vadd.xlane.f32.xlu0 %v912_v15  ;;  %v1645_v15 = vmul.f32 1.442695, %v1601_v2  ;;  %v834_v2 = vmul.f32 1.442695, %v794_v43 }
 0x268   : > { %2994 = vpow2.f32 %v1645_v15  ;;  %v3789_v20 = vpop.eup %2992  ;;  %v1617_v15 = vsub.f32 %v3519_v34, %v1579_v8 }
 0x269   : > { %5358 = vst [vmem:[#allocation22_spill] sm:$0xff] %v3789_v20  ;;  %2996 = vpow2.f32 %v842_v9  ;;  %v963_v35 = vsel %vm689_vm2, %v3789_v20, 0.0  ;;  %v3812_v20 = vpop.xlane.xlu0 %1536 }
 0x26a   : > { %v3791_v25 = vpop.xlane.xlu2 %733  ;;  %2998 = vpow2.f32 %v834_v2  ;;  %v1677_v9 = vmul.f32 1.442695, %v1617_v15 }
 0x26c   : > { %3000 = vpow2.f32 %v1677_v9 }
 0x26e   : > { %v3795_v17 = vpop.eup %2994 }
 0x26f   : > { %5359 = vst [vmem:[#allocation23_spill] sm:$0xff] %v3795_v17  ;;  %v3799_v21 = vpop.eup %2996 }
 0x270   : > { %5360 = vst [vmem:[#allocation24_spill] sm:$0xff] %v3799_v21  ;;  %v918_v19 = vsel %vm689_vm2, %v3799_v21, 0.0  ;;  %v3814_v38 = vpop.eup %2998 }
 0x271   : > { %5362 = vst [vmem:[#allocation26_spill] sm:$0xff] %v3814_v38  ;;  %v906_v11 = vsel %vm689_vm2, %v3814_v38, 0.0  ;;  %v782_v16 = vpop.xlane.xlu0 %781 }
 0x272   : > { %v3801_v40 = vpop.xlane.xlu2 %1587  ;;  %v3822_v2 = vpop.eup %3000  ;;  %v816_v50 = vsub.f32 %v3539_v54, %v782_v16 }
 0x273   : > { %1733 = vrot.lane.b32.xlu1 %v3777_v48, %s3172_s11 }
 0x27a   : > { %1771 = vrot.lane.b32.xlu0 %v3785_v23, %s3172_s11  ;;  %v3809_v29 = vpop.xlane.xlu2 %883 }
 0x27b   : > { %5361 = vst [vmem:[#allocation25_spill] sm:$0xff] %v3809_v29 }
 0x280   : > { %964 = vadd.xlane.f32.xlu2 %v963_v35  ;;  %v776_v35 = vpop.xlane.xlu1 %775 }
 0x281   : > { %v814_v21 = vsub.f32 %v3519_v34, %v776_v35 }
 0x282   : > { %1741 = vrot.lane.b32.xlu0 %v3795_v17, %s3172_s11  ;;  %v3818_v28 = vpop.permute.xlu2 %1749 }
 0x283   : > { %v874_v8 = vmul.f32 1.442695, %v814_v21 }
 0x288   : > { %919 = vadd.xlane.f32.xlu2 %v918_v19  ;;  %v1602_v19 = vsub.f32 %v3529_v44, %v1534_v47  ;;  %v731_v15 = vpop.xlane.xlu1 %730 }
 0x289   : > { %v799_v47 = vsub.f32 %v3529_v44, %v731_v15 }
 0x28a   : > { %v1647_v43 = vmul.f32 1.442695, %v1602_v19  ;;  %v3827_v34 = vpop.permute.xlu2 %1721  ;;  %v1615_v19 = vsub.f32 %v3485_v56, %v3755_v30 }
 0x28b   : > { %v844_v9 = vmul.f32 1.442695, %v799_v47 }
 0x28c   : > { %3002 = vpow2.f32 %v1647_v43  ;;  %v1673_v38 = vmul.f32 1.442695, %v1615_v19 }
 0x28d   : > { %3004 = vpow2.f32 %v874_v8 }
 0x28e   : > { %3006 = vpow2.f32 %v844_v9 }
 0x28f   : > { %3008 = vpow2.f32 %v1673_v38 }
 0x290   : > { %v1585_v47 = vpop.xlane.xlu1 %1584 }
 0x291   : > { %v1619_v19 = vsub.f32 %v3539_v54, %v1585_v47 }
 0x292   : > { %v3829_v35 = vpop.eup %3002  ;;  %v3839_v44 = vpop.xlane.xlu2 %937 }
 0x293   : > { %v3833_v21 = vpop.eup %3004  ;;  %5364 = vst [vmem:[#allocation28_spill] sm:$0xff] %v3839_v44  ;;  %v1681_v38 = vmul.f32 1.442695, %v1619_v19 }
 0x294   : > { %5363 = vst [vmem:[#allocation27_spill] sm:$0xff] %v3833_v21  ;;  %v966_v43 = vsel %vm689_vm2, %v3833_v21, 0.0  ;;  %v3841_v8 = vpop.eup %3006 }
 0x295   : > { %5365 = vst [vmem:[#allocation29_spill] sm:$0xff] %v3841_v8  ;;  %v921_v30 = vsel %vm689_vm2, %v3841_v8, 0.0  ;;  %v3847_v59 = vpop.eup %3008  ;;  %3010 = vpow2.f32 %v1681_v38  ;;  %v878_v8 = vmul.f32 1.442695, %v816_v50  ;;  %v812_v50 = vsub.f32 %v3485_v56, %v3743_v26 }
 0x297   : > { %3012 = vpow2.f32 %v878_v8 }
 0x298   : > { %v1540_v21 = vpop.xlane.xlu1 %1539 }
 0x29a   : > { %v3849_v9 = vpop.xlane.xlu2 %892 }
 0x29b   : > { %5366 = vst [vmem:[#allocation30_spill] sm:$0xff] %v3849_v9  ;;  %v3862_v41 = vpop.eup %3010  ;;  %v1861_v9 = vsel %vm689_vm2, %v3818_v28, 0.0 }
 0x29c   : > { %5369 = vst [vmem:[#allocation33_spill] sm:$0xff] %v3862_v41 }
 0x29d   : > { %907 = vadd.xlane.f32.xlu1 %v906_v11  ;;  %v737_v11 = vpop.xlane.xlu0 %736  ;;  %v3869_v38 = vpop.eup %3012 }
 0x29e   : > { %v801_v47 = vsub.f32 %v3547_v3, %v737_v11  ;;  %5370 = vst [vmem:[#allocation34_spill] sm:$0xff] %v3869_v38 }
 0x2a0   : > { %1773 = vrot.lane.b32.xlu2 %v3822_v2, %s3172_s11  ;;  %v848_v54 = vmul.f32 1.442695, %v801_v47  ;;  %v785_v26 = vpop.xlane.xlu1 %784 }
 0x2a2   : > { %v3857_v7 = vpop.permute.xlu2 %1755 }
 0x2a3   : > { %v1870_v28 = vsel %vm689_vm2, %v3857_v7, 0.0 }
 0x2a5   : > { %v3843_v15 = vpop.permute.xlu0 %1717 }
 0x2a8   : > { %1743 = vrot.lane.b32.xlu2 %v3829_v35, %s3172_s11 }
 0x2aa   : > { %v1726_v19 = vpop.permute.xlu2 %1725 }
 0x2ac   : > { %967 = vadd.xlane.f32.xlu0 %v966_v43 }
 0x2ad   : > { %v3854_v43 = vpop.xlane.xlu0 %931 }
 0x2ae   : > { %5367 = vst [vmem:[#allocation31_spill] sm:$0xff] %v3854_v43 }
 0x2b2   : > { %v3879_v11 = vpop.xlane.xlu2 %946 }
 0x2b3   : > { %5372 = vst [vmem:[#allocation36_spill] sm:$0xff] %v3879_v11 }
 0x2b4   : > { %922 = vadd.xlane.f32.xlu0 %v921_v30  ;;  %v1604_v30 = vsub.f32 %v3547_v3, %v1540_v21  ;;  %v972_v3 = vsel %vm689_vm2, %v3869_v38, 0.0  ;;  %v1720_v38 = vpop.permute.xlu1 %1719 }
 0x2b5   : > { %v3860_v53 = vpop.xlane.xlu0 %886 }
 0x2b6   : > { %1769 = vrot.lane.b32.xlu1 %v3847_v59, %s3172_s11  ;;  %5368 = vst [vmem:[#allocation32_spill] sm:$0xff] %v3860_v53  ;;  %v1651_v52 = vmul.f32 1.442695, %v1604_v30 }
 0x2b8   : > { %3014 = vpow2.f32 %v1651_v52  ;;  %v870_v52 = vmul.f32 1.442695, %v812_v50 }
 0x2b9   : > { %3016 = vpow2.f32 %v848_v54 }
 0x2ba   : > { %3018 = vpow2.f32 %v870_v52  ;;  %v3889_v54 = vpop.xlane.xlu2 %901 }
 0x2bb   : > { %5375 = vst [vmem:[#allocation39_spill] sm:$0xff] %v3889_v54 }
 0x2bd   : > { %v3867_v16 = vpop.permute.xlu0 %1753 }
 0x2be   : > { %v3873_v21 = vpop.eup %3014 }
 0x2bf   : > { %5371 = vst [vmem:[#allocation35_spill] sm:$0xff] %v3873_v21  ;;  %v3881_v8 = vpop.eup %3016 }
 0x2c0   : > { %5373 = vst [vmem:[#allocation37_spill] sm:$0xff] %v3881_v8  ;;  %v927_v56 = vsel %vm689_vm2, %v3881_v8, 0.0  ;;  %v3887_v47 = vpop.eup %3018  ;;  %v1752_v8 = vpop.permute.xlu1 %1751 }
 0x2c1   : > { %5374 = vst [vmem:[#allocation38_spill] sm:$0xff] %v3887_v47  ;;  %v960_v50 = vsel %vm689_vm2, %v3887_v47, 0.0 }
 0x2c2   : > { %v1762_v11 = vpop.permute.xlu2 %1761 }
 0x2c5   : > { %v3883_v30 = vpop.permute.xlu0 %1723 }
 0x2c8   : > { %1777 = vrot.lane.b32.xlu0 %v3862_v41, %s3172_s11 }
 0x2ca   : > { %v1732_v47 = vpop.permute.xlu2 %1731 }
 0x2cd   : > { %v3891_v22 = vpop.xlane.xlu0 %940 }
 0x2ce   : > { %5376 = vst [vmem:[#allocation40_spill] sm:$0xff] %v3891_v22 }
 0x2d0   : > { %1747 = vrot.lane.b32.xlu0 %v3873_v21, %s3172_s11 }
 0x2d1   : > { %973 = vadd.xlane.f32.xlu2 %v972_v3  ;;  %v1620_v3 = vsub.f32 %v3556_v13, %v3801_v40 }
 0x2d3   : > { %v1683_v52 = vmul.f32 1.442695, %v1620_v3  ;;  %v3908_v3 = vpop.xlane.xlu1 %934 }
 0x2d4   : > { %5378 = vst [vmem:[#allocation42_spill] sm:$0xff] %v3908_v3 }
 0x2d5   : > { %v3897_v31 = vpop.xlane.xlu0 %895  ;;  %3020 = vpow2.f32 %v1683_v52 }
 0x2d6   : > { %5377 = vst [vmem:[#allocation41_spill] sm:$0xff] %v3897_v31 }
 0x2d9   : > { %928 = vadd.xlane.f32.xlu2 %v927_v56  ;;  %v1600_v56 = vsub.f32 %v3495_v1, %v3767_v49  ;;  %v3912_v49 = vpop.xlane.xlu2 %955 }
 0x2da   : > { %5379 = vst [vmem:[#allocation43_spill] sm:$0xff] %v3912_v49 }
 0x2db   : > { %v1643_v54 = vmul.f32 1.442695, %v1600_v56  ;;  %v3903_v22 = vpop.eup %3020  ;;  %v3921_v56 = vpop.xlane.xlu1 %889 }
 0x2dc   : > { %5381 = vst [vmem:[#allocation45_spill] sm:$0xff] %v3921_v56  ;;  %v797_v56 = vsub.f32 %v3495_v1, %v3751_v63 }
 0x2dd   : > { %v3901_v12 = vpop.permute.xlu0 %1759  ;;  %3022 = vpow2.f32 %v1643_v54 }
 0x2e0   : > { %961 = vadd.xlane.f32.xlu1 %v960_v50  ;;  %v817_v50 = vsub.f32 %v3556_v13, %v785_v26  ;;  %v1816_v13 = vsel %vm689_vm2, %v1720_v38, 0.0 }
 0x2e2   : > { %v880_v40 = vmul.f32 1.442695, %v817_v50 }
 0x2e3   : > { %v3910_v31 = vpop.eup %3022  ;;  %v1758_v49 = vpop.permute.xlu1 %1757 }
 0x2e4   : > { %3024 = vpow2.f32 %v880_v40  ;;  %v3927_v40 = vpop.xlane.xlu2 %910 }
 0x2e5   : > { %v3914_v52 = vpop.permute.xlu0 %1729  ;;  %5383 = vst [vmem:[#allocation47_spill] sm:$0xff] %v3927_v40  ;;  %v840_v40 = vmul.f32 1.442695, %v797_v56  ;;  %v1879_v56 = vsel %vm689_vm2, %v1762_v11, 0.0  ;;  %v1618_v11 = vsub.f32 %v3521_v36, %v3807_v0 }
 0x2e7   : > { %3026 = vpow2.f32 %v840_v40 }
 0x2ea   : > { %v3919_v26 = vpop.eup %3024 }
 0x2eb   : > { %5380 = vst [vmem:[#allocation44_spill] sm:$0xff] %v3919_v26  ;;  %v975_v50 = vsel %vm689_vm2, %v3919_v26, 0.0 }
 0x2ec   : > { %v1768_v38 = vpop.permute.xlu2 %1767 }
 0x2ed   : > { %v3923_v54 = vpop.xlane.xlu0 %949 }
 0x2ee   : > { %5382 = vst [vmem:[#allocation46_spill] sm:$0xff] %v3923_v54  ;;  %v1825_v54 = vsel %vm689_vm2, %v1726_v19, 0.0  ;;  %v3950_v19 = vpop.eup %3026 }
 0x2ef   : > { %5388 = vst [vmem:[#allocation52_spill] sm:$0xff] %v3950_v19  ;;  %v915_v7 = vsel %vm689_vm2, %v3950_v19, 0.0 }
 0x2f1   : > { %1779 = vrot.lane.b32.xlu2 %v3903_v22, %s3172_s11 }
 0x2f4   : > { %v1738_v3 = vpop.permute.xlu2 %1737 }
 0x2f5   : > { %v3931_v44 = vpop.xlane.xlu0 %904 }
 0x2f6   : > { %5384 = vst [vmem:[#allocation48_spill] sm:$0xff] %v3931_v44 }
 0x2f9   : > { %1739 = vrot.lane.b32.xlu1 %v3910_v31, %s3172_s11 }
 0x2fa   : > { %1817 = vadd.xlane.f32.xlu0 %v1816_v13  ;;  %v3933_v13 = vpop.xlane.xlu1 %943 }
 0x2fb   : > { %5385 = vst [vmem:[#allocation49_spill] sm:$0xff] %v3933_v13 }
 0x2fc   : > { %v3948_v63 = vpop.xlane.xlu2 %964 }
 0x2fd   : > { %v3938_v26 = vpop.permute.xlu0 %1765  ;;  %5387 = vst [vmem:[#allocation51_spill] sm:$0xff] %v3948_v63  ;;  %v1873_v63 = vsel %vm689_vm2, %v1758_v49, 0.0 }
 0x302   : > { %976 = vadd.xlane.f32.xlu0 %v975_v50  ;;  %v1728_v50 = vpop.permute.xlu1 %1727 }
 0x303   : > { %v1828_v19 = vsel %vm689_vm2, %v1728_v50, 0.0 }
 0x305   : > { %v3944_v44 = vpop.permute.xlu0 %1735 }
 0x30a   : > { %1862 = vadd.xlane.f32.xlu0 %v1861_v9  ;;  %v1819_v9 = vsel %vm689_vm2, %v3827_v34, 0.0  ;;  %v3946_v1 = vpop.xlane.xlu1 %898 }
 0x30b   : > { %5386 = vst [vmem:[#allocation50_spill] sm:$0xff] %v3946_v1 }
 0x30d   : > { %v3956_v34 = vpop.xlane.xlu0 %958 }
 0x30e   : > { %5389 = vst [vmem:[#allocation53_spill] sm:$0xff] %v3956_v34 }
 0x312   : > { %1826 = vadd.xlane.f32.xlu0 %v1825_v54  ;;  %v1864_v54 = vsel %vm689_vm2, %v1752_v8, 0.0  ;;  %v1764_v40 = vpop.permute.xlu1 %1763 }
 0x313   : > { %v1882_v0 = vsel %vm689_vm2, %v1764_v40, 0.0 }
 0x31a   : > { %1871 = vadd.xlane.f32.xlu0 %v1870_v28  ;;  %1820 = vadd.xlane.f32.xlu2 %v1819_v9  ;;  %v3958_v28 = vpop.xlane.xlu2 %919  ;;  %v1834_v9 = vsel %vm689_vm2, %v1732_v47, 0.0  ;;  %v3964_v8 = vpop.xlane.xlu1 %952 }
 0x31b   : > { %5390 = vst [vmem:[#allocation54_spill] sm:$0xff] %v3958_v28 }
 0x31c   : > { %5391 = vst [vmem:[#allocation55_spill] sm:$0xff] %v3964_v8 }
 0x322   : > { %1880 = vadd.xlane.f32.xlu0 %v1879_v56  ;;  %1865 = vadd.xlane.f32.xlu2 %v1864_v54  ;;  %v3966_v56 = vpop.xlane.xlu0 %913  ;;  %v1679_v54 = vmul.f32 1.442695, %v1618_v11  ;;  %v1774_v34 = vpop.permute.xlu2 %1773 }
 0x323   : > { %916 = vadd.xlane.f32.xlu1 %v915_v7  ;;  %5392 = vst [vmem:[#allocation56_spill] sm:$0xff] %v3966_v56  ;;  %v1888_v7 = vsel %vm689_vm2, %v1768_v38, 0.0  ;;  %v1734_v47 = vpop.permute.xlu1 %1733 }
 0x324   : > { %3028 = vpow2.f32 %v1679_v54  ;;  %v1837_v54 = vsel %vm689_vm2, %v1734_v47, 0.0 }
 0x32a   : > { %1835 = vadd.xlane.f32.xlu0 %v1834_v9  ;;  %1874 = vadd.xlane.f32.xlu2 %v1873_v63  ;;  %v3970_v49 = vpop.permute.xlu0 %1771  ;;  %v1843_v63 = vsel %vm689_vm2, %v1738_v3, 0.0  ;;  %v3974_v9 = vpop.eup %3028 }
 0x32b   : > { %v1744_v11 = vpop.permute.xlu2 %1743  ;;  %v3978_v38 = vpop.xlane.xlu1 %907 }
 0x32c   : > { %5393 = vst [vmem:[#allocation57_spill] sm:$0xff] %v3978_v38 }
 0x332   : > { %1889 = vadd.xlane.f32.xlu0 %v1888_v7  ;;  %1829 = vadd.xlane.f32.xlu2 %v1828_v19  ;;  %v3980_v50 = vpop.permute.xlu0 %1741  ;;  %v1897_v19 = vsel %vm689_vm2, %v1774_v34, 0.0  ;;  %v1852_v7 = vsel %vm689_vm2, %v1744_v11, 0.0  ;;  %v815_v34 = vsub.f32 %v3521_v36, %v3779_v33 }
 0x333   : > { %v1770_v40 = vpop.permute.xlu1 %1769 }
 0x33a   : > { %1844 = vadd.xlane.f32.xlu0 %v1843_v63  ;;  %1883 = vadd.xlane.f32.xlu2 %v1882_v0  ;;  %v3987_v63 = vpop.xlane.xlu0 %967  ;;  %v1891_v0 = vsel %vm689_vm2, %v1770_v40, 0.0 }
 0x33b   : > { %5395 = vst [vmem:[#allocation59_spill] sm:$0xff] %v3987_v63 }
 0x33c   : > { %1775 = vrot.lane.b32.xlu1 %v3974_v9, %s3172_s11 }
 0x342   : > { %1898 = vadd.xlane.f32.xlu0 %v1897_v19  ;;  %1838 = vadd.xlane.f32.xlu2 %v1837_v54  ;;  %v3992_v38 = vpop.xlane.xlu0 %922  ;;  %v876_v54 = vmul.f32 1.442695, %v815_v34  ;;  %v1603_v34 = vsub.f32 %v3531_v46, %v3812_v20 }
 0x343   : > { %5397 = vst [vmem:[#allocation61_spill] sm:$0xff] %v3992_v38 }
 0x344   : > { %v3984_v3 = vpop.xlane.xlu2 %973  ;;  %3030 = vpow2.f32 %v876_v54 }
 0x345   : > { %5394 = vst [vmem:[#allocation58_spill] sm:$0xff] %v3984_v3 }
 0x34a   : > { %1853 = vadd.xlane.f32.xlu0 %v1852_v7  ;;  %1892 = vadd.xlane.f32.xlu2 %v1891_v0  ;;  %v3997_v3 = vpop.permute.xlu0 %1777  ;;  %v3999_v11 = vpop.eup %3030 }
 0x34b   : > { %5398 = vst [vmem:[#allocation62_spill] sm:$0xff] %v3999_v11  ;;  %v969_v0 = vsel %vm689_vm2, %v3999_v11, 0.0 }
 0x34c   : > { %v3990_v28 = vpop.xlane.xlu2 %928 }
 0x34d   : > { %5396 = vst [vmem:[#allocation60_spill] sm:$0xff] %v3990_v28 }
 0x352   : > { %v4003_v7 = vpop.permute.xlu0 %1747 }
 0x353   : > { %v4001_v40 = vpop.xlane.xlu1 %961 }
 0x354   : > { %v1780_v47 = vpop.permute.xlu2 %1779  ;;  %5399 = vst [vmem:[#allocation63_spill] sm:$0xff] %v4001_v40 }
 0x355   : > { %v1906_v19 = vsel %vm689_vm2, %v1780_v47, 0.0  ;;  %v1649_v47 = vmul.f32 1.442695, %v1603_v34 }
 0x356   : > { %1907 = vadd.xlane.f32.xlu0 %v1906_v19 }
 0x357   : > { %3032 = vpow2.f32 %v1649_v47 }
 0x35d   : > { %v4014_v40 = vpop.eup %3032 }
 0x35e   : > { %5401 = vst [vmem:[#allocation65_spill] sm:$0xff] %v4014_v40 }
 0x366   : > { %970 = vadd.xlane.f32.xlu1 %v969_v0 }
 0x36b   : > { %v1740_v28 = vpop.permute.xlu1 %1739 }
 0x36c   : > { %v1846_v36 = vsel %vm689_vm2, %v1740_v28, 0.0 }
 0x36d   : > { %1847 = vadd.xlane.f32.xlu2 %v1846_v36  ;;  %v4008_v33 = vpop.xlane.xlu0 %1817 }
 0x375   : > { %v4012_v19 = vpop.xlane.xlu0 %976 }
 0x376   : > { %5400 = vst [vmem:[#allocation64_spill] sm:$0xff] %v4012_v19 }
 0x37d   : > { %v1863_v54 = vpop.xlane.xlu0 %1862 }
 0x37e   : > { %3034 = vrcp.f32 %v1863_v54  ;;  %v2160_v63 = vand.u32 2147483648, %v1863_v54  ;;  %vm2154_vm4 = vweird.f32 %v1863_v54  ;;  %v2158_v34 = vand.u32 2147483647, %v1863_v54 }
 0x37f   : > { %1745 = vrot.lane.b32.xlu1 %v4014_v40, %s3172_s11 }
 0x380   : > { %v2161_v56 = vor.u32 1.1754944e-38, %v2160_v63  ;;  %vm2159_vm6 = vcmp.eq.f32.partialorder %v2158_v34, 8.507059e+37 }
 0x384   : > { %v3035_v0 = vpop.eup %3034 }
 0x385   : > { %v2150_v11 = vmul.f32 %v3035_v0, %v1863_v54  ;;  %v4018_v28 = vpop.xlane.xlu0 %1826  ;;  %vm2155_vm3 = vweird.f32 %v3035_v0 }
 0x386   : > { %vm2156_vm5 = vmor %vm2154_vm4, %vm2155_vm3  ;;  %vm1974_vm0 = vweird.f32 %v4018_v28 }
 0x387   : > { %v2151_v36 = vsub.f32 1.0, %v2150_v11 }
 0x389   : > { %v2152_v38 = vmul.f32 %v3035_v0, %v2151_v36 }
 0x38b   : > { %v2153_v20 = vadd.f32 %v3035_v0, %v2152_v38 }
 0x38d   : > { %v1821_v47 = vpop.xlane.xlu2 %1820  ;;  %v1872_v19 = vpop.xlane.xlu0 %1871  ;;  %v2157_v8 = vsel %vm2156_vm5, %v3035_v0, %v2153_v20  ;;  %v800_v0 = vsub.f32 %v3531_v46, %v3791_v25 }
 0x38e   : > { %3036 = vrcp.f32 %v1821_v47  ;;  %v2162_v1 = vsel %vm2159_vm6, %v2161_v56, %v2157_v8  ;;  %v1948_v43 = vand.u32 2147483647, %v1821_v47  ;;  %vm1944_vm8 = vweird.f32 %v1821_v47 }
 0x38f   : > { %3038 = vrcp.f32 %v1872_v19  ;;  %v2163_v13 = vmul.f32 %v3579_v60, %v2162_v1  ;;  %v846_v56 = vmul.f32 1.442695, %v800_v0  ;;  %vm2199_vm12 = vweird.f32 %v1872_v19 }
 0x390   : > { %3040 = vrcp.f32 %v4018_v28  ;;  %vm1949_vm10 = vcmp.eq.f32.partialorder %v1948_v43, 8.507059e+37  ;;  %v2203_v40 = vand.u32 2147483647, %v1872_v19 }
 0x391   : > { %2455 = vrot.lane.b32.xlu0 %v2163_v13, %s3172_s11  ;;  %v1950_v13 = vand.u32 2147483648, %v1821_v47 }
 0x392   : > { %vm2204_vm14 = vcmp.eq.f32.partialorder %v2203_v40, 8.507059e+37 }
 0x393   : > { %v1951_v25 = vor.u32 1.1754944e-38, %v1950_v13  ;;  %v1980_v13 = vand.u32 2147483648, %v4018_v28 }
 0x394   : > { %v3037_v11 = vpop.eup %3036 }
 0x395   : > { %v3039_v36 = vpop.eup %3038  ;;  %v1940_v38 = vmul.f32 %v3037_v11, %v1821_v47  ;;  %v4023_v53 = vpop.xlane.xlu0 %1880  ;;  %vm1945_vm7 = vweird.f32 %v3037_v11 }
 0x396   : > { %v2195_v54 = vmul.f32 %v3039_v36, %v1872_v19  ;;  %v4027_v20 = vpop.eup %3040  ;;  %3042 = vrcp.f32 %v4023_v53  ;;  %vm1946_vm9 = vmor %vm1944_vm8, %vm1945_vm7  ;;  %vm2200_vm11 = vweird.f32 %v3039_v36  ;;  %vm2244_vm5 = vweird.f32 %v4023_v53 }
 0x397   : > { %v1941_v63 = vsub.f32 1.0, %v1940_v38  ;;  %v1970_v60 = vmul.f32 %v4027_v20, %v4018_v28  ;;  %3044 = vpow2.f32 %v846_v56  ;;  %vm2201_vm13 = vmor %vm2199_vm12, %vm2200_vm11  ;;  %vm1975_vm15 = vweird.f32 %v4027_v20 }
 0x398   : > { %v2196_v8 = vsub.f32 1.0, %v2195_v54  ;;  %vm1976_vm1 = vmor %vm1974_vm0, %vm1975_vm15 }
 0x399   : > { %v1942_v34 = vmul.f32 %v3037_v11, %v1941_v63  ;;  %v1971_v46 = vsub.f32 1.0, %v1970_v60  ;;  %v2205_v63 = vand.u32 2147483648, %v1872_v19 }
 0x39a   : > { %v2197_v21 = vmul.f32 %v3039_v36, %v2196_v8 }
 0x39b   : > { %v1943_v29 = vadd.f32 %v3037_v11, %v1942_v34  ;;  %v1972_v43 = vmul.f32 %v4027_v20, %v1971_v46  ;;  %v2206_v19 = vor.u32 1.1754944e-38, %v2205_v63  ;;  %v1978_v46 = vand.u32 2147483647, %v4018_v28 }
 0x39c   : > { %v2198_v38 = vadd.f32 %v3039_v36, %v2197_v21  ;;  %v4034_v0 = vpop.eup %3042  ;;  %v4045_v21 = vpop.xlane.xlu1 %916  ;;  %v1813_v28 = vsel %vm689_vm2, %v3843_v15, 0.0 }
 0x39d   : > { %v4032_v1 = vpop.xlane.xlu0 %1835  ;;  %v1947_v54 = vsel %vm1946_vm9, %v3037_v11, %v1943_v29  ;;  %v4037_v17 = vpop.eup %3044  ;;  %v2240_v29 = vmul.f32 %v4034_v0, %v4023_v53  ;;  %v1973_v8 = vadd.f32 %v4027_v20, %v1972_v43  ;;  %vm1979_vm3 = vcmp.eq.f32.partialorder %v1978_v46, 8.507059e+37 }
 0x39e   : > { %v1952_v41 = vsel %vm1949_vm10, %v1951_v25, %v1947_v54  ;;  %3046 = vrcp.f32 %v4032_v1  ;;  %v2202_v11 = vsel %vm2201_vm13, %v3039_v36, %v2198_v38  ;;  %vm2245_vm4 = vweird.f32 %v4034_v0 }
 0x39f   : > { %v1953_v34 = vmul.f32 %v3588_v4, %v1952_v41  ;;  %v924_v4 = vsel %vm689_vm2, %v4037_v17, 0.0  ;;  %v2207_v41 = vsel %vm2204_vm14, %v2206_v19, %v2202_v11  ;;  %v2241_v56 = vsub.f32 1.0, %v2240_v29  ;;  %vm2246_vm6 = vmor %vm2244_vm5, %vm2245_vm4 }
 0x3a0   : > { %v2208_v36 = vmul.f32 %v3638_v32, %v2207_v41  ;;  %v1977_v63 = vsel %vm1976_vm1, %v4027_v20, %v1973_v8  ;;  %v2248_v20 = vand.u32 2147483647, %v4023_v53  ;;  %vm2019_vm9 = vweird.f32 %v4032_v1 }
 0x3a1   : > { %2427 = vrot.lane.b32.xlu0 %v1953_v34, %s3172_s11  ;;  %v2242_v40 = vmul.f32 %v4034_v0, %v2241_v56  ;;  %v1981_v34 = vor.u32 1.1754944e-38, %v1980_v13 }
 0x3a2   : > { %vm2249_vm7 = vcmp.eq.f32.partialorder %v2248_v20, 8.507059e+37 }
 0x3a3   : > { %v1982_v43 = vsel %vm1979_vm3, %v1981_v34, %v1977_v63  ;;  %v2243_v29 = vadd.f32 %v4034_v0, %v2242_v40  ;;  %v2023_v63 = vand.u32 2147483647, %v4032_v1 }
 0x3a4   : > { %v3047_v60 = vpop.eup %3046  ;;  %v1983_v41 = vmul.f32 %v3643_v39, %v1982_v43  ;;  %v1822_v43 = vsel %vm689_vm2, %v3883_v30, 0.0 }
 0x3a5   : > { %v4040_v47 = vpop.xlane.xlu0 %1889  ;;  %v2015_v25 = vmul.f32 %v3047_v60, %v4032_v1  ;;  %v2247_v56 = vsel %vm2246_vm6, %v4034_v0, %v2243_v29  ;;  %vm2020_vm8 = vweird.f32 %v3047_v60  ;;  %vm2024_vm11 = vcmp.eq.f32.partialorder %v2023_v63, 8.507059e+37 }
 0x3a6   : > { %3048 = vrcp.f32 %v4040_v47  ;;  %vm2021_vm10 = vmor %vm2019_vm9, %vm2020_vm8  ;;  %v2295_v20 = vand.u32 2147483648, %v4040_v47  ;;  %vm2289_vm13 = vweird.f32 %v4040_v47 }
 0x3a7   : > { %v2016_v11 = vsub.f32 1.0, %v2015_v25 }
 0x3a9   : > { %925 = vadd.xlane.f32.xlu1 %v924_v4  ;;  %2461 = vrot.lane.b32.xlu0 %v2208_v36, %s3172_s11  ;;  %v2250_v4 = vand.u32 2147483648, %v4023_v53  ;;  %v2017_v15 = vmul.f32 %v3047_v60, %v2016_v11  ;;  %v1867_v36 = vsel %vm689_vm2, %v3867_v16, 0.0 }
 0x3ab   : > { %v2251_v13 = vor.u32 1.1754944e-38, %v2250_v4  ;;  %v2018_v39 = vadd.f32 %v3047_v60, %v2017_v15 }
 0x3ac   : > { %v3049_v19 = vpop.eup %3048 }
 0x3ad   : > { %v4060_v38 = vpop.xlane.xlu0 %1844  ;;  %v2285_v8 = vmul.f32 %v3049_v19, %v4040_v47  ;;  %v2252_v53 = vsel %vm2249_vm7, %v2251_v13, %v2247_v56  ;;  %vm2290_vm12 = vweird.f32 %v3049_v19  ;;  %v2296_v56 = vor.u32 1.1754944e-38, %v2295_v20 }
 0x3ae   : > { %v1776_v54 = vpop.permute.xlu1 %1775  ;;  %3050 = vrcp.f32 %v4060_v38  ;;  %v2253_v0 = vmul.f32 %v3688_v51, %v2252_v53  ;;  %vm2291_vm14 = vmor %vm2289_vm13, %vm2290_vm12  ;;  %v1876_v13 = vsel %vm689_vm2, %v3901_v12, 0.0  ;;  %vm2064_vm1 = vweird.f32 %v4060_v38 }
 0x3af   : > { %v1900_v32 = vsel %vm689_vm2, %v1776_v54, 0.0  ;;  %v2286_v40 = vsub.f32 1.0, %v2285_v8  ;;  %v2025_v54 = vand.u32 2147483648, %v4032_v1 }
 0x3b0   : > { %1901 = vadd.xlane.f32.xlu2 %v1900_v32 }
 0x3b1   : > { %1814 = vadd.xlane.f32.xlu1 %v1813_v28  ;;  %2431 = vrot.lane.b32.xlu0 %v1983_v41, %s3172_s11  ;;  %v2287_v34 = vmul.f32 %v3049_v19, %v2286_v40  ;;  %v2022_v28 = vsel %vm2021_vm10, %v3047_v60, %v2018_v39  ;;  %v2026_v32 = vor.u32 1.1754944e-38, %v2025_v54  ;;  %v2293_v41 = vand.u32 2147483647, %v4040_v47 }
 0x3b2   : > { %v2070_v40 = vand.u32 2147483648, %v4060_v38  ;;  %v2068_v54 = vand.u32 2147483647, %v4060_v38 }
 0x3b3   : > { %v2027_v29 = vsel %vm2024_vm11, %v2026_v32, %v2022_v28  ;;  %v2288_v11 = vadd.f32 %v3049_v19, %v2287_v34  ;;  %vm2294_vm15 = vcmp.eq.f32.partialorder %v2293_v41, 8.507059e+37  ;;  %v1885_v41 = vsel %vm689_vm2, %v3938_v26, 0.0 }
 0x3b4   : > { %v3051_v25 = vpop.eup %3050  ;;  %v2028_v60 = vmul.f32 %v3693_v37, %v2027_v29  ;;  %v2071_v34 = vor.u32 1.1754944e-38, %v2070_v40  ;;  %vm2069_vm4 = vcmp.eq.f32.partialorder %v2068_v54, 8.507059e+37  ;;  %v1840_v26 = vsel %vm689_vm2, %v3944_v44, 0.0 }
 0x3b5   : > { %v4076_v46 = vpop.xlane.xlu0 %1898  ;;  %v2060_v16 = vmul.f32 %v3051_v25, %v4060_v38  ;;  %v2292_v8 = vsel %vm2291_vm14, %v3049_v19, %v2288_v11  ;;  %vm2065_vm0 = vweird.f32 %v3051_v25 }
 0x3b6   : > { %3052 = vrcp.f32 %v4076_v46  ;;  %vm2066_vm3 = vmor %vm2064_vm1, %vm2065_vm0  ;;  %vm2334_vm6 = vweird.f32 %v4076_v46  ;;  %v2338_v29 = vand.u32 2147483647, %v4076_v46 }
 0x3b7   : > { %v2061_v1 = vsub.f32 1.0, %v2060_v16  ;;  %v1831_v16 = vsel %vm689_vm2, %v3914_v52, 0.0 }
 0x3b8   : > { %vm2339_vm8 = vcmp.eq.f32.partialorder %v2338_v29, 8.507059e+37 }
 0x3b9   : > { %1868 = vadd.xlane.f32.xlu1 %v1867_v36  ;;  %2467 = vrot.lane.b32.xlu0 %v2253_v0, %s3172_s11  ;;  %v2062_v30 = vmul.f32 %v3051_v25, %v2061_v1  ;;  %v2297_v36 = vsel %vm2294_vm15, %v2296_v56, %v2292_v8 }
 0x3ba   : > { %v2298_v19 = vmul.f32 %v3746_v57, %v2297_v36  ;;  %v2340_v57 = vand.u32 2147483648, %v4076_v46 }
 0x3bb   : > { %v2063_v53 = vadd.f32 %v3051_v25, %v2062_v30 }
 0x3bc   : > { %v3053_v4 = vpop.eup %3052  ;;  %v2341_v20 = vor.u32 1.1754944e-38, %v2340_v57 }
 0x3bd   : > { %v4089_v51 = vpop.xlane.xlu0 %1853  ;;  %v2330_v15 = vmul.f32 %v3053_v4, %v4076_v46  ;;  %v2067_v0 = vsel %vm2066_vm3, %v3051_v25, %v2063_v53  ;;  %vm2335_vm5 = vweird.f32 %v3053_v4  ;;  %vm1929_vm3 = vweird.f32 %v4008_v33 }
 0x3be   : > { %3054 = vrcp.f32 %v4089_v51  ;;  %v2072_v28 = vsel %vm2069_vm4, %v2071_v34, %v2067_v0  ;;  %vm2336_vm7 = vmor %vm2334_vm6, %vm2335_vm5  ;;  %v2115_v46 = vand.u32 2147483648, %v4089_v51  ;;  %vm2109_vm10 = vweird.f32 %v4089_v51  ;;  %v1866_v0 = vpop.xlane.xlu2 %1865 }
 0x3bf   : > { %v2331_v47 = vsub.f32 1.0, %v2330_v15  ;;  %v2073_v11 = vmul.f32 %v3757_v55, %v2072_v28  ;;  %v2113_v55 = vand.u32 2147483647, %v4089_v51 }
 0x3c1   : > { %1823 = vadd.xlane.f32.xlu1 %v1822_v43  ;;  %2437 = vrot.lane.b32.xlu0 %v2028_v60, %s3172_s11  ;;  %v2332_v63 = vmul.f32 %v3053_v4, %v2331_v47  ;;  %vm2114_vm12 = vcmp.eq.f32.partialorder %v2113_v55, 8.507059e+37 }
 0x3c3   : > { %v2333_v32 = vadd.f32 %v3053_v4, %v2332_v63 }
 0x3c4   : > { %v3055_v39 = vpop.eup %3054 }
 0x3c5   : > { %v2105_v12 = vmul.f32 %v3055_v39, %v4089_v51  ;;  %v2337_v52 = vsel %vm2336_vm7, %v3053_v4, %v2333_v32  ;;  %vm2110_vm9 = vweird.f32 %v3055_v39  ;;  %vm2169_vm7 = vweird.f32 %v1866_v0 }
 0x3c6   : > { %v2342_v60 = vsel %vm2339_vm8, %v2341_v20, %v2337_v52  ;;  %vm2111_vm11 = vmor %vm2109_vm10, %vm2110_vm9  ;;  %v4136_v34 = vpop.xlane.xlu2 %1874 }
 0x3c7   : > { %v2106_v38 = vsub.f32 1.0, %v2105_v12  ;;  %v2343_v8 = vmul.f32 %v3822_v2, %v2342_v60 }
 0x3c9   : > { %1877 = vadd.xlane.f32.xlu1 %v1876_v13  ;;  %v1908_v37 = vpop.xlane.xlu0 %1907  ;;  %2473 = vrot.lane.b32.xlu0 %v2298_v19, %s3172_s11  ;;  %v2107_v25 = vmul.f32 %v3055_v39, %v2106_v38  ;;  %v2116_v13 = vor.u32 1.1754944e-38, %v2115_v46 }
 0x3ca   : > { %3056 = vrcp.f32 %v1908_v37  ;;  %v2385_v47 = vand.u32 2147483648, %v1908_v37  ;;  %vm2379_vm14 = vweird.f32 %v1908_v37  ;;  %v2383_v40 = vand.u32 2147483647, %v1908_v37 }
 0x3cb   : > { %v2108_v30 = vadd.f32 %v3055_v39, %v2107_v25  ;;  %3058 = vrcp.f32 %v4008_v33  ;;  %v1935_v25 = vand.u32 2147483648, %v4008_v33 }
 0x3cc   : > { %v2386_v54 = vor.u32 1.1754944e-38, %v2385_v47  ;;  %vm2384_vm0 = vcmp.eq.f32.partialorder %v2383_v40, 8.507059e+37  ;;  %3060 = vrcp.f32 %v1866_v0 }
 0x3cd   : > { %v2112_v56 = vsel %vm2111_vm11, %v3055_v39, %v2108_v30  ;;  %v1894_v39 = vsel %vm689_vm2, %v3970_v49, 0.0  ;;  %v1903_v49 = vsel %vm689_vm2, %v3997_v3, 0.0  ;;  %3062 = vrcp.f32 %v4136_v34 }
 0x3ce   : > { %v2117_v36 = vsel %vm2114_vm12, %v2116_v13, %v2112_v56  ;;  %v4141_v38 = vpop.xlane.xlu2 %1829  ;;  %v1936_v60 = vor.u32 1.1754944e-38, %v1935_v25  ;;  %vm2214_vm11 = vweird.f32 %v4136_v34 }
 0x3cf   : > { %v2118_v51 = vmul.f32 %v3829_v35, %v2117_v36  ;;  %v1849_v35 = vsel %vm689_vm2, %v3980_v50, 0.0  ;;  %3064 = vrcp.f32 %v4141_v38 }
 0x3d0   : > { %v3057_v43 = vpop.eup %3056 }
 0x3d1   : > { %1832 = vadd.xlane.f32.xlu1 %v1831_v16  ;;  %v2375_v1 = vmul.f32 %v3057_v43, %v1908_v37  ;;  %2443 = vrot.lane.b32.xlu0 %v2073_v11, %s3172_s11  ;;  %vm2380_vm13 = vweird.f32 %v3057_v43  ;;  %v1858_v16 = vsel %vm689_vm2, %v4003_v7, 0.0  ;;  %v1933_v7 = vand.u32 2147483647, %v4008_v33 }
 0x3d2   : > { %vm2381_vm15 = vmor %vm2379_vm14, %vm2380_vm13 }
 0x3d3   : > { %v2376_v15 = vsub.f32 1.0, %v2375_v1  ;;  %vm1934_vm5 = vcmp.eq.f32.partialorder %v1933_v7, 8.507059e+37 }
 0x3d5   : > { %v2377_v4 = vmul.f32 %v3057_v43, %v2376_v15 }
 0x3d6   : > { %v4148_v1 = vpop.xlane.xlu2 %1883 }
 0x3d7   : > { %v2378_v53 = vadd.f32 %v3057_v43, %v2377_v4  ;;  %v2173_v4 = vand.u32 2147483647, %v1866_v0  ;;  %3066 = vrcp.f32 %v4148_v1 }
 0x3d9   : > { %1886 = vadd.xlane.f32.xlu1 %v1885_v41  ;;  %2479 = vrot.lane.b32.xlu0 %v2343_v8, %s3172_s11  ;;  %v2382_v2 = vsel %vm2381_vm15, %v3057_v43, %v2378_v53  ;;  %v4126_v19 = vpop.xlane.xlu1 %970  ;;  %v2175_v8 = vand.u32 2147483648, %v1866_v0  ;;  %vm2174_vm9 = vcmp.eq.f32.partialorder %v2173_v4, 8.507059e+37  ;;  %vm1989_vm15 = vweird.f32 %v4141_v38 }
 0x3da   : > { %v2387_v44 = vsel %vm2384_vm0, %v2386_v54, %v2382_v2 }
 0x3db   : > { %v2388_v63 = vmul.f32 %v3903_v22, %v2387_v44  ;;  %v3059_v22 = vpop.eup %3058  ;;  %v2176_v36 = vor.u32 1.1754944e-38, %v2175_v8 }
 0x3dc   : > { %v1925_v50 = vmul.f32 %v3059_v22, %v4008_v33  ;;  %v3061_v32 = vpop.eup %3060  ;;  %vm1930_vm1 = vweird.f32 %v3059_v22 }
 0x3dd   : > { %v2165_v43 = vmul.f32 %v3061_v32, %v1866_v0  ;;  %v3063_v11 = vpop.eup %3062  ;;  %vm1931_vm4 = vmor %vm1929_vm3, %vm1930_vm1  ;;  %vm2170_vm6 = vweird.f32 %v3061_v32 }
 0x3de   : > { %v1926_v28 = vsub.f32 1.0, %v1925_v50  ;;  %v2210_v20 = vmul.f32 %v3063_v11, %v4136_v34  ;;  %v3065_v15 = vpop.eup %3064  ;;  %vm2171_vm8 = vmor %vm2169_vm7, %vm2170_vm6  ;;  %v4155_v53 = vpop.xlane.xlu2 %1838  ;;  %vm2215_vm10 = vweird.f32 %v3063_v11 }
 0x3df   : > { %v2166_v29 = vsub.f32 1.0, %v2165_v43  ;;  %v1985_v56 = vmul.f32 %v3065_v15, %v4141_v38  ;;  %v4159_v2 = vpop.eup %3066  ;;  %3068 = vrcp.f32 %v4155_v53  ;;  %vm2216_vm12 = vmor %vm2214_vm11, %vm2215_vm10  ;;  %vm1990_vm14 = vweird.f32 %v3065_v15 }
 0x3e0   : > { %v1927_v3 = vmul.f32 %v3059_v22, %v1926_v28  ;;  %v2211_v55 = vsub.f32 1.0, %v2210_v20  ;;  %v1993_v28 = vand.u32 2147483647, %v4141_v38  ;;  %vm1991_vm0 = vmor %vm1989_vm15, %vm1990_vm14  ;;  %vm2260_vm3 = vweird.f32 %v4159_v2 }
 0x3e1   : > { %1841 = vadd.xlane.f32.xlu1 %v1840_v26  ;;  %2449 = vrot.lane.b32.xlu0 %v2118_v51, %s3172_s11  ;;  %v2167_v52 = vmul.f32 %v3061_v32, %v2166_v29  ;;  %v1986_v40 = vsub.f32 1.0, %v1985_v56 }
 0x3e2   : > { %v1928_v57 = vadd.f32 %v3059_v22, %v1927_v3  ;;  %v2212_v13 = vmul.f32 %v3063_v11, %v2211_v55  ;;  %vm1994_vm1 = vcmp.eq.f32.partialorder %v1993_v28, 8.507059e+37 }
 0x3e3   : > { %v2168_v46 = vadd.f32 %v3061_v32, %v2167_v52 }
 0x3e4   : > { %v1932_v41 = vsel %vm1931_vm4, %v3059_v22, %v1928_v57  ;;  %v2213_v54 = vadd.f32 %v3063_v11, %v2212_v13  ;;  %vm2259_vm4 = vweird.f32 %v4148_v1 }
 0x3e5   : > { %v1937_v30 = vsel %vm1934_vm5, %v1936_v60, %v1932_v41  ;;  %v2172_v26 = vsel %vm2171_vm8, %v3061_v32, %v2168_v46  ;;  %v4169_v0 = vpop.eup %3068  ;;  %v2265_v60 = vand.u32 2147483648, %v4148_v1  ;;  %vm4196_vm5 = vmor %vm2259_vm4, %vm2260_vm3 }
 0x3e6   : > { %v1938_v33 = vmul.f32 %v3575_v58, %v1937_v30  ;;  %v2177_v51 = vsel %vm2174_vm9, %v2176_v36, %v2172_v26  ;;  %v2220_v58 = vand.u32 2147483648, %v4136_v34  ;;  %v4171_v50 = vpop.xlane.xlu2 %1892  ;;  %v2030_v32 = vmul.f32 %v4169_v0, %v4155_v53 }
 0x3e7   : > { %v2178_v44 = vmul.f32 %v3583_v61, %v2177_v51  ;;  %v2266_v26 = vor.u32 1.1754944e-38, %v2265_v60  ;;  %vm2035_vm9 = vweird.f32 %v4169_v0 }
 0x3e8   : > { %v2031_v25 = vsub.f32 1.0, %v2030_v32 }
 0x3e9   : > { %1895 = vadd.xlane.f32.xlu1 %v1894_v39  ;;  %2485 = vrot.lane.b32.xlu0 %v2388_v63, %s3172_s11  ;;  %v2218_v39 = vand.u32 2147483647, %v4136_v34  ;;  %v1987_v63 = vmul.f32 %v3065_v15, %v1986_v40  ;;  %v1995_v34 = vand.u32 2147483648, %v4141_v38 }
 0x3ea   : > { %v2032_v46 = vmul.f32 %v4169_v0, %v2031_v25 }
 0x3eb   : > { %vm2219_vm13 = vcmp.eq.f32.partialorder %v2218_v39, 8.507059e+37  ;;  %v1988_v22 = vadd.f32 %v3065_v15, %v1987_v63  ;;  %v1996_v29 = vor.u32 1.1754944e-38, %v1995_v34 }
 0x3ec   : > { %v2033_v40 = vadd.f32 %v4169_v0, %v2032_v46 }
 0x3ed   : > { %v1992_v57 = vsel %vm1991_vm0, %v3065_v15, %v1988_v22  ;;  %v2263_v15 = vand.u32 2147483647, %v4148_v1 }
 0x3ee   : > { %v1997_v38 = vsel %vm1994_vm1, %v1996_v29, %v1992_v57  ;;  %v4186_v41 = vpop.xlane.xlu2 %1847 }
 0x3ef   : > { %v1998_v55 = vmul.f32 %v3682_v5, %v1997_v38  ;;  %vm2264_vm8 = vcmp.eq.f32.partialorder %v2263_v15, 8.507059e+37 }
 0x3f1   : > { %v1746_v37 = vpop.permute.xlu1 %1745  ;;  %1850 = vadd.xlane.f32.xlu1 %v1849_v35  ;;  %v2255_v35 = vmul.f32 %v4159_v2, %v4148_v1 }
 0x3f2   : > { %v1855_v12 = vsel %vm689_vm2, %v1746_v37, 0.0  ;;  %v2217_v37 = vsel %vm2216_vm12, %v3063_v11, %v2213_v54  ;;  %vm2034_vm12 = vweird.f32 %v4155_v53 }
 0x3f3   : > { %1856 = vadd.xlane.f32.xlu2 %v1855_v12  ;;  %v2221_v12 = vor.u32 1.1754944e-38, %v2220_v58 }
 0x3f5   : > { %v2222_v61 = vsel %vm2219_vm13, %v2221_v12, %v2217_v37  ;;  %vm4221_vm13 = vmor %vm2034_vm12, %vm2035_vm9 }
 0x3f6   : > { %v2223_v3 = vmul.f32 %v3634_v18, %v2222_v61 }
 0x3f9   : > { %1904 = vadd.xlane.f32.xlu1 %v1903_v49 }
 0x401   : > { %1859 = vadd.xlane.f32.xlu1 %v1858_v16  ;;  %v2256_v16 = vsub.f32 1.0, %v2255_v35  ;;  %v2040_v35 = vand.u32 2147483648, %v4155_v53 }
 0x403   : > { %v2257_v43 = vmul.f32 %v4159_v2, %v2256_v16  ;;  %v2038_v16 = vand.u32 2147483647, %v4155_v53 }
 0x405   : > { %v2258_v20 = vadd.f32 %v4159_v2, %v2257_v43  ;;  %vm2039_vm0 = vcmp.eq.f32.partialorder %v2038_v16, 8.507059e+37 }
 0x407   : > { %v2262_v1 = vsel %vm4196_vm5, %v4159_v2, %v2258_v20  ;;  %vm2304_vm5 = vweird.f32 %v4171_v50 }
 0x41a   : > { %2425 = vrot.lane.b32.xlu1 %v1938_v33, %s3172_s11 }
 0x41c   : > { %v4157_v47 = vpop.xlane.xlu1 %925 }
 0x422   : > { %2457 = vrot.lane.b32.xlu1 %v2178_v44, %s3172_s11  ;;  %v2267_v44 = vsel %vm2264_vm8, %v2266_v26, %v2262_v1 }
 0x423   : > { %v4217_v37 = vpop.xlane.xlu2 %1901  ;;  %v2268_v34 = vmul.f32 %v3728_v14, %v2267_v44 }
 0x424   : > { %v1815_v49 = vpop.xlane.xlu1 %1814 }
 0x425   : > { %3070 = vrcp.f32 %v1815_v49  ;;  %v1920_v33 = vand.u32 2147483648, %v1815_v49  ;;  %v1918_v13 = vand.u32 2147483647, %v1815_v49  ;;  %vm1914_vm7 = vweird.f32 %v1815_v49 }
 0x426   : > { %3072 = vrcp.f32 %v4171_v50 }
 0x427   : > { %v1921_v51 = vor.u32 1.1754944e-38, %v1920_v33  ;;  %vm1919_vm11 = vcmp.eq.f32.partialorder %v1918_v13, 8.507059e+37 }
 0x42a   : > { %2463 = vrot.lane.b32.xlu1 %v2223_v3, %s3172_s11  ;;  %v2037_v3 = vsel %vm4221_vm13, %v4169_v0, %v2033_v40  ;;  %vm2079_vm13 = vweird.f32 %v4186_v41 }
 0x42b   : > { %v3071_v11 = vpop.eup %3070 }
 0x42c   : > { %v1910_v7 = vmul.f32 %v3071_v11, %v1815_v49  ;;  %v4182_v52 = vpop.xlane.xlu1 %1868  ;;  %v4189_v18 = vpop.eup %3072  ;;  %vm1915_vm6 = vweird.f32 %v3071_v11 }
 0x42d   : > { %3074 = vrcp.f32 %v4182_v52  ;;  %v2300_v56 = vmul.f32 %v4189_v18, %v4171_v50  ;;  %vm1916_vm10 = vmor %vm1914_vm7, %vm1915_vm6  ;;  %v2190_v32 = vand.u32 2147483648, %v4182_v52  ;;  %v2188_v53 = vand.u32 2147483647, %v4182_v52 }
 0x42e   : > { %v1911_v30 = vsub.f32 1.0, %v1910_v7  ;;  %3076 = vrcp.f32 %v4186_v41  ;;  %vm2184_vm15 = vweird.f32 %v4182_v52  ;;  %vm2305_vm1 = vweird.f32 %v4189_v18 }
 0x42f   : > { %v2301_v2 = vsub.f32 1.0, %v2300_v56  ;;  %v2191_v0 = vor.u32 1.1754944e-38, %v2190_v32  ;;  %vm2189_vm4 = vcmp.eq.f32.partialorder %v2188_v53, 8.507059e+37  ;;  %vm4255_vm6 = vmor %vm2304_vm5, %vm2305_vm1 }
 0x430   : > { %v1912_v4 = vmul.f32 %v3071_v11, %v1911_v30 }
 0x431   : > { %v2302_v43 = vmul.f32 %v4189_v18, %v2301_v2 }
 0x432   : > { %v1913_v36 = vadd.f32 %v3071_v11, %v1912_v4  ;;  %2433 = vrot.lane.b32.xlu1 %v1998_v55, %s3172_s11  ;;  %v2308_v55 = vand.u32 2147483647, %v4171_v50 }
 0x433   : > { %v3075_v5 = vpop.eup %3074  ;;  %v2303_v20 = vadd.f32 %v4189_v18, %v2302_v43 }
 0x434   : > { %v2180_v54 = vmul.f32 %v3075_v5, %v4182_v52  ;;  %v4210_v58 = vpop.xlane.xlu1 %1823  ;;  %v1917_v39 = vsel %vm1916_vm10, %v3071_v11, %v1913_v36  ;;  %v4213_v63 = vpop.eup %3076  ;;  %vm2185_vm14 = vweird.f32 %v3075_v5  ;;  %v2310_v52 = vand.u32 2147483648, %v4171_v50 }
 0x435   : > { %3078 = vrcp.f32 %v4210_v58  ;;  %v1922_v49 = vsel %vm1919_vm11, %v1921_v51, %v1917_v39  ;;  %v2075_v57 = vmul.f32 %v4213_v63, %v4186_v41  ;;  %vm2186_vm3 = vmor %vm2184_vm15, %vm2185_vm14  ;;  %v1965_v56 = vand.u32 2147483648, %v4210_v58 }
 0x436   : > { %v2181_v12 = vsub.f32 1.0, %v2180_v54  ;;  %v1923_v61 = vmul.f32 %v3568_v6, %v1922_v49  ;;  %3080 = vrcp.f32 %v4217_v37  ;;  %v2041_v6 = vor.u32 1.1754944e-38, %v2040_v35 }
 0x437   : > { %v2076_v60 = vsub.f32 1.0, %v2075_v57  ;;  %v1963_v26 = vand.u32 2147483647, %v4210_v58  ;;  %v2311_v50 = vor.u32 1.1754944e-38, %v2310_v52  ;;  %vm1959_vm8 = vweird.f32 %v4210_v58 }
 0x438   : > { %v2182_v28 = vmul.f32 %v3075_v5, %v2181_v12  ;;  %2423 = vrot.lane.b32.xlu2 %v1923_v61, %s3172_s11  ;;  %v2042_v38 = vsel %vm2039_vm0, %v2041_v6, %v2037_v3  ;;  %vm2309_vm9 = vcmp.eq.f32.partialorder %v2308_v55, 8.507059e+37  ;;  %v1966_v40 = vor.u32 1.1754944e-38, %v1965_v56 }
 0x439   : > { %v2043_v13 = vmul.f32 %v3777_v48, %v2042_v38  ;;  %v2077_v1 = vmul.f32 %v4213_v63, %v2076_v60  ;;  %vm2080_vm11 = vweird.f32 %v4213_v63  ;;  %vm1964_vm12 = vcmp.eq.f32.partialorder %v1963_v26, 8.507059e+37 }
 0x43a   : > { %v2183_v14 = vadd.f32 %v3075_v5, %v2182_v28  ;;  %2469 = vrot.lane.b32.xlu1 %v2268_v34, %s3172_s11  ;;  %v2083_v49 = vand.u32 2147483647, %v4186_v41  ;;  %vm4281_vm14 = vmor %vm2079_vm13, %vm2080_vm11 }
 0x43b   : > { %v3079_v29 = vpop.eup %3078 }
 0x43c   : > { %v1955_v11 = vmul.f32 %v3079_v29, %v4210_v58  ;;  %v4243_v25 = vpop.xlane.xlu1 %1877  ;;  %v2187_v7 = vsel %vm2186_vm3, %v3075_v5, %v2183_v14  ;;  %v4248_v46 = vpop.eup %3080  ;;  %vm1960_vm7 = vweird.f32 %v3079_v29  ;;  %v2085_v58 = vand.u32 2147483648, %v4186_v41 }
 0x43d   : > { %3082 = vrcp.f32 %v4243_v25  ;;  %v2192_v15 = vsel %vm2189_vm4, %v2191_v0, %v2187_v7  ;;  %v2345_v36 = vmul.f32 %v4248_v46, %v4217_v37  ;;  %vm1961_vm10 = vmor %vm1959_vm8, %vm1960_vm7  ;;  %v2235_v34 = vand.u32 2147483648, %v4243_v25 }
 0x43e   : > { %v1956_v30 = vsub.f32 1.0, %v1955_v11  ;;  %v2193_v8 = vmul.f32 %v3617_v62, %v2192_v15  ;;  %v2307_v62 = vsel %vm4255_vm6, %v4189_v18, %v2303_v20  ;;  %v2078_v18 = vadd.f32 %v4213_v63, %v2077_v1 }
 0x43f   : > { %v2312_v44 = vsel %vm2309_vm9, %v2311_v50, %v2307_v62  ;;  %v2346_v2 = vsub.f32 1.0, %v2345_v36  ;;  %v2233_v32 = vand.u32 2147483647, %v4243_v25  ;;  %v2086_v3 = vor.u32 1.1754944e-38, %v2085_v58 }
 0x440   : > { %v1957_v33 = vmul.f32 %v3079_v29, %v1956_v30  ;;  %2459 = vrot.lane.b32.xlu2 %v2193_v8, %s3172_s11  ;;  %v2313_v28 = vmul.f32 %v3847_v59, %v2312_v44  ;;  %v2082_v41 = vsel %vm4281_vm14, %v4213_v63, %v2078_v18  ;;  %vm2229_vm0 = vweird.f32 %v4243_v25 }
 0x441   : > { %vm2084_vm1 = vcmp.eq.f32.partialorder %v2083_v49, 8.507059e+37  ;;  %v2236_v59 = vor.u32 1.1754944e-38, %v2235_v34  ;;  %vm2234_vm4 = vcmp.eq.f32.partialorder %v2233_v32, 8.507059e+37  ;;  %vm2350_vm5 = vweird.f32 %v4248_v46 }
 0x442   : > { %v1958_v5 = vadd.f32 %v3079_v29, %v1957_v33  ;;  %2439 = vrot.lane.b32.xlu1 %v2043_v13, %s3172_s11  ;;  %vm2349_vm6 = vweird.f32 %v4217_v37  ;;  %v2353_v20 = vand.u32 2147483647, %v4217_v37 }
 0x443   : > { %v3083_v48 = vpop.eup %3082  ;;  %vm4304_vm8 = vmor %vm2349_vm6, %vm2350_vm5 }
 0x444   : > { %v2225_v51 = vmul.f32 %v3083_v48, %v4243_v25  ;;  %v4272_v54 = vpop.xlane.xlu1 %1832  ;;  %v1962_v39 = vsel %vm1961_vm10, %v3079_v29, %v1958_v5  ;;  %vm2230_vm15 = vweird.f32 %v3083_v48  ;;  %v2087_v29 = vsel %vm2084_vm1, %v2086_v3, %v2082_v41 }
 0x445   : > { %3084 = vrcp.f32 %v4272_v54  ;;  %v1967_v12 = vsel %vm1964_vm12, %v1966_v40, %v1962_v39  ;;  %vm2231_vm3 = vmor %vm2229_vm0, %vm2230_vm15  ;;  %v2355_v25 = vand.u32 2147483648, %v4217_v37  ;;  %v2088_v38 = vmul.f32 %v3910_v31, %v2087_v29 }
 0x446   : > { %v2226_v35 = vsub.f32 1.0, %v2225_v51  ;;  %v1968_v22 = vmul.f32 %v3627_v10, %v1967_v12  ;;  %v2347_v10 = vmul.f32 %v4248_v46, %v2346_v2  ;;  %v2010_v52 = vand.u32 2147483648, %v4272_v54 }
 0x447   : > { %v2008_v15 = vand.u32 2147483647, %v4272_v54  ;;  %vm2004_vm9 = vweird.f32 %v4272_v54  ;;  %v2356_v37 = vor.u32 1.1754944e-38, %v2355_v25  ;;  %vm2354_vm11 = vcmp.eq.f32.partialorder %v2353_v20, 8.507059e+37 }
 0x448   : > { %v2227_v61 = vmul.f32 %v3083_v48, %v2226_v35  ;;  %2429 = vrot.lane.b32.xlu2 %v1968_v22, %s3172_s11  ;;  %v2348_v63 = vadd.f32 %v4248_v46, %v2347_v10  ;;  %v2011_v8 = vor.u32 1.1754944e-38, %v2010_v52 }
 0x449   : > { %vm2009_vm12 = vcmp.eq.f32.partialorder %v2008_v15, 8.507059e+37 }
 0x44a   : > { %v2228_v43 = vadd.f32 %v3083_v48, %v2227_v61  ;;  %2475 = vrot.lane.b32.xlu1 %v2313_v28, %s3172_s11  ;;  %v2352_v31 = vsel %vm4304_vm8, %v4248_v46, %v2348_v63 }
 0x44b   : > { %v3085_v57 = vpop.eup %3084  ;;  %v2357_v13 = vsel %vm2354_vm11, %v2356_v37, %v2352_v31 }
 0x44c   : > { %v2000_v53 = vmul.f32 %v3085_v57, %v4272_v54  ;;  %v1887_v6 = vpop.xlane.xlu1 %1886  ;;  %v2232_v14 = vsel %vm2231_vm3, %v3083_v48, %v2228_v43  ;;  %vm2005_vm7 = vweird.f32 %v3085_v57  ;;  %v2358_v46 = vmul.f32 %v3974_v9, %v2357_v13 }
 0x44d   : > { %3086 = vrcp.f32 %v1887_v6  ;;  %v2237_v11 = vsel %vm2234_vm4, %v2236_v59, %v2232_v14  ;;  %vm2006_vm10 = vmor %vm2004_vm9, %vm2005_vm7  ;;  %v2280_v36 = vand.u32 2147483648, %v1887_v6  ;;  %v2278_v5 = vand.u32 2147483647, %v1887_v6 }
 0x44e   : > { %v2001_v0 = vsub.f32 1.0, %v2000_v53  ;;  %v2238_v7 = vmul.f32 %v3667_v24, %v2237_v11  ;;  %vm2274_vm14 = vweird.f32 %v1887_v6 }
 0x44f   : > { %v2281_v51 = vor.u32 1.1754944e-38, %v2280_v36  ;;  %vm2279_vm0 = vcmp.eq.f32.partialorder %v2278_v5, 8.507059e+37 }
 0x450   : > { %v2002_v60 = vmul.f32 %v3085_v57, %v2001_v0  ;;  %2465 = vrot.lane.b32.xlu2 %v2238_v7, %s3172_s11 }
 0x452   : > { %v2003_v55 = vadd.f32 %v3085_v57, %v2002_v60  ;;  %2445 = vrot.lane.b32.xlu1 %v2088_v38, %s3172_s11 }
 0x453   : > { %v3087_v24 = vpop.eup %3086 }
 0x454   : > { %v2270_v4 = vmul.f32 %v3087_v24, %v1887_v6  ;;  %v1842_v33 = vpop.xlane.xlu1 %1841  ;;  %v2007_v56 = vsel %vm2006_vm10, %v3085_v57, %v2003_v55  ;;  %vm2275_vm13 = vweird.f32 %v3087_v24 }
 0x455   : > { %3088 = vrcp.f32 %v1842_v33  ;;  %v2012_v26 = vsel %vm2009_vm12, %v2011_v8, %v2007_v56  ;;  %vm2276_vm15 = vmor %vm2274_vm14, %vm2275_vm13  ;;  %v2055_v2 = vand.u32 2147483648, %v1842_v33  ;;  %v2053_v35 = vand.u32 2147483647, %v1842_v33 }
 0x456   : > { %v2271_v1 = vsub.f32 1.0, %v2270_v4  ;;  %v2013_v62 = vmul.f32 %v3676_v42, %v2012_v26  ;;  %vm2049_vm3 = vweird.f32 %v1842_v33 }
 0x457   : > { %v2056_v22 = vor.u32 1.1754944e-38, %v2055_v2  ;;  %vm2054_vm5 = vcmp.eq.f32.partialorder %v2053_v35, 8.507059e+37  ;;  %v5414_v2 = vld [vmem:[#allocation33_spill] sm:$0xff] }
 0x458   : > { %v2272_v50 = vmul.f32 %v3087_v24, %v2271_v1  ;;  %2435 = vrot.lane.b32.xlu2 %v2013_v62, %s3172_s11  ;;  %v5412_v62 = vld [vmem:[#allocation23_spill] sm:$0xff] }
 0x45a   : > { %v2273_v48 = vadd.f32 %v3087_v24, %v2272_v50  ;;  %2481 = vrot.lane.b32.xlu1 %v2358_v46, %s3172_s11 }
 0x45b   : > { %v3089_v40 = vpop.eup %3088 }
 0x45c   : > { %v2045_v54 = vmul.f32 %v3089_v40, %v1842_v33  ;;  %v1896_v39 = vpop.xlane.xlu1 %1895  ;;  %v2277_v44 = vsel %vm2276_vm15, %v3087_v24, %v2273_v48  ;;  %vm2050_vm1 = vweird.f32 %v3089_v40  ;;  %v5413_v48 = vld [vmem:[#allocation65_spill] sm:$0xff] }
 0x45d   : > { %3090 = vrcp.f32 %v1896_v39  ;;  %v2282_v18 = vsel %vm2279_vm0, %v2281_v51, %v2277_v44  ;;  %vm2051_vm4 = vmor %vm2049_vm3, %vm2050_vm1  ;;  %v2325_v3 = vand.u32 2147483648, %v1896_v39  ;;  %v2323_v43 = vand.u32 2147483647, %v1896_v39 }
 0x45e   : > { %v2046_v42 = vsub.f32 1.0, %v2045_v54  ;;  %v2283_v58 = vmul.f32 %v3718_v27, %v2282_v18  ;;  %vm2319_vm7 = vweird.f32 %v1896_v39 }
 0x45f   : > { %v2326_v53 = vor.u32 1.1754944e-38, %v2325_v3  ;;  %vm2324_vm9 = vcmp.eq.f32.partialorder %v2323_v43, 8.507059e+37 }
 0x460   : > { %v2047_v9 = vmul.f32 %v3089_v40, %v2046_v42  ;;  %2471 = vrot.lane.b32.xlu2 %v2283_v58, %s3172_s11 }
 0x462   : > { %v2048_v12 = vadd.f32 %v3089_v40, %v2047_v9 }
 0x463   : > { %v3091_v49 = vpop.eup %3090 }
 0x464   : > { %v2315_v16 = vmul.f32 %v3091_v49, %v1896_v39  ;;  %v1851_v61 = vpop.xlane.xlu1 %1850  ;;  %v2052_v34 = vsel %vm2051_vm4, %v3089_v40, %v2048_v12  ;;  %vm2320_vm6 = vweird.f32 %v3091_v49  ;;  %v2456_v39 = vpop.permute.xlu0 %2455 }
 0x465   : > { %3092 = vrcp.f32 %v1851_v61  ;;  %v2057_v41 = vsel %vm2054_vm5, %v2056_v22, %v2052_v34  ;;  %vm2321_vm8 = vmor %vm2319_vm7, %vm2320_vm6  ;;  %v2100_v7 = vand.u32 2147483648, %v1851_v61  ;;  %vm2094_vm11 = vweird.f32 %v1851_v61 }
 0x466   : > { %v2316_v28 = vsub.f32 1.0, %v2315_v16  ;;  %v1857_v32 = vpop.xlane.xlu2 %1856  ;;  %v2058_v10 = vmul.f32 %v3732_v45, %v2057_v41  ;;  %v2098_v60 = vand.u32 2147483647, %v1851_v61 }
 0x467   : > { %3094 = vrcp.f32 %v1857_v32  ;;  %v2130_v52 = vand.u32 2147483648, %v1857_v32  ;;  %v2128_v55 = vand.u32 2147483647, %v1857_v32  ;;  %v2101_v24 = vor.u32 1.1754944e-38, %v2100_v7 }
 0x468   : > { %v2317_v27 = vmul.f32 %v3091_v49, %v2316_v28  ;;  %2441 = vrot.lane.b32.xlu2 %v2058_v10, %s3172_s11  ;;  %vm2124_vm14 = vweird.f32 %v1857_v32  ;;  %vm2099_vm15 = vcmp.eq.f32.partialorder %v2098_v60, 8.507059e+37  ;;  %v687_v28 = vlaneseq }
 0x469   : > { %v2131_v33 = vor.u32 1.1754944e-38, %v2130_v52  ;;  %vm2129_vm1 = vcmp.eq.f32.partialorder %v2128_v55, 8.507059e+37 }
 0x46a   : > { %v2318_v57 = vadd.f32 %v3091_v49, %v2317_v27  ;;  %v5415_v27 = vld [vmem:[#allocation35_spill] sm:$0xff]  ;;  %v4332_v10 = vand.u32 127, %v687_v28 }
 0x46b   : > { %v3093_v59 = vpop.eup %3092 }
 0x46c   : > { %v2090_v6 = vmul.f32 %v3093_v59, %v1851_v61  ;;  %v1905_v14 = vpop.xlane.xlu1 %1904  ;;  %v2322_v29 = vsel %vm2321_vm8, %v3091_v49, %v2318_v57  ;;  %vm2095_vm10 = vweird.f32 %v3093_v59  ;;  %v2428_v61 = vpop.permute.xlu0 %2427  ;;  %v3173_v57 = vmov 0.0  }
 0x46d   : > { %v3095_v63 = vpop.eup %3094  ;;  %3096 = vrcp.f32 %v1905_v14  ;;  %v2327_v25 = vsel %vm2324_vm9, %v2326_v53, %v2322_v29  ;;  %vm2096_vm13 = vmor %vm2094_vm11, %vm2095_vm10  ;;  %v2370_v26 = vand.u32 2147483648, %v1905_v14  ;;  %v2368_v5 = vand.u32 2147483647, %v1905_v14 }
 0x46e   : > { %v2091_v0 = vsub.f32 1.0, %v2090_v6  ;;  %v2120_v11 = vmul.f32 %v3095_v63, %v1857_v32  ;;  %v2328_v45 = vmul.f32 %v3785_v23, %v2327_v25  ;;  %vm2125_vm12 = vweird.f32 %v3095_v63 }
 0x46f   : > { %vm2126_vm0 = vmor %vm2124_vm14, %vm2125_vm12  ;;  %vm2364_vm4 = vweird.f32 %v1905_v14  ;;  %v2371_v44 = vor.u32 1.1754944e-38, %v2370_v26  ;;  %vm2369_vm6 = vcmp.eq.f32.partialorder %v2368_v5, 8.507059e+37  ;;  %vm2389_vm11 = vcmp.eq.s32.totalorder %v4332_v10, 1  ;;  %v5417_v5 = vld [vmem:[#allocation25_spill] sm:$0xff] }
 0x470   : > { %v2092_v38 = vmul.f32 %v3093_v59, %v2091_v0  ;;  %v2121_v20 = vsub.f32 1.0, %v2120_v11  ;;  %2477 = vrot.lane.b32.xlu2 %v2328_v45, %s3172_s11 }
 0x472   : > { %v2093_v30 = vadd.f32 %v3093_v59, %v2092_v38  ;;  %v2122_v15 = vmul.f32 %v3095_v63, %v2121_v20 }
 0x473   : > { %v3097_v31 = vpop.eup %3096 }
 0x474   : > { %v2123_v37 = vadd.f32 %v3095_v63, %v2122_v15  ;;  %v2360_v8 = vmul.f32 %v3097_v31, %v1905_v14  ;;  %v1860_v4 = vpop.xlane.xlu1 %1859  ;;  %v2097_v23 = vsel %vm2096_vm13, %v3093_v59, %v2093_v30  ;;  %vm2365_vm3 = vweird.f32 %v3097_v31  ;;  %v2462_v53 = vpop.permute.xlu0 %2461 }
 0x475   : > { %3098 = vrcp.f32 %v1860_v4  ;;  %v2102_v13 = vsel %vm2099_vm15, %v2101_v24, %v2097_v23  ;;  %vm2366_vm5 = vmor %vm2364_vm4, %vm2365_vm3  ;;  %v2145_v12 = vand.u32 2147483648, %v1860_v4  ;;  %v2143_v22 = vand.u32 2147483647, %v1860_v4 }
 0x476   : > { %v2361_v56 = vsub.f32 1.0, %v2360_v8  ;;  %v2127_v1 = vsel %vm2126_vm0, %v3095_v63, %v2123_v37  ;;  %v2103_v50 = vmul.f32 %v5412_v62, %v2102_v13  ;;  %vm2139_vm8 = vweird.f32 %v1860_v4 }
 0x477   : > { %v2132_v36 = vsel %vm2129_vm1, %v2131_v33, %v2127_v1  ;;  %v2146_v34 = vor.u32 1.1754944e-38, %v2145_v12  ;;  %vm2144_vm10 = vcmp.eq.f32.partialorder %v2143_v22, 8.507059e+37  ;;  %v4337_v59 = vsel %vm2389_vm11, 1.0, %v3173_v57 }
 0x478   : > { %v2362_v46 = vmul.f32 %v3097_v31, %v2361_v56  ;;  %v2133_v40 = vmul.f32 %v5413_v48, %v2132_v36  ;;  %2447 = vrot.lane.b32.xlu2 %v2103_v50, %s3172_s11  ;;  %v2535_v6 = vsub.f32 %v4337_v59, %v2456_v39  ;;  %v2521_v20 = vsub.f32 %v4337_v59, %v2428_v61  ;;  %v5416_v36 = vld [vmem:[#allocation31_spill] sm:$0xff]  ;;  %v5418_v39 = vld [vmem:[#allocation32_spill] sm:$0xff] }
 0x479   : > { %v2538_v60 = vsub.f32 %v4337_v59, %v2462_v53  ;;  %3100 = vrcp.f32 %v5416_v36  ;;  %vm1223_vm13 = vweird.f32 %v5416_v36  ;;  %vm983_vm0 = vweird.f32 %v5417_v5 }
 0x47a   : > { %v2363_v51 = vadd.f32 %v3097_v31, %v2362_v46  ;;  %2451 = vrot.lane.b32.xlu1 %v2133_v40, %s3172_s11  ;;  %3102 = vrcp.f32 %v5417_v5 }
 0x47b   : > { %v3099_v54 = vpop.eup %3098  ;;  %3104 = vrcp.f32 %v5418_v39 }
 0x47c   : > { %v2135_v42 = vmul.f32 %v3099_v54, %v1860_v4  ;;  %v2367_v18 = vsel %vm2366_vm5, %v3097_v31, %v2363_v51  ;;  %vm2140_vm7 = vweird.f32 %v3099_v54  ;;  %v2432_v11 = vpop.permute.xlu0 %2431  ;;  %vm998_vm5 = vweird.f32 %v5418_v39 }
 0x47d   : > { %v2372_v58 = vsel %vm2369_vm6, %v2371_v44, %v2367_v18  ;;  %vm2141_vm9 = vmor %vm2139_vm8, %vm2140_vm7  ;;  %v2523_v24 = vsub.f32 %v4337_v59, %v2432_v11  ;;  %v1227_v11 = vand.u32 2147483647, %v5416_v36  ;;  %vm1458_vm7 = vcmp.eq.s32.totalorder %v4332_v10, 0 }
 0x47e   : > { %v2136_v9 = vsub.f32 1.0, %v2135_v42  ;;  %v2373_v35 = vmul.f32 %v5414_v2, %v2372_v58 }
 0x47f   : > { %vm1228_vm1 = vcmp.eq.f32.partialorder %v1227_v11, 8.507059e+37 }
 0x480   : > { %v2137_v49 = vmul.f32 %v3099_v54, %v2136_v9  ;;  %2483 = vrot.lane.b32.xlu2 %v2373_v35, %s3172_s11 }
 0x482   : > { %v2138_v16 = vadd.f32 %v3099_v54, %v2137_v49 }
 0x484   : > { %v2142_v32 = vsel %vm2141_vm9, %v3099_v54, %v2138_v16  ;;  %v2468_v52 = vpop.permute.xlu0 %2467  ;;  %v4375_v54 = vpop.eup %3100 }
 0x485   : > { %v2147_v41 = vsel %vm2144_vm10, %v2146_v34, %v2142_v32  ;;  %v2541_v56 = vsub.f32 %v4337_v59, %v2468_v52  ;;  %v4381_v58 = vpop.eup %3102  ;;  %v1219_v9 = vmul.f32 %v4375_v54, %v5416_v36  ;;  %vm1224_vm12 = vweird.f32 %v4375_v54 }
 0x486   : > { %v2148_v3 = vmul.f32 %v5415_v27, %v2147_v41  ;;  %v4386_v2 = vpop.eup %3104  ;;  %v979_v35 = vmul.f32 %v4381_v58, %v5417_v5  ;;  %v5419_v41 = vld [vmem:[#allocation42_spill] sm:$0xff]  ;;  %vm984_vm14 = vweird.f32 %v4381_v58  ;;  %vm4417_vm15 = vmor %vm1223_vm13, %vm1224_vm12 }
 0x487   : > { %v1220_v49 = vsub.f32 1.0, %v1219_v9  ;;  %v994_v61 = vmul.f32 %v4386_v2, %v5418_v39  ;;  %3106 = vrcp.f32 %v5419_v41  ;;  %vm4434_vm3 = vmor %vm983_vm0, %vm984_vm14  ;;  %vm999_vm4 = vweird.f32 %v4386_v2 }
 0x488   : > { %2453 = vrot.lane.b32.xlu2 %v2148_v3, %s3172_s11  ;;  %v980_v34 = vsub.f32 1.0, %v979_v35  ;;  %v5420_v3 = vld [vmem:[#allocation28_spill] sm:$0xff]  ;;  %vm4452_vm6 = vmor %vm998_vm5, %vm999_vm4  ;;  %vm1238_vm10 = vweird.f32 %v5419_v41 }
 0x489   : > { %v1221_v32 = vmul.f32 %v4375_v54, %v1220_v49  ;;  %3108 = vrcp.f32 %v5420_v3  ;;  %v995_v53 = vsub.f32 1.0, %v994_v61  ;;  %v1244_v49 = vand.u32 2147483648, %v5419_v41 }
 0x48a   : > { %v4475_v61 = vsel %vm1458_vm7, 1.0, %v3173_v57  ;;  %vm1253_vm12 = vweird.f32 %v5420_v3 }
 0x48c   : > { %v2426_v43 = vpop.permute.xlu1 %2425  ;;  %v2438_v37 = vpop.permute.xlu0 %2437 }
 0x48d   : > { %v2520_v25 = vsub.f32 %v4337_v59, %v2426_v43  ;;  %v2526_v46 = vsub.f32 %v4337_v59, %v2438_v37 }
 0x490   : > { %2615 = vrot.lane.b32.xlu2 %v2535_v6, %s3174_s13  ;;  %v981_v6 = vmul.f32 %v4381_v58, %v980_v34 }
 0x492   : > { %v2424_v14 = vpop.permute.xlu2 %2423 }
 0x493   : > { %v2519_v29 = vsub.f32 %v4337_v59, %v2424_v14 }
 0x494   : > { %v2458_v63 = vpop.permute.xlu1 %2457  ;;  %v2474_v26 = vpop.permute.xlu0 %2473 }
 0x495   : > { %v2536_v0 = vsub.f32 %v4337_v59, %v2458_v63  ;;  %2583 = vrot.lane.b32.xlu1 %v2519_v29, %s3174_s13  ;;  %v2544_v42 = vsub.f32 %v4337_v59, %v2474_v26 }
 0x497   : > { %2617 = vrot.lane.b32.xlu0 %v2536_v0, %s3174_s13  ;;  %v1222_v0 = vadd.f32 %v4375_v54, %v1221_v32  ;;  %v5432_v32 = vld [vmem:[#allocation2_spill] sm:$0xff] }
 0x498   : > { %2585 = vrot.lane.b32.xlu2 %v2520_v25, %s3174_s13  ;;  %v1229_v25 = vand.u32 2147483648, %v5416_v36 }
 0x49a   : > { %v2460_v7 = vpop.permute.xlu2 %2459  ;;  %v1230_v37 = vor.u32 1.1754944e-38, %v1229_v25  ;;  %v1257_v25 = vand.u32 2147483647, %v5420_v3 }
 0x49b   : > { %v2537_v45 = vsub.f32 %v4337_v59, %v2460_v7  ;;  %v4408_v7 = vpop.eup %3106 }
 0x49c   : > { %v2464_v38 = vpop.permute.xlu1 %2463  ;;  %v2444_v44 = vpop.permute.xlu0 %2443  ;;  %vm1239_vm13 = vweird.f32 %v4408_v7 }
 0x49d   : > { %2619 = vrot.lane.b32.xlu1 %v2537_v45, %s3174_s13  ;;  %v2539_v31 = vsub.f32 %v4337_v59, %v2464_v38  ;;  %v2529_v28 = vsub.f32 %v4337_v59, %v2444_v44  ;;  %v996_v45 = vmul.f32 %v4386_v2, %v995_v53  ;;  %v4414_v38 = vpop.eup %3108  ;;  %v5433_v53 = vld [vmem:[#allocation49_spill] sm:$0xff] }
 0x49e   : > { %vm1254_vm14 = vweird.f32 %v4414_v38 }
 0x49f   : > { %2587 = vrot.lane.b32.xlu0 %v2521_v20, %s3174_s13 }
 0x4a0   : > { %2621 = vrot.lane.b32.xlu2 %v2538_v60, %s3174_s13  ;;  %v5423_v60 = vld [vmem:[#allocation45_spill] sm:$0xff] }
 0x4a1   : > { %3110 = vrcp.f32 %v5423_v60  ;;  %vm1013_vm0 = vweird.f32 %v5423_v60 }
 0x4a2   : > { %v2430_v30 = vpop.permute.xlu2 %2429 }
 0x4a3   : > { %v2522_v15 = vsub.f32 %v4337_v59, %v2430_v30  ;;  %v982_v30 = vadd.f32 %v4381_v58, %v981_v6 }
 0x4a4   : > { %v2434_v55 = vpop.permute.xlu1 %2433  ;;  %v2480_v27 = vpop.permute.xlu0 %2479 }
 0x4a5   : > { %2589 = vrot.lane.b32.xlu1 %v2522_v15, %s3174_s13  ;;  %v2524_v33 = vsub.f32 %v4337_v59, %v2434_v55  ;;  %v2547_v52 = vsub.f32 %v4337_v59, %v2480_v27  ;;  %v989_v15 = vand.u32 2147483648, %v5417_v5  ;;  %v5424_v55 = vld [vmem:[#allocation30_spill] sm:$0xff] }
 0x4a6   : > { %3112 = vrcp.f32 %v5424_v55  ;;  %vm1028_vm4 = vweird.f32 %v5424_v55 }
 0x4a7   : > { %2623 = vrot.lane.b32.xlu0 %v2539_v31, %s3174_s13  ;;  %v1226_v31 = vsel %vm4417_vm15, %v4375_v54, %v1222_v0  ;;  %v990_v36 = vor.u32 1.1754944e-38, %v989_v15  ;;  %v5430_v54 = vld [vmem:[#allocation41_spill] sm:$0xff]  ;;  %v1019_v15 = vand.u32 2147483648, %v5423_v60  ;;  %vm4519_vm15 = vmor %vm1238_vm10, %vm1239_vm13 }
 0x4a8   : > { %2591 = vrot.lane.b32.xlu2 %v2523_v24, %s3174_s13  ;;  %v987_v24 = vand.u32 2147483647, %v5417_v5 }
 0x4aa   : > { %v2466_v8 = vpop.permute.xlu2 %2465  ;;  %vm988_vm8 = vcmp.eq.f32.partialorder %v987_v24, 8.507059e+37 }
 0x4ab   : > { %v2540_v4 = vsub.f32 %v4337_v59, %v2466_v8  ;;  %v1234_v8 = vmul.f32 %v4408_v7, %v5419_v41 }
 0x4ac   : > { %v2470_v23 = vpop.permute.xlu1 %2469 }
 0x4ad   : > { %2625 = vrot.lane.b32.xlu1 %v2540_v4, %s3174_s13  ;;  %v2542_v62 = vsub.f32 %v4337_v59, %v2470_v23  ;;  %v1249_v23 = vmul.f32 %v4414_v38, %v5420_v3 }
 0x4af   : > { %2593 = vrot.lane.b32.xlu0 %v2524_v33, %s3174_s13  ;;  %v5427_v33 = vld [vmem:[#allocation40_spill] sm:$0xff] }
 0x4b0   : > { %2627 = vrot.lane.b32.xlu2 %v2541_v56, %s3174_s13  ;;  %3114 = vrcp.f32 %v5427_v33  ;;  %v2450_v56 = vpop.permute.xlu0 %2449 }
 0x4b1   : > { %3116 = vrcp.f32 %v5430_v54  ;;  %v2532_v10 = vsub.f32 %v4337_v59, %v2450_v56  ;;  %v1034_v56 = vand.u32 2147483648, %v5424_v55 }
 0x4b2   : > { %v2436_v13 = vpop.permute.xlu2 %2435  ;;  %3118 = vrcp.f32 %v5433_v53 }
 0x4b3   : > { %v2525_v1 = vsub.f32 %v4337_v59, %v2436_v13  ;;  %v997_v13 = vadd.f32 %v4386_v2, %v996_v45 }
 0x4b4   : > { %v2440_v50 = vpop.permute.xlu1 %2439 }
 0x4b5   : > { %2595 = vrot.lane.b32.xlu1 %v2525_v1, %s3174_s13  ;;  %v2527_v51 = vsub.f32 %v4337_v59, %v2440_v50  ;;  %v1004_v1 = vand.u32 2147483648, %v5418_v39  ;;  %v986_v50 = vsel %vm4434_vm3, %v4381_v58, %v982_v30  ;;  %v1001_v58 = vsel %vm4452_vm6, %v4386_v2, %v997_v13  ;;  %vm4532_vm3 = vmor %vm1253_vm12, %vm1254_vm14 }
 0x4b6   : > { %v991_v9 = vsel %vm988_vm8, %v990_v36, %v986_v50  ;;  %v1017_v36 = vand.u32 2147483647, %v5423_v60  ;;  %vm1268_vm12 = vweird.f32 %v5427_v33  ;;  %vm1043_vm14 = vweird.f32 %v5430_v54 }
 0x4b7   : > { %2629 = vrot.lane.b32.xlu0 %v2542_v62, %s3174_s13  ;;  %v1231_v62 = vsel %vm1228_vm1, %v1230_v37, %v1226_v31  ;;  %v1005_v35 = vor.u32 1.1754944e-38, %v1004_v1  ;;  %v4482_v27 = vmul.f32 %v5432_v32, %v991_v9  ;;  %vm4526_vm1 = vcmp.eq.f32.partialorder %v1257_v25, 8.507059e+37  ;;  %v5447_v25 = vld [vmem:[#allocation46_spill] sm:$0xff] }
 0x4b8   : > { %2597 = vrot.lane.b32.xlu2 %v2526_v46, %s3174_s13  ;;  %v1002_v46 = vand.u32 2147483647, %v5418_v39  ;;  %v5431_v39 = vld [vmem:[#allocation3_spill] sm:$0xff]  ;;  %v2486_v20 = vpop.permute.xlu0 %2485  ;;  %vm4560_vm6 = vcmp.eq.f32.partialorder %v1017_v36, 8.507059e+37  ;;  %v1274_v32 = vand.u32 2147483648, %v5427_v33 }
 0x4b9   : > { %v2550_v1 = vsub.f32 %v4337_v59, %v2486_v20 }
 0x4ba   : > { %v2472_v48 = vpop.permute.xlu2 %2471  ;;  %vm1003_vm9 = vcmp.eq.f32.partialorder %v1002_v46, 8.507059e+37 }
 0x4bb   : > { %v2543_v40 = vsub.f32 %v4337_v59, %v2472_v48  ;;  %v4450_v48 = vpop.eup %3110 }
 0x4bc   : > { %v2476_v18 = vpop.permute.xlu1 %2475  ;;  %v4458_v44 = vpop.eup %3112  ;;  %vm1014_vm5 = vweird.f32 %v4450_v48 }
 0x4bd   : > { %2631 = vrot.lane.b32.xlu1 %v2543_v40, %s3174_s13  ;;  %v2545_v22 = vsub.f32 %v4337_v59, %v2476_v18  ;;  %v4462_v18 = vmul.f32 %v5431_v39, %v1231_v62  ;;  %v1024_v2 = vmul.f32 %v4458_v44, %v5424_v55  ;;  %v1032_v39 = vand.u32 2147483647, %v5424_v55  ;;  %vm4582_vm10 = vmor %vm1013_vm0, %vm1014_vm5 }
 0x4be   : > { %vm1029_vm7 = vweird.f32 %v4458_v44  ;;  %v1272_v55 = vand.u32 2147483647, %v5427_v33  ;;  %vm2711_vm0 = vcmask 31744  }
 0x4bf   : > { %2599 = vrot.lane.b32.xlu0 %v2527_v51, %s3174_s13  ;;  %v1235_v51 = vsub.f32 1.0, %v1234_v8  ;;  %v1476_v57 = vsub.f32 %v4475_v61, %v4462_v18  ;;  %v1025_v31 = vsub.f32 1.0, %v1024_v2  ;;  %v5437_v8 = vld [vmem:[#allocation36_spill] sm:$0xff] }
 0x4c0   : > { %2633 = vrot.lane.b32.xlu2 %v2544_v42, %s3174_s13  ;;  %v1250_v42 = vsub.f32 1.0, %v1249_v23  ;;  %3120 = vrcp.f32 %v5437_v8 }
 0x4c1   : > { %v1236_v34 = vmul.f32 %v4408_v7, %v1235_v51  ;;  %v1026_v40 = vmul.f32 %v4458_v44, %v1025_v31 }
 0x4c2   : > { %v2442_v12 = vpop.permute.xlu2 %2441 }
 0x4c3   : > { %v2528_v16 = vsub.f32 %v4337_v59, %v2442_v12  ;;  %v1242_v12 = vand.u32 2147483647, %v5419_v41  ;;  %v1237_v24 = vadd.f32 %v4408_v7, %v1236_v34  ;;  %v4536_v41 = vor.u32 1.1754944e-38, %v1019_v15  ;;  %v5452_v15 = vld [vmem:[#allocation50_spill] sm:$0xff] }
 0x4c4   : > { %v2446_v43 = vpop.permute.xlu1 %2445 }
 0x4c5   : > { %2601 = vrot.lane.b32.xlu1 %v2528_v16, %s3174_s13  ;;  %v2530_v29 = vsub.f32 %v4337_v59, %v2446_v43  ;;  %v1009_v16 = vmul.f32 %v4450_v48, %v5423_v60  ;;  %v1251_v43 = vmul.f32 %v4414_v38, %v1250_v42  ;;  %vm4496_vm11 = vcmp.eq.f32.partialorder %v1242_v12, 8.507059e+37 }
 0x4c6   : > { %v1241_v42 = vsel %vm4519_vm15, %v4408_v7, %v1237_v24  ;;  %v5455_v24 = vld [vmem:[#allocation48_spill] sm:$0xff] }
 0x4c7   : > { %2635 = vrot.lane.b32.xlu0 %v2545_v22, %s3174_s13  ;;  %v4470_v22 = vpop.eup %3114  ;;  %v1010_v45 = vsub.f32 1.0, %v1009_v16  ;;  %v1252_v4 = vadd.f32 %v4414_v38, %v1251_v43 }
 0x4c8   : > { %2603 = vrot.lane.b32.xlu2 %v2529_v28, %s3174_s13  ;;  %v1006_v28 = vsel %vm1003_vm9, %v1005_v35, %v1001_v58  ;;  %v4489_v6 = vpop.eup %3116  ;;  %v5444_v58 = vld [vmem:[#allocation39_spill] sm:$0xff]  ;;  %v1035_v35 = vor.u32 1.1754944e-38, %v1034_v56  ;;  %vm1269_vm8 = vweird.f32 %v4470_v22  ;;  %vm4576_vm9 = vcmp.eq.f32.partialorder %v1032_v39, 8.507059e+37 }
 0x4c9   : > { %v1039_v37 = vmul.f32 %v4489_v6, %v5430_v54  ;;  %v1011_v50 = vmul.f32 %v4450_v48, %v1010_v45  ;;  %3122 = vrcp.f32 %v5444_v58  ;;  %v1256_v9 = vsel %vm4532_vm3, %v4414_v38, %v1252_v4  ;;  %vm4617_vm13 = vmor %vm1268_vm12, %vm1269_vm8 }
 0x4ca   : > { %v2478_v14 = vpop.permute.xlu2 %2477  ;;  %3124 = vrcp.f32 %v5447_v25  ;;  %vm1044_vm15 = vweird.f32 %v4489_v6  ;;  %v1049_v39 = vand.u32 2147483648, %v5430_v54 }
 0x4cb   : > { %v2546_v63 = vsub.f32 %v4337_v59, %v2478_v14  ;;  %v1245_v14 = vor.u32 1.1754944e-38, %v1244_v49  ;;  %v1012_v34 = vadd.f32 %v4450_v48, %v1011_v50  ;;  %3126 = vrcp.f32 %v5452_v15  ;;  %vm4652_vm3 = vmor %vm1043_vm14, %vm1044_vm15 }
 0x4cc   : > { %3128 = vrcp.f32 %v5455_v24 }
 0x4cd   : > { %2637 = vrot.lane.b32.xlu1 %v2546_v63, %s3174_s13  ;;  %v1264_v63 = vmul.f32 %v4470_v22, %v5427_v33 }
 0x4cf   : > { %2605 = vrot.lane.b32.xlu0 %v2530_v29, %s3174_s13  ;;  %v1259_v29 = vand.u32 2147483648, %v5420_v3  ;;  %v1265_v13 = vsub.f32 1.0, %v1264_v63  ;;  %v1040_v3 = vsub.f32 1.0, %v1039_v37  ;;  %v5456_v37 = vld [vmem:[#allocation5_spill] sm:$0xff] }
 0x4d0   : > { %2639 = vrot.lane.b32.xlu2 %v2547_v52, %s3174_s13  ;;  %v5436_v52 = vld [vmem:[#allocation4_spill] sm:$0xff] }
 0x4d1   : > { %v4503_v30 = vmul.f32 %v5436_v52, %v1006_v28  ;;  %v1260_v23 = vor.u32 1.1754944e-38, %v1259_v29  ;;  %v1266_v12 = vmul.f32 %v4470_v22, %v1265_v13  ;;  %v1246_v28 = vsel %vm4496_vm11, %v1245_v14, %v1241_v42  ;;  %vm4596_vm11 = vmor %vm1028_vm4, %vm1029_vm7  ;;  %v5463_v14 = vld [vmem:[#allocation8_spill] sm:$0xff] }
 0x4d2   : > { %v2448_v26 = vpop.permute.xlu2 %2447  ;;  %v1027_v29 = vadd.f32 %v4458_v44, %v1026_v40  ;;  %v1041_v63 = vmul.f32 %v4489_v6, %v1040_v3  ;;  %v4602_v4 = vmul.f32 %v5456_v37, %v1246_v28  ;;  %v1016_v13 = vsel %vm4582_vm10, %v4450_v48, %v1012_v34  ;;  %v5468_v37 = vld [vmem:[#allocation9_spill] sm:$0xff] }
 0x4d3   : > { %v2531_v5 = vsub.f32 %v4337_v59, %v2448_v26  ;;  %v4515_v26 = vpop.eup %3118  ;;  %v1461_v51 = vsub.f32 %v4475_v61, %v4503_v30  ;;  %v1261_v43 = vsel %vm4526_vm1, %v1260_v23, %v1256_v9  ;;  %v1267_v45 = vadd.f32 %v4470_v22, %v1266_v12  ;;  %v5457_v23 = vld [vmem:[#allocation6_spill] sm:$0xff] }
 0x4d4   : > { %v1279_v49 = vmul.f32 %v4515_v26, %v5433_v53  ;;  %v4556_v16 = vpop.eup %3120  ;;  %v4605_v56 = vmul.f32 %v5457_v23, %v1261_v43  ;;  %v1031_v62 = vsel %vm4596_vm11, %v4458_v44, %v1027_v29  ;;  %v1042_v36 = vadd.f32 %v4489_v6, %v1041_v63  ;;  %v5462_v63 = vld [vmem:[#allocation7_spill] sm:$0xff] }
 0x4d5   : > { %2607 = vrot.lane.b32.xlu1 %v2531_v5, %s3174_s13  ;;  %v1294_v52 = vmul.f32 %v4556_v16, %v5437_v8  ;;  %v4590_v31 = vpop.eup %3122  ;;  %v1271_v40 = vsel %vm4617_vm13, %v4470_v22, %v1267_v45  ;;  %vm1273_vm1 = vcmp.eq.f32.partialorder %v1272_v55, 8.507059e+37  ;;  %v1021_v18 = vsel %vm4560_vm6, %v4536_v41, %v1016_v13 }
 0x4d6   : > { %v1280_v20 = vsub.f32 1.0, %v1279_v49  ;;  %v1069_v44 = vmul.f32 %v4590_v31, %v5444_v58  ;;  %v4636_v42 = vpop.eup %3124  ;;  %v1287_v34 = vand.u32 2147483647, %v5433_v53  ;;  %v1046_v28 = vsel %vm4652_vm3, %v4489_v6, %v1042_v36 }
 0x4d7   : > { %v1295_v48 = vsub.f32 1.0, %v1294_v52  ;;  %v4646_v49 = vpop.eup %3126  ;;  %vm1284_vm4 = vweird.f32 %v4515_v26  ;;  %v1309_v43 = vmul.f32 %v4636_v42, %v5447_v25  ;;  %v4681_v11 = vmul.f32 %v5462_v63, %v1021_v18 }
 0x4d8   : > { %2609 = vrot.lane.b32.xlu2 %v2532_v10, %s3174_s13  ;;  %v4554_v10 = vpop.permute.xlu1 %2481  ;;  %v1281_v33 = vmul.f32 %v4515_v26, %v1280_v20  ;;  %v1070_v2 = vsub.f32 1.0, %v1069_v44  ;;  %v1054_v29 = vmul.f32 %v4646_v49, %v5452_v15  ;;  %vm1283_vm6 = vweird.f32 %v5433_v53 }
 0x4d9   : > { %vm4689_vm7 = vmor %vm1283_vm6, %vm1284_vm4  ;;  %vm4693_vm8 = vcmp.eq.f32.partialorder %v1287_v34, 8.507059e+37  ;;  %v1310_v50 = vsub.f32 1.0, %v1309_v43  ;;  %vm1298_vm10 = vweird.f32 %v5437_v8  ;;  %v1304_v44 = vand.u32 2147483648, %v5437_v8 }
 0x4da   : > { %v4494_v0 = vpop.permute.xlu2 %2483  ;;  %v1282_v41 = vadd.f32 %v4515_v26, %v1281_v33  ;;  %v1071_v55 = vmul.f32 %v4590_v31, %v1070_v2  ;;  %v1055_v36 = vsub.f32 1.0, %v1054_v29  ;;  %v2548_v33 = vsub.f32 %v4337_v59, %v4554_v10  ;;  %v5470_v10 = vld [vmem:[#allocation43_spill] sm:$0xff] }
 0x4db   : > { %v2549_v3 = vsub.f32 %v4337_v59, %v4494_v0  ;;  %v1047_v0 = vand.u32 2147483647, %v5430_v54  ;;  %3130 = vrcp.f32 %v5470_v10  ;;  %vm1074_vm12 = vweird.f32 %v4590_v31 }
 0x4dc   : > { %v1305_v18 = vor.u32 1.1754944e-38, %v1304_v44  ;;  %vm1073_vm13 = vweird.f32 %v5444_v58  ;;  %vm1313_vm3 = vweird.f32 %v5447_v25  ;;  %vm1314_vm4 = vweird.f32 %v4636_v42 }
 0x4dd   : > { %vm1048_vm5 = vcmp.eq.f32.partialorder %v1047_v0, 8.507059e+37  ;;  %vm4743_vm15 = vmor %vm1073_vm13, %vm1074_vm12  ;;  %v1064_v20 = vand.u32 2147483648, %v5452_v15 }
 0x4e0   : > { %2645 = vrot.lane.b32.xlu2 %v2550_v1, %s3174_s13  ;;  %v1275_v1 = vor.u32 1.1754944e-38, %v1274_v32  ;;  %v1050_v32 = vor.u32 1.1754944e-38, %v1049_v39  ;;  %v1077_v39 = vand.u32 2147483647, %v5444_v58 }
 0x4e2   : > { %v2454_v7 = vpop.permute.xlu2 %2453  ;;  %v1276_v54 = vsel %vm1273_vm1, %v1275_v1, %v1271_v40  ;;  %v1051_v13 = vsel %vm1048_vm5, %v1050_v32, %v1046_v28  ;;  %vm4747_vm1 = vcmp.eq.f32.partialorder %v1077_v39, 8.507059e+37  ;;  %vm1059_vm5 = vweird.f32 %v4646_v49 }
 0x4e3   : > { %v2534_v38 = vsub.f32 %v4337_v59, %v2454_v7  ;;  %v4664_v7 = vpop.eup %3128  ;;  %v1277_v23 = vmul.f32 %v5468_v37, %v1276_v54  ;;  %v1062_v37 = vand.u32 2147483647, %v5452_v15  ;;  %v1462_v54 = vsub.f32 %v4475_v61, %v4681_v11 }
 0x4e4   : > { %v1084_v6 = vmul.f32 %v4664_v7, %v5455_v24  ;;  %v4759_v32 = vpop.eup %3130  ;;  %vm1089_vm6 = vweird.f32 %v4664_v7 }
 0x4e5   : > { %2613 = vrot.lane.b32.xlu1 %v2534_v38, %s3174_s13  ;;  %v1289_v38 = vand.u32 2147483648, %v5433_v53  ;;  %v1479_v22 = vsub.f32 %v4475_v61, %v1277_v23  ;;  %v1094_v23 = vand.u32 2147483648, %v5455_v24  ;;  %vm1063_vm13 = vcmp.eq.f32.partialorder %v1062_v37, 8.507059e+37 }
 0x4e7   : > { %v1290_v60 = vor.u32 1.1754944e-38, %v1289_v38 }
 0x4ea   : > { %v2616_v46 = vpop.permute.xlu2 %2615 }
 0x4eb   : > { %v2695_v9 = vsel %vm689_vm2, %v1476_v57, %v2616_v46  ;;  %v1036_v57 = vsel %vm4576_vm9, %v1035_v35, %v1031_v62  ;;  %v1296_v35 = vmul.f32 %v4556_v16, %v1295_v48  ;;  %vm1299_vm9 = vweird.f32 %v4556_v16 }
 0x4ec   : > { %v2452_v5 = vpop.permute.xlu1 %2451  ;;  %2728 = vst.msk [vmem:[%s4628_s16 + $0x80] sm:$0xff] %vm2711_vm0, %v2695_v9  ;;  %v4687_v45 = vmul.f32 %v5463_v14, %v1036_v57  ;;  %v1286_v62 = vsel %vm4689_vm7, %v4515_v26, %v1282_v41  ;;  %v1085_v46 = vsub.f32 1.0, %v1084_v6  ;;  %v1302_v26 = vand.u32 2147483647, %v5437_v8  ;;  %vm4724_vm11 = vmor %vm1298_vm10, %vm1299_vm9  ;;  %v5478_v41 = vld [vmem:[#allocation11_spill] sm:$0xff] }
 0x4ed   : > { %v2533_v12 = vsub.f32 %v4337_v59, %v2452_v5  ;;  %2643 = vrot.lane.b32.xlu1 %v2549_v3, %s3174_s13  ;;  %v1297_v53 = vadd.f32 %v4556_v16, %v1296_v35  ;;  %v5469_v5 = vld [vmem:[#allocation10_spill] sm:$0xff]  ;;  %v1079_v59 = vand.u32 2147483648, %v5444_v58  ;;  %v5473_v3 = vld [vmem:[#allocation53_spill] sm:$0xff]  ;;  %v1291_v8 = vsel %vm4693_vm8, %v1290_v60, %v1286_v62  ;;  %vm4777_vm7 = vmor %vm1313_vm3, %vm1314_vm4 }
 0x4ee   : > { %v4715_v40 = vmul.f32 %v5469_v5, %v1051_v13  ;;  %3132 = vrcp.f32 %v5473_v3  ;;  %v1311_v9 = vmul.f32 %v4636_v42, %v1310_v50  ;;  %v1086_v57 = vmul.f32 %v4664_v7, %v1085_v46  ;;  %v5487_v5 = vld [vmem:[#allocation55_spill] sm:$0xff] }
 0x4ef   : > { %2611 = vrot.lane.b32.xlu0 %v2533_v12, %s3174_s13  ;;  %v1056_v12 = vmul.f32 %v4646_v49, %v1055_v36  ;;  %v1301_v0 = vsel %vm4724_vm11, %v4556_v16, %v1297_v53  ;;  %vm1303_vm14 = vcmp.eq.f32.partialorder %v1302_v26, 8.507059e+37  ;;  %v1080_v28 = vor.u32 1.1754944e-38, %v1079_v59 }
 0x4f0   : > { %v1464_v34 = vsub.f32 %v4475_v61, %v4715_v40  ;;  %v4752_v16 = vmul.f32 %v5478_v41, %v1291_v8  ;;  %v1306_v35 = vsel %vm1303_vm14, %v1305_v18, %v1301_v0  ;;  %v1312_v43 = vadd.f32 %v4636_v42, %v1311_v9  ;;  %v5489_v0 = vld [vmem:[#allocation13_spill] sm:$0xff] }
 0x4f1   : > { %v1057_v29 = vadd.f32 %v4646_v49, %v1056_v12  ;;  %v1319_v14 = vand.u32 2147483648, %v5447_v25  ;;  %v1087_v52 = vadd.f32 %v4664_v7, %v1086_v57  ;;  %v1317_v60 = vand.u32 2147483647, %v5447_v25 }
 0x4f2   : > { %v2586_v1 = vpop.permute.xlu2 %2585  ;;  %vm1058_vm8 = vweird.f32 %v5452_v15  ;;  %vm1088_vm10 = vweird.f32 %v5455_v24  ;;  %v1092_v53 = vand.u32 2147483647, %v5455_v24  ;;  %v5486_v15 = vld [vmem:[#allocation47_spill] sm:$0xff]  ;;  %v1316_v50 = vsel %vm4777_vm7, %v4636_v42, %v1312_v43 }
 0x4f3   : > { %v2680_v48 = vsel %vm689_vm2, %v1461_v51, %v2586_v1  ;;  %v1072_v51 = vadd.f32 %v4590_v31, %v1071_v55  ;;  %vm4785_vm9 = vmor %vm1058_vm8, %vm1059_vm5  ;;  %v1339_v55 = vmul.f32 %v4759_v32, %v5470_v10  ;;  %v5483_v1 = vld [vmem:[#allocation56_spill] sm:$0xff]  ;;  %v1320_v36 = vor.u32 1.1754944e-38, %v1319_v14 }
 0x4f4   : > { %2713 = vst.msk [vmem:[%s4628_s16 + $0x8] sm:$0xff] %vm2711_vm0, %v2680_v48  ;;  %v4765_v6 = vpop.eup %3132  ;;  %3134 = vrcp.f32 %v5483_v1  ;;  %vm4794_vm11 = vmor %vm1088_vm10, %vm1089_vm6  ;;  %v1061_v24 = vsel %vm4785_vm9, %v4646_v49, %v1057_v29  ;;  %vm1318_vm12 = vcmp.eq.f32.partialorder %v1317_v60, 8.507059e+37  ;;  %v1095_v46 = vor.u32 1.1754944e-38, %v1094_v23 }
 0x4f5   : > { %v1076_v2 = vsel %vm4743_vm15, %v4590_v31, %v1072_v51  ;;  %3136 = vrcp.f32 %v5486_v15  ;;  %v1354_v62 = vmul.f32 %v4765_v6, %v5473_v3  ;;  %v1091_v48 = vsel %vm4794_vm11, %v4664_v7, %v1087_v52  ;;  %v5488_v51 = vld [vmem:[#allocation12_spill] sm:$0xff] }
 0x4f6   : > { %v1081_v44 = vsel %vm4747_vm1, %v1080_v28, %v1076_v2  ;;  %3138 = vrcp.f32 %v5487_v5  ;;  %vm1093_vm14 = vcmp.eq.f32.partialorder %v1092_v53, 8.507059e+37  ;;  %v1340_v42 = vsub.f32 1.0, %v1339_v55  ;;  %v5491_v28 = vld [vmem:[#allocation15_spill] sm:$0xff]  ;;  %v5494_v53 = vld [vmem:[#allocation57_spill] sm:$0xff] }
 0x4f7   : > { %2641 = vrot.lane.b32.xlu0 %v2548_v33, %s3174_s13  ;;  %v1065_v33 = vor.u32 1.1754944e-38, %v1064_v20  ;;  %v1321_v26 = vsel %vm1318_vm12, %v1320_v36, %v1316_v50  ;;  %v1355_v39 = vsub.f32 1.0, %v1354_v62  ;;  %v1096_v30 = vsel %vm1093_vm14, %v1095_v46, %v1091_v48 }
 0x4f8   : > { %v4815_v7 = vmul.f32 %v5488_v51, %v1306_v35  ;;  %v1460_v9 = vsub.f32 %v4475_v61, %v4482_v27  ;;  %v1477_v12 = vsub.f32 %v4475_v61, %v4602_v4  ;;  %v4828_v18 = vmul.f32 %v5489_v0, %v1081_v44  ;;  %v5493_v35 = vld [vmem:[#allocation16_spill] sm:$0xff] }
 0x4f9   : > { %v1066_v49 = vsel %vm1063_vm13, %v1065_v33, %v1061_v24  ;;  %v1463_v27 = vsub.f32 %v4475_v61, %v4687_v45  ;;  %v1341_v4 = vmul.f32 %v4759_v32, %v1340_v42  ;;  %v4843_v2 = vmul.f32 %v5493_v35, %v1096_v30 }
 0x4fa   : > { %v2622_v58 = vpop.permute.xlu2 %2621  ;;  %v4817_v8 = vpop.eup %3134  ;;  %v4838_v41 = vmul.f32 %v5491_v28, %v1066_v49  ;;  %v1480_v43 = vsub.f32 %v4475_v61, %v4752_v16  ;;  %v1356_v29 = vmul.f32 %v4765_v6, %v1355_v39  ;;  %v1481_v52 = vsub.f32 %v4475_v61, %v4815_v7 }
 0x4fb   : > { %v2698_v63 = vsel %vm689_vm2, %v1479_v22, %v2622_v58  ;;  %v1478_v22 = vsub.f32 %v4475_v61, %v4605_v56  ;;  %v4830_v57 = vpop.eup %3136  ;;  %v5492_v56 = vld [vmem:[#allocation59_spill] sm:$0xff]  ;;  %v1347_v31 = vand.u32 2147483647, %v5470_v10  ;;  %v1466_v23 = vsub.f32 %v4475_v61, %v4828_v18 }
 0x4fc   : > { %2731 = vst.msk [vmem:[%s4628_s16 + $0x98] sm:$0xff] %vm2711_vm0, %v2698_v63  ;;  %3140 = vrcp.f32 %v5492_v56  ;;  %v4847_v11 = vpop.eup %3138  ;;  %v1129_v63 = vmul.f32 %v4817_v8, %v5483_v1  ;;  %v1114_v60 = vmul.f32 %v4830_v57, %v5486_v15  ;;  %v1349_v13 = vand.u32 2147483648, %v5470_v10 }
 0x4fd   : > { %3142 = vrcp.f32 %v5494_v53  ;;  %v1465_v25 = vsub.f32 %v4475_v61, %v4838_v41  ;;  %v1342_v62 = vadd.f32 %v4759_v32, %v1341_v4  ;;  %vm1344_vm15 = vweird.f32 %v4759_v32 }
 0x4fe   : > { %v1324_v50 = vmul.f32 %v4847_v11, %v5487_v5  ;;  %v1467_v36 = vsub.f32 %v4475_v61, %v4843_v2  ;;  %v1357_v33 = vadd.f32 %v4765_v6, %v1356_v29  ;;  %vm1359_vm1 = vweird.f32 %v4765_v6 }
 0x4ff   : > { %v1130_v48 = vsub.f32 1.0, %v1129_v63  ;;  %vm1343_vm3 = vweird.f32 %v5470_v10  ;;  %vm4882_vm4 = vcmp.eq.f32.partialorder %v1347_v31, 8.507059e+37  ;;  %v1350_v39 = vor.u32 1.1754944e-38, %v1349_v13  ;;  %v5504_v13 = vld [vmem:[#allocation63_spill] sm:$0xff] }
 0x500   : > { %vm4889_vm5 = vmor %vm1343_vm3, %vm1344_vm15  ;;  %vm1358_vm6 = vweird.f32 %v5473_v3  ;;  %v1362_v10 = vand.u32 2147483647, %v5473_v3  ;;  %v1122_v30 = vand.u32 2147483647, %v5486_v15  ;;  %v1325_v51 = vsub.f32 1.0, %v1324_v50 }
 0x501   : > { %vm4899_vm7 = vmor %vm1358_vm6, %vm1359_vm1  ;;  %vm1118_vm8 = vweird.f32 %v5486_v15  ;;  %vm1119_vm9 = vweird.f32 %v4830_v57  ;;  %vm1134_vm11 = vweird.f32 %v4817_v8  ;;  %vm1133_vm13 = vweird.f32 %v5483_v1 }
 0x502   : > { %v2592_v40 = vpop.permute.xlu2 %2591  ;;  %v4879_v46 = vpop.eup %3140  ;;  %v1361_v35 = vsel %vm4899_vm7, %v4765_v6, %v1357_v33  ;;  %vm1363_vm10 = vcmp.eq.f32.partialorder %v1362_v10, 8.507059e+37  ;;  %vm4932_vm12 = vcmp.eq.f32.partialorder %v1122_v30, 8.507059e+37  ;;  %v1139_v33 = vand.u32 2147483648, %v5483_v1  ;;  %vm4957_vm15 = vmor %vm1133_vm13, %vm1134_vm11  ;;  %v5510_v10 = vld [vmem:[#allocation64_spill] sm:$0xff] }
 0x503   : > { %v2683_v59 = vsel %vm689_vm2, %v1464_v34, %v2592_v40  ;;  %v5490_v34 = vld [vmem:[#allocation14_spill] sm:$0xff]  ;;  %v1115_v40 = vsub.f32 1.0, %v1114_v60  ;;  %v1399_v28 = vmul.f32 %v4879_v46, %v5492_v56  ;;  %v1137_v42 = vand.u32 2147483647, %v5483_v1  ;;  %vm4976_vm1 = vmor %vm1118_vm8, %vm1119_vm9 }
 0x504   : > { %2716 = vst.msk [vmem:[%s4628_s16 + $0x20] sm:$0xff] %vm2711_vm0, %v2683_v59  ;;  %v1322_v38 = vmul.f32 %v5490_v34, %v1321_v26  ;;  %v1364_v26 = vand.u32 2147483648, %v5473_v3  ;;  %v1124_v59 = vand.u32 2147483648, %v5486_v15  ;;  %v1346_v34 = vsel %vm4889_vm5, %v4759_v32, %v1342_v62 }
 0x505   : > { %v1131_v3 = vmul.f32 %v4817_v8, %v1130_v48  ;;  %v1116_v2 = vmul.f32 %v4830_v57, %v1115_v40  ;;  %v1351_v6 = vsel %vm4882_vm4, %v1350_v39, %v1346_v34  ;;  %v5505_v48 = vld [vmem:[#allocation17_spill] sm:$0xff]  ;;  %v5506_v40 = vld [vmem:[#allocation51_spill] sm:$0xff]  ;;  %vm1329_vm14 = vweird.f32 %v4847_v11 }
 0x506   : > { %v1482_v55 = vsub.f32 %v4475_v61, %v1322_v38  ;;  %v4907_v38 = vpop.eup %3142  ;;  %v1365_v29 = vor.u32 1.1754944e-38, %v1364_v26  ;;  %v4922_v63 = vor.u32 1.1754944e-38, %v1124_v59  ;;  %vm1328_vm3 = vweird.f32 %v5487_v5 }
 0x507   : > { %v2584_v58 = vpop.permute.xlu1 %2583  ;;  %v1132_v60 = vadd.f32 %v4817_v8, %v1131_v3  ;;  %v1117_v50 = vadd.f32 %v4830_v57, %v1116_v2  ;;  %v1140_v45 = vor.u32 1.1754944e-38, %v1139_v33  ;;  %vm4992_vm4 = vmor %vm1328_vm3, %vm1329_vm14  ;;  %vm1138_vm5 = vcmp.eq.f32.partialorder %v1137_v42, 8.507059e+37 }
 0x508   : > { %v2679_v14 = vsel %vm689_vm2, %v1460_v9, %v2584_v58  ;;  %vm1404_vm6 = vweird.f32 %v4879_v46  ;;  %vm1403_vm8 = vweird.f32 %v5492_v56  ;;  %vm1103_vm9 = vweird.f32 %v5494_v53 }
 0x509   : > { %v2618_v20 = vpop.permute.xlu0 %2617  ;;  %2712 = vst.msk [vmem:[%s4628_s16] sm:$0xff] %vm2711_vm0, %v2679_v14  ;;  %v1099_v14 = vmul.f32 %v4907_v38, %v5494_v53  ;;  %v1136_v34 = vsel %vm4957_vm15, %v4817_v8, %v1132_v60  ;;  %v1121_v16 = vsel %vm4976_vm1, %v4830_v57, %v1117_v50  ;;  %v5515_v60 = vld [vmem:[#allocation21_spill] sm:$0xff]  ;;  %vm5032_vm11 = vmor %vm1403_vm8, %vm1404_vm6  ;;  %v1452_v7 = vand.u32 2147483647, %v5510_v10 }
 0x50a   : > { %v2696_v37 = vsel %vm689_vm2, %v1477_v12, %v2618_v20  ;;  %v2628_v24 = vpop.permute.xlu2 %2627  ;;  %v5501_v12 = vld [vmem:[#allocation61_spill] sm:$0xff] }
 0x50b   : > { %2729 = vst.msk [vmem:[%s4628_s16 + $0x88] sm:$0xff] %vm2711_vm0, %v2696_v37  ;;  %v2701_v44 = vsel %vm689_vm2, %v1482_v55, %v2628_v24  ;;  %3144 = vrcp.f32 %v5501_v12  ;;  %v1400_v37 = vsub.f32 1.0, %v1399_v28  ;;  %v1334_v24 = vand.u32 2147483648, %v5487_v5 }
 0x50c   : > { %2734 = vst.msk [vmem:[%s4628_s16 + $0xb0] sm:$0xff] %vm2711_vm0, %v2701_v44  ;;  %3146 = vrcp.f32 %v5504_v13  ;;  %v4947_v44 = vmul.f32 %v5505_v48, %v1351_v6  ;;  %v1100_v59 = vsub.f32 1.0, %v1099_v14  ;;  %v1332_v28 = vand.u32 2147483647, %v5487_v5 }
 0x50d   : > { %3148 = vrcp.f32 %v5506_v40  ;;  %v1401_v1 = vmul.f32 %v4879_v46, %v1400_v37  ;;  %v1409_v14 = vand.u32 2147483648, %v5492_v56  ;;  %vm1178_vm1 = vweird.f32 %v5501_v12 }
 0x50e   : > { %3150 = vrcp.f32 %v5510_v10  ;;  %vm1333_vm7 = vcmp.eq.f32.partialorder %v1332_v28, 8.507059e+37 }
 0x50f   : > { %v2620_v0 = vpop.permute.xlu1 %2619  ;;  %3152 = vrcp.f32 %v4045_v21 }
 0x510   : > { %v2697_v4 = vsel %vm689_vm2, %v1478_v22, %v2620_v0  ;;  %v1326_v22 = vmul.f32 %v4847_v11, %v1325_v51 }
 0x511   : > { %v2588_v58 = vpop.permute.xlu0 %2587  ;;  %2730 = vst.msk [vmem:[%s4628_s16 + $0x90] sm:$0xff] %vm2711_vm0, %v2697_v4  ;;  %v4939_v62 = vpop.eup %3144  ;;  %v1335_v4 = vor.u32 1.1754944e-38, %v1334_v24 }
 0x512   : > { %v2681_v32 = vsel %vm689_vm2, %v1462_v54, %v2588_v58  ;;  %v2598_v20 = vpop.permute.xlu2 %2597  ;;  %v1366_v54 = vsel %vm1363_vm10, %v1365_v29, %v1361_v35  ;;  %v1327_v49 = vadd.f32 %v4847_v11, %v1326_v22  ;;  %v1174_v51 = vmul.f32 %v4939_v62, %v5501_v12 }
 0x513   : > { %2714 = vst.msk [vmem:[%s4628_s16 + $0x10] sm:$0xff] %vm2711_vm0, %v2681_v32  ;;  %v2686_v55 = vsel %vm689_vm2, %v1467_v36, %v2598_v20  ;;  %v5507_v36 = vld [vmem:[#allocation20_spill] sm:$0xff]  ;;  %v1141_v35 = vsel %vm1138_vm5, %v1140_v45, %v1136_v34  ;;  %v1402_v32 = vadd.f32 %v4879_v46, %v1401_v1  ;;  %vm1104_vm10 = vweird.f32 %v4907_v38  ;;  %v5520_v1 = vld [vmem:[#allocation19_spill] sm:$0xff] }
 0x514   : > { %2719 = vst.msk [vmem:[%s4628_s16 + $0x38] sm:$0xff] %vm2711_vm0, %v2686_v55  ;;  %v1367_v26 = vmul.f32 %v5507_v36, %v1366_v54  ;;  %v1331_v2 = vsel %vm4992_vm4, %v4847_v11, %v1327_v49  ;;  %v1175_v6 = vsub.f32 1.0, %v1174_v51  ;;  %v1126_v11 = vsel %vm4932_vm12, %v4922_v63, %v1121_v16  ;;  %vm5057_vm12 = vmor %vm1103_vm9, %vm1104_vm10  ;;  %v5521_v51 = vld [vmem:[#allocation54_spill] sm:$0xff] }
 0x515   : > { %v1407_v54 = vand.u32 2147483647, %v5492_v56  ;;  %v1142_v37 = vmul.f32 %v5515_v60, %v1141_v35  ;;  %v1336_v55 = vsel %vm1333_vm7, %v1335_v4, %v1331_v2  ;;  %v1406_v36 = vsel %vm5032_vm11, %v4879_v46, %v1402_v32  ;;  %v5526_v63 = vld [vmem:[#allocation26_spill] sm:$0xff] }
 0x516   : > { %v1485_v5 = vsub.f32 %v4475_v61, %v1367_v26  ;;  %v1176_v31 = vmul.f32 %v4939_v62, %v1175_v6  ;;  %v1109_v26 = vand.u32 2147483648, %v5494_v53  ;;  %v1410_v49 = vor.u32 1.1754944e-38, %v1409_v14  ;;  %v5525_v6 = vld [vmem:[#allocation18_spill] sm:$0xff] }
 0x517   : > { %v2590_v30 = vpop.permute.xlu1 %2589  ;;  %vm1408_vm13 = vcmp.eq.f32.partialorder %v1407_v54, 8.507059e+37  ;;  %v1470_v46 = vsub.f32 %v4475_v61, %v1142_v37  ;;  %v1337_v41 = vmul.f32 %v5520_v1, %v1336_v55  ;;  %3154 = vrcp.f32 %v5521_v51 }
 0x518   : > { %v2682_v9 = vsel %vm689_vm2, %v1463_v27, %v2590_v30  ;;  %v4988_v27 = vpop.eup %3146  ;;  %vm1179_vm14 = vweird.f32 %v4939_v62  ;;  %v1484_v2 = vsub.f32 %v4475_v61, %v4947_v44  ;;  %vm1388_vm5 = vweird.f32 %v5506_v40 }
 0x519   : > { %v2624_v0 = vpop.permute.xlu0 %2623  ;;  %2715 = vst.msk [vmem:[%s4628_s16 + $0x18] sm:$0xff] %vm2711_vm0, %v2682_v9  ;;  %v5007_v29 = vpop.eup %3148  ;;  %v1369_v20 = vmul.f32 %v4988_v27, %v5504_v13  ;;  %vm5082_vm3 = vmor %vm1178_vm1, %vm1179_vm14  ;;  %v1483_v35 = vsub.f32 %v4475_v61, %v1337_v41  ;;  %vm1374_vm4 = vweird.f32 %v4988_v27  ;;  %vm1373_vm7 = vweird.f32 %v5504_v13 }
 0x51a   : > { %v2699_v8 = vsel %vm689_vm2, %v1480_v43, %v2624_v0  ;;  %v1101_v43 = vmul.f32 %v4907_v38, %v1100_v59  ;;  %v2634_v58 = vpop.permute.xlu2 %2633  ;;  %v5012_v57 = vpop.eup %3150  ;;  %v1384_v50 = vmul.f32 %v5007_v29, %v5506_v40  ;;  %v1411_v0 = vsel %vm1408_vm13, %v1410_v49, %v1406_v36  ;;  %vm5120_vm8 = vmor %vm1373_vm7, %vm1374_vm4 }
 0x51b   : > { %2732 = vst.msk [vmem:[%s4628_s16 + $0xa0] sm:$0xff] %vm2711_vm0, %v2699_v8  ;;  %v2704_v22 = vsel %vm689_vm2, %v1485_v5, %v2634_v58  ;;  %v1444_v33 = vmul.f32 %v5012_v57, %v5510_v10  ;;  %v1370_v39 = vsub.f32 1.0, %v1369_v20  ;;  %v5053_v30 = vpop.eup %3152  ;;  %v1110_v8 = vor.u32 1.1754944e-38, %v1109_v26  ;;  %v5522_v5 = vld [vmem:[#allocation27_spill] sm:$0xff] }
 0x51c   : > { %2737 = vst.msk [vmem:[%s4628_s16 + $0xc8] sm:$0xff] %vm2711_vm0, %v2704_v22  ;;  %v1102_v24 = vadd.f32 %v4907_v38, %v1101_v43  ;;  %v1385_v45 = vsub.f32 1.0, %v1384_v50  ;;  %v1144_v4 = vmul.f32 %v5053_v30, %v4045_v21  ;;  %v1412_v16 = vmul.f32 %v5522_v5, %v1411_v0 }
 0x51d   : > { %v1445_v3 = vsub.f32 1.0, %v1444_v33  ;;  %v1371_v15 = vmul.f32 %v4988_v27, %v1370_v39  ;;  %v5090_v22 = vmul.f32 %v5525_v6, %v1126_v11  ;;  %v5100_v37 = vpop.eup %3154  ;;  %v1377_v50 = vand.u32 2147483647, %v5504_v13 }
 0x51e   : > { %v1106_v34 = vsel %vm5057_vm12, %v4907_v38, %v1102_v24  ;;  %v1182_v38 = vand.u32 2147483647, %v5501_v12  ;;  %v1145_v11 = vsub.f32 1.0, %v1144_v4  ;;  %v1386_v18 = vmul.f32 %v5007_v29, %v1385_v45 }
 0x51f   : > { %v2626_v56 = vpop.permute.xlu1 %2625  ;;  %v1372_v44 = vadd.f32 %v4988_v27, %v1371_v15  ;;  %v1159_v33 = vmul.f32 %v5100_v37, %v5521_v51  ;;  %vm1449_vm9 = vweird.f32 %v5012_v57  ;;  %v1454_v26 = vand.u32 2147483648, %v5510_v10 }
 0x520   : > { %v2700_v48 = vsel %vm689_vm2, %v1481_v52, %v2626_v56  ;;  %v1107_v52 = vand.u32 2147483647, %v5494_v53  ;;  %v1177_v53 = vadd.f32 %v4939_v62, %v1176_v31  ;;  %vm1183_vm6 = vcmp.eq.f32.partialorder %v1182_v38, 8.507059e+37 }
 0x521   : > { %v2594_v42 = vpop.permute.xlu0 %2593  ;;  %2733 = vst.msk [vmem:[%s4628_s16 + $0xa8] sm:$0xff] %vm2711_vm0, %v2700_v48  ;;  %v1146_v49 = vmul.f32 %v5053_v30, %v1145_v11  ;;  %v1376_v39 = vsel %vm5120_vm8, %v4988_v27, %v1372_v44  ;;  %vm1448_vm10 = vweird.f32 %v5510_v10  ;;  %v1387_v1 = vadd.f32 %v5007_v29, %v1386_v18 }
 0x522   : > { %v2684_v59 = vsel %vm689_vm2, %v1465_v25, %v2594_v42  ;;  %v1184_v25 = vand.u32 2147483648, %v5501_v12  ;;  %v2604_v9 = vpop.permute.xlu2 %2603  ;;  %vm1108_vm15 = vcmp.eq.f32.partialorder %v1107_v52, 8.507059e+37  ;;  %v1446_v12 = vmul.f32 %v5012_v57, %v1445_v3  ;;  %v5529_v52 = vld [vmem:[#allocation29_spill] sm:$0xff]  ;;  %vm5140_vm13 = vmor %vm1448_vm10, %vm1449_vm9 }
 0x523   : > { %2717 = vst.msk [vmem:[%s4628_s16 + $0x28] sm:$0xff] %vm2711_vm0, %v2684_v59  ;;  %v2689_v28 = vsel %vm689_vm2, %v1470_v46, %v2604_v9  ;;  %v1111_v32 = vsel %vm1108_vm15, %v1110_v8, %v1106_v34  ;;  %v1181_v60 = vsel %vm5082_vm3, %v4939_v62, %v1177_v53  ;;  %v1488_v62 = vsub.f32 %v4475_v61, %v1412_v16  ;;  %v5534_v16 = vld [vmem:[#allocation38_spill] sm:$0xff] }
 0x524   : > { %2722 = vst.msk [vmem:[%s4628_s16 + $0x50] sm:$0xff] %vm2711_vm0, %v2689_v28  ;;  %v1185_v14 = vor.u32 1.1754944e-38, %v1184_v25  ;;  %v1112_v56 = vmul.f32 %v5526_v63, %v1111_v32  ;;  %v1447_v42 = vadd.f32 %v5012_v57, %v1446_v12  ;;  %vm1389_vm11 = vweird.f32 %v5007_v29 }
 0x525   : > { %vm1378_vm12 = vcmp.eq.f32.partialorder %v1377_v50, 8.507059e+37  ;;  %v1160_v9 = vsub.f32 1.0, %v1159_v33  ;;  %v1455_v3 = vor.u32 1.1754944e-38, %v1454_v26  ;;  %v1147_v28 = vadd.f32 %v5053_v30, %v1146_v49  ;;  %vm5163_vm1 = vmor %vm1388_vm5, %vm1389_vm11  ;;  %v5540_v33 = vld [vmem:[#allocation22_spill] sm:$0xff] }
 0x526   : > { %v1186_v31 = vsel %vm1183_vm6, %v1185_v14, %v1181_v60  ;;  %v1468_v27 = vsub.f32 %v4475_v61, %v1112_v56  ;;  %v1451_v53 = vsel %vm5140_vm13, %v5012_v57, %v1447_v42  ;;  %vm1149_vm14 = vweird.f32 %v5053_v30  ;;  %v5539_v56 = vld [vmem:[#allocation58_spill] sm:$0xff]  ;;  %v5541_v42 = vld [vmem:[#allocation52_spill] sm:$0xff] }
 0x527   : > { %v2596_v58 = vpop.permute.xlu1 %2595  ;;  %v1187_v46 = vmul.f32 %v5529_v52, %v1186_v31  ;;  %v1394_v8 = vand.u32 2147483648, %v5506_v40  ;;  %vm1453_vm15 = vcmp.eq.f32.partialorder %v1452_v7, 8.507059e+37  ;;  %v1154_v15 = vand.u32 2147483648, %v4045_v21 }
 0x528   : > { %v2685_v20 = vsel %vm689_vm2, %v1466_v23, %v2596_v58  ;;  %v1379_v23 = vand.u32 2147483648, %v5504_v13  ;;  %v1392_v13 = vand.u32 2147483647, %v5506_v40  ;;  %vm1148_vm3 = vweird.f32 %v4045_v21 }
 0x529   : > { %v2630_v54 = vpop.permute.xlu0 %2629  ;;  %2718 = vst.msk [vmem:[%s4628_s16 + $0x30] sm:$0xff] %vm2711_vm0, %v2685_v20  ;;  %v1473_v4 = vsub.f32 %v4475_v61, %v1187_v46  ;;  %v1152_v38 = vand.u32 2147483647, %v4045_v21  ;;  %v1456_v58 = vsel %vm1453_vm15, %v1455_v3, %v1451_v53  ;;  %vm5173_vm4 = vmor %vm1148_vm3, %vm1149_vm14  ;;  %v1161_v32 = vmul.f32 %v5100_v37, %v1160_v9  ;;  %v5538_v20 = vld [vmem:[#allocation44_spill] sm:$0xff] }
 0x52a   : > { %v2702_v55 = vsel %vm689_vm2, %v1483_v35, %v2630_v54  ;;  %v2640_v24 = vpop.permute.xlu2 %2639  ;;  %v1380_v59 = vor.u32 1.1754944e-38, %v1379_v23  ;;  %v5535_v35 = vld [vmem:[#allocation60_spill] sm:$0xff]  ;;  %v1391_v21 = vsel %vm5163_vm1, %v5007_v29, %v1387_v1  ;;  %v1151_v6 = vsel %vm5173_vm4, %v5053_v30, %v1147_v28 }
 0x52b   : > { %2735 = vst.msk [vmem:[%s4628_s16 + $0xb8] sm:$0xff] %vm2711_vm0, %v2702_v55  ;;  %v2707_v36 = vsel %vm689_vm2, %v1488_v62, %v2640_v24  ;;  %3156 = vrcp.f32 %v5535_v35  ;;  %v1395_v14 = vor.u32 1.1754944e-38, %v1394_v8  ;;  %v1155_v12 = vor.u32 1.1754944e-38, %v1154_v15 }
 0x52c   : > { %2740 = vst.msk [vmem:[%s4628_s16 + $0xe0] sm:$0xff] %vm2711_vm0, %v2707_v36  ;;  %v1381_v34 = vsel %vm1378_vm12, %v1380_v59, %v1376_v39  ;;  %v1457_v54 = vmul.f32 %v5538_v20, %v1456_v58  ;;  %vm1393_vm5 = vcmp.eq.f32.partialorder %v1392_v13, 8.507059e+37  ;;  %vm1153_vm6 = vcmp.eq.f32.partialorder %v1152_v38, 8.507059e+37 }
 0x52d   : > { %v1382_v43 = vmul.f32 %v5534_v16, %v1381_v34  ;;  %v1469_v60 = vsub.f32 %v4475_v61, %v5090_v22  ;;  %v1396_v29 = vsel %vm1393_vm5, %v1395_v14, %v1391_v21  ;;  %v1156_v18 = vsel %vm1153_vm6, %v1155_v12, %v1151_v6 }
 0x52e   : > { %v1162_v23 = vadd.f32 %v5100_v37, %v1161_v32  ;;  %vm1164_vm7 = vweird.f32 %v5100_v37  ;;  %vm1163_vm8 = vweird.f32 %v5521_v51  ;;  %v1169_v22 = vand.u32 2147483648, %v5521_v51 }
 0x52f   : > { %v2632_v25 = vpop.permute.xlu1 %2631  ;;  %v1486_v44 = vsub.f32 %v4475_v61, %v1382_v43  ;;  %v1491_v24 = vsub.f32 %v4475_v61, %v1457_v54  ;;  %v1167_v63 = vand.u32 2147483647, %v5521_v51  ;;  %3158 = vrcp.f32 %v5539_v56  ;;  %vm1165_vm9 = vmor %vm1163_vm8, %vm1164_vm7 }
 0x530   : > { %v2703_v0 = vsel %vm689_vm2, %v1484_v2, %v2632_v25  ;;  %v1397_v48 = vmul.f32 %v5540_v33, %v1396_v29  ;;  %v1157_v36 = vmul.f32 %v5541_v42, %v1156_v18  ;;  %3160 = vrcp.f32 %v4157_v47  ;;  %v5546_v33 = vld [vmem:[#allocation34_spill] sm:$0xff] }
 0x531   : > { %v2600_v10 = vpop.permute.xlu0 %2599  ;;  %2736 = vst.msk [vmem:[%s4628_s16 + $0xc0] sm:$0xff] %vm2711_vm0, %v2703_v0  ;;  %v3157_v50 = vpop.eup %3156  ;;  %v1166_v51 = vsel %vm1165_vm9, %v5100_v37, %v1162_v23  ;;  %v1170_v49 = vor.u32 1.1754944e-38, %v1169_v22  ;;  %vm1168_vm10 = vcmp.eq.f32.partialorder %v1167_v63, 8.507059e+37  ;;  %v5542_v37 = vld [vmem:[#allocation24_spill] sm:$0xff]  ;;  %3162 = vrcp.f32 %v4126_v19 }
 0x532   : > { %v2687_v45 = vsel %vm689_vm2, %v1468_v27, %v2600_v10  ;;  %v2610_v5 = vpop.permute.xlu2 %2609  ;;  %v1204_v26 = vmul.f32 %v3157_v50, %v5535_v35  ;;  %v1487_v39 = vsub.f32 %v4475_v61, %v1397_v48  ;;  %v1471_v59 = vsub.f32 %v4475_v61, %v1157_v36 }
 0x533   : > { %2720 = vst.msk [vmem:[%s4628_s16 + $0x40] sm:$0xff] %vm2711_vm0, %v2687_v45  ;;  %v2692_v40 = vsel %vm689_vm2, %v1473_v4, %v2610_v5  ;;  %v1171_v46 = vsel %vm1168_vm10, %v1170_v49, %v1166_v51  ;;  %vm1209_vm11 = vweird.f32 %v3157_v50  ;;  %v1214_v38 = vand.u32 2147483648, %v5535_v35 }
 0x534   : > { %2725 = vst.msk [vmem:[%s4628_s16 + $0x68] sm:$0xff] %vm2711_vm0, %v2692_v40  ;;  %v1205_v41 = vsub.f32 1.0, %v1204_v26  ;;  %v1172_v0 = vmul.f32 %v5542_v37, %v1171_v46  ;;  %vm1208_vm12 = vweird.f32 %v5535_v35  ;;  %v1212_v5 = vand.u32 2147483647, %v5535_v35 }
 0x535   : > { %v3159_v1 = vpop.eup %3158  ;;  %vm1210_vm13 = vmor %vm1208_vm12, %vm1209_vm11  ;;  %v1215_v40 = vor.u32 1.1754944e-38, %v1214_v38  ;;  %vm1433_vm3 = vweird.f32 %v5539_v56  ;;  %v1439_v12 = vand.u32 2147483648, %v5539_v56  ;;  %v1199_v35 = vand.u32 2147483648, %v4157_v47 }
 0x536   : > { %v3161_v9 = vpop.eup %3160  ;;  %v1429_v10 = vmul.f32 %v3159_v1, %v5539_v56  ;;  %v1206_v34 = vmul.f32 %v3157_v50, %v1205_v41  ;;  %v1472_v3 = vsub.f32 %v4475_v61, %v1172_v0  ;;  %vm1213_vm14 = vcmp.eq.f32.partialorder %v1212_v5, 8.507059e+37 }
 0x537   : > { %v2602_v11 = vpop.permute.xlu1 %2601  ;;  %v1189_v53 = vmul.f32 %v3161_v9, %v4157_v47  ;;  %v3163_v57 = vpop.eup %3162  ;;  %vm1434_vm15 = vweird.f32 %v3159_v1  ;;  %vm1194_vm1 = vweird.f32 %v3161_v9  ;;  %v1437_v54 = vand.u32 2147483647, %v5539_v56 }
 0x538   : > { %v2688_v30 = vsel %vm689_vm2, %v1469_v60, %v2602_v11  ;;  %v1430_v28 = vsub.f32 1.0, %v1429_v10  ;;  %v1207_v8 = vadd.f32 %v3157_v50, %v1206_v34  ;;  %v1414_v43 = vmul.f32 %v3163_v57, %v4126_v19  ;;  %vm5235_vm4 = vmor %vm1433_vm3, %vm1434_vm15 }
 0x539   : > { %v2636_v55 = vpop.permute.xlu0 %2635  ;;  %2721 = vst.msk [vmem:[%s4628_s16 + $0x48] sm:$0xff] %vm2711_vm0, %v2688_v30  ;;  %v1190_v15 = vsub.f32 1.0, %v1189_v53  ;;  %vm1193_vm5 = vweird.f32 %v4157_v47  ;;  %v1197_v60 = vand.u32 2147483647, %v4157_v47  ;;  %v1440_v23 = vor.u32 1.1754944e-38, %v1439_v12 }
 0x53a   : > { %v2705_v62 = vsel %vm689_vm2, %v1486_v44, %v2636_v55  ;;  %v2646_v31 = vpop.permute.xlu2 %2645  ;;  %v1431_v16 = vmul.f32 %v3159_v1, %v1430_v28  ;;  %v1211_v2 = vsel %vm1210_vm13, %v3157_v50, %v1207_v8  ;;  %v1415_v6 = vsub.f32 1.0, %v1414_v43  ;;  %v5545_v44 = vld [vmem:[#allocation37_spill] sm:$0xff]  ;;  %vm1195_vm6 = vmor %vm1193_vm5, %vm1194_vm1 }
 0x53b   : > { %2738 = vst.msk [vmem:[%s4628_s16 + $0xd0] sm:$0xff] %vm2711_vm0, %v2705_v62  ;;  %v2710_v13 = vsel %vm689_vm2, %v1491_v24, %v2646_v31  ;;  %v1191_v58 = vmul.f32 %v3161_v9, %v1190_v15  ;;  %v1216_v32 = vsel %vm1213_vm14, %v1215_v40, %v1211_v2  ;;  %v1200_v30 = vor.u32 1.1754944e-38, %v1199_v35 }
 0x53c   : > { %2743 = vst.msk [vmem:[%s4628_s16 + $0xf8] sm:$0xff] %vm2711_vm0, %v2710_v13  ;;  %v1432_v21 = vadd.f32 %v3159_v1, %v1431_v16  ;;  %v1217_v11 = vmul.f32 %v5545_v44, %v1216_v32  ;;  %v1416_v55 = vmul.f32 %v3163_v57, %v1415_v6  ;;  %vm1438_vm7 = vcmp.eq.f32.partialorder %v1437_v54, 8.507059e+37 }
 0x53d   : > { %v1192_v14 = vadd.f32 %v3161_v9, %v1191_v58  ;;  %vm1198_vm8 = vcmp.eq.f32.partialorder %v1197_v60, 8.507059e+37  ;;  %vm1419_vm9 = vweird.f32 %v3163_v57  ;;  %v1424_v56 = vand.u32 2147483648, %v4126_v19 }
 0x53e   : > { %v1436_v29 = vsel %vm5235_vm4, %v3159_v1, %v1432_v21  ;;  %v1475_v62 = vsub.f32 %v4475_v61, %v1217_v11  ;;  %v1417_v63 = vadd.f32 %v3163_v57, %v1416_v55  ;;  %vm1418_vm10 = vweird.f32 %v4126_v19 }
 0x53f   : > { %v2638_v7 = vpop.permute.xlu1 %2637  ;;  %v1196_v18 = vsel %vm1195_vm6, %v3161_v9, %v1192_v14  ;;  %v1441_v22 = vsel %vm1438_vm7, %v1440_v23, %v1436_v29  ;;  %v1422_v31 = vand.u32 2147483647, %v4126_v19  ;;  %vm1420_vm11 = vmor %vm1418_vm10, %vm1419_vm9  ;;  %v1425_v13 = vor.u32 1.1754944e-38, %v1424_v56 }
 0x540   : > { %v2706_v25 = vsel %vm689_vm2, %v1487_v39, %v2638_v7  ;;  %v1201_v24 = vsel %vm1198_vm8, %v1200_v30, %v1196_v18  ;;  %v1442_v48 = vmul.f32 %v5546_v33, %v1441_v22  ;;  %v1421_v36 = vsel %vm1420_vm11, %v3163_v57, %v1417_v63 }
 0x541   : > { %v2606_v52 = vpop.permute.xlu0 %2605  ;;  %2739 = vst.msk [vmem:[%s4628_s16 + $0xd8] sm:$0xff] %vm2711_vm0, %v2706_v25  ;;  %v1202_v42 = vmul.f32 %v4037_v17, %v1201_v24  ;;  %vm1423_vm12 = vcmp.eq.f32.partialorder %v1422_v31, 8.507059e+37  ;;  %v5547_v17 = vld [vmem:[#allocation62_spill] sm:$0xff] }
 0x542   : > { %v2690_v27 = vsel %vm689_vm2, %v1471_v59, %v2606_v52  ;;  %v1490_v26 = vsub.f32 %v4475_v61, %v1442_v48  ;;  %v1426_v59 = vsel %vm1423_vm12, %v1425_v13, %v1421_v36 }
 0x543   : > { %2723 = vst.msk [vmem:[%s4628_s16 + $0x58] sm:$0xff] %vm2711_vm0, %v2690_v27  ;;  %v1474_v51 = vsub.f32 %v4475_v61, %v1202_v42  ;;  %v1427_v52 = vmul.f32 %v5547_v17, %v1426_v59 }
 0x545   : > { %v1489_v46 = vsub.f32 %v4475_v61, %v1427_v52 }
 0x547   : > { %v2608_v45 = vpop.permute.xlu1 %2607 }
 0x548   : > { %v2691_v4 = vsel %vm689_vm2, %v1472_v3, %v2608_v45 }
 0x549   : > { %2724 = vst.msk [vmem:[%s4628_s16 + $0x60] sm:$0xff] %vm2711_vm0, %v2691_v4 }
 0x557   : > { %v2614_v50 = vpop.permute.xlu1 %2613 }
 0x558   : > { %v2694_v47 = vsel %vm689_vm2, %v1475_v62, %v2614_v50 }
 0x559   : > { %2727 = vst.msk [vmem:[%s4628_s16 + $0x78] sm:$0xff] %vm2711_vm0, %v2694_v47 }
 0x55f   : > { %v2644_v49 = vpop.permute.xlu1 %2643 }
 0x560   : > { %v2709_v7 = vsel %vm689_vm2, %v1490_v26, %v2644_v49 }
 0x561   : > { %v2612_v39 = vpop.permute.xlu0 %2611  ;;  %2742 = vst.msk [vmem:[%s4628_s16 + $0xf0] sm:$0xff] %vm2711_vm0, %v2709_v7 }
 0x562   : > { %v2693_v19 = vsel %vm689_vm2, %v1474_v51, %v2612_v39 }
 0x563   : > { %2726 = vst.msk [vmem:[%s4628_s16 + $0x70] sm:$0xff] %vm2711_vm0, %v2693_v19 }
 0x569   : > { %v2642_v1 = vpop.permute.xlu0 %2641 }
 0x56a   : > { %v2708_v41 = vsel %vm689_vm2, %v1489_v46, %v2642_v1 }
 0x56b   : > { %2741 = vst.msk [vmem:[%s4628_s16 + $0xe8] sm:$0xff] %vm2711_vm0, %v2708_v41 }
 0x56c PF: > { %s13_s12 = sadd.s32 1, %s3170_s12  }
 0x56d   : > { %p10_p4 = scmp.ge.s32.totalorder %s13_s12, 4  }
 0x56f   :  { %12 = sbr.rel (!%p10_p4) target bundleno = 1 (0x1), region = 65 }

</bundles_post_ra>
